<compile_context>
chip_gen: v6e
topology: v6e:2x2x1
jax: 0.10.0
libtpu: 0.0.40
codegen_flags: <defaults>
</compile_context>

<pallas_src>
import jax
import jax.numpy as jnp
from jax.experimental import pallas as pl
from jax.experimental.pallas import tpu as pltpu

LANE = 128


def _round_up(x, m):
    return (x + m - 1) // m * m


def _pick_row_tile(H, W, Fp, Cp):
    # Largest divisor of H whose working set (~a dozen (TH+2, W, max(Fp,Cp)) f32 live values plus
    # double-buffered IO tiles) stays a few MiB -- bounded well under v7x's 64 MiB VMEM -- while
    # keeping TH*W large enough to feed the MXU.
    budget = 8 * 2 ** 20
    per_row = 16 * W * max(Fp, Cp) * 4
    max_rows = max(1, budget // per_row)
    best = 1
    for d in range(1, H + 1):
        if H % d == 0 and d <= max_rows:
            best = d
    return best


def _gdfn_kernel(x_ref, xtop_ref, xbot_ref,
                 w1_ref, b1_ref, dwb1_ref,
                 w2_ref, b2_ref, dwb2_ref,
                 wo_ref, bo_ref, o_ref):
    """One (batch, row-tile) step of the gated-dconv FFN.

    x_ref:    (1, TH, W, Cp)  main rows of this tile
    xtop_ref: (1, 1,  W, Cp)  row above the tile (clamped at the image edge, masked in h-space)
    xbot_ref: (1, 1,  W, Cp)  row below the tile (clamped at the image edge, masked in h-space)
    w1/w2:    (Cp, Fp)        project_in weights, gate halves (bf16 or f32)
    b1/b2:    (1, Fp)         project_in bias halves (f32)
    dwb1/2:   (10, Fp)        rows 0..8 = 3x3 depthwise taps (tap index = dy*3 + dx), row 9 = dw bias
    wo:       (Fp, Cp)        project_out weight; bo: (1, Cp) bias (f32)
    o_ref:    (1, TH, W, Cp)
    """
    t = pl.program_id(1)
    nt = pl.num_programs(1)
    TH, W, Cp = x_ref.shape[1], x_ref.shape[2], x_ref.shape[3]
    Fp = w1_ref.shape[1]
    mm_dtype = w1_ref.dtype

    # ---- gather main rows + 1-row halos -> (TH+2, W, Cp) ----
    x_ext = jnp.concatenate([xtop_ref[0], x_ref[0], xbot_ref[0]], axis=0)
    x_mm = x_ext.reshape((TH + 2) * W, Cp).astype(mm_dtype)

    # ---- project_in: 1x1 conv == channel matmul on the MXU (one per gate half) ----
    h1 = jnp.dot(x_mm, w1_ref[...], preferred_element_type=jnp.float32) + b1_ref[...]
    h2 = jnp.dot(x_mm, w2_ref[...], preferred_element_type=jnp.float32) + b2_ref[...]
    h1 = h1.reshape(TH + 2, W, Fp)
    h2 = h2.reshape(TH + 2, W, Fp)

    # ---- zero the halo rows that fall outside the image (dwconv zero padding lives in h-space) ----
    lo = jnp.where(t == 0, 1, 0)               # first valid extended row
    hi = jnp.where(t == nt - 1, TH, TH + 1)    # last valid extended row
    row = jax.lax.broadcasted_iota(jnp.int32, (TH + 2, W, Fp), 0)
    valid = (row >= lo) & (row <= hi)
    h1 = jnp.where(valid, h1, 0.0)
    h2 = jnp.where(valid, h2, 0.0)

    # ---- depthwise 3x3 conv, padding=1: in-register shifted views (no padded VMEM scratch) ----
    zcol = jnp.zeros((TH + 2, 1, Fp), jnp.float32)

    def w_shifts(h):
        # columns of the zero-padded (pad=1) input: dx=0 -> h[:, x-1], dx=1 -> h[:, x], dx=2 -> h[:, x+1]
        return (jnp.concatenate([zcol, h[:, :W - 1, :]], axis=1),
                h,
                jnp.concatenate([h[:, 1:, :], zcol], axis=1))

    hs1 = w_shifts(h1)
    hs2 = w_shifts(h2)

    taps1 = dwb1_ref[...]                      # single (10, Fp) load, rows indexed in-register
    taps2 = dwb2_ref[...]
    # accumulator initialized with the depthwise bias (folded in, no separate add)
    acc1 = jnp.broadcast_to(taps1[9:10, :].reshape(1, 1, Fp), (TH, W, Fp))
    acc2 = jnp.broadcast_to(taps2[9:10, :].reshape(1, 1, Fp), (TH, W, Fp))
    for dy in range(3):
        for dx in range(3):
            i = dy * 3 + dx
            k1 = taps1[i:i + 1, :].reshape(1, 1, Fp)
            k2 = taps2[i:i + 1, :].reshape(1, 1, Fp)
            acc1 = acc1 + hs1[dx][dy:dy + TH, :, :] * k1
            acc2 = acc2 + hs2[dx][dy:dy + TH, :, :] * k2

    # ---- gated GELU (exact erf, matching torch F.gelu default) ----
    g = 0.5 * acc1 * (1.0 + jax.lax.erf(acc1 * 0.7071067811865476))
    gated = (g * acc2).reshape(TH * W, Fp).astype(mm_dtype)

    # ---- project_out: 1x1 conv == channel matmul on the MXU ----
    out = jnp.dot(gated, wo_ref[...], preferred_element_type=jnp.float32) + bo_ref[...]
    o_ref[0] = out.reshape(TH, W, Cp).astype(o_ref.dtype)


def feedforward_pallas(x_nhwc, params, *, row_tile=None, matmul_dtype=jnp.bfloat16):
    """Gated-DConv FFN. x_nhwc: (B, H, W, C) float32 -> (B, H, W, C).

    params are in the original (unpadded, fused-gate) layout produced by make_params:
      w_in (C, 2F), b_in (1, 2F), w_dw (9, 2F), b_dw (1, 2F), w_out (F, C), b_out (1, C)
    The wrapper splits the gate halves and zero-pads C and F up to multiples of 128 so every block
    the kernel touches is lane-dense; the pad channels stay exactly zero end-to-end and are sliced
    off before returning.
    """
    w_in, b_in, w_dw, b_dw, w_out, b_out = params
    B, H, W, C = x_nhwc.shape
    C2 = w_in.shape[1]
    F = C2 // 2
    Cp = _round_up(C, LANE)
    Fp = _round_up(F, LANE)

    if row_tile is None:
        row_tile = _pick_row_tile(H, W, Fp, Cp)
    assert H % row_tile == 0, (H, row_tile)
    TH = row_tile
    nt = H // TH

    def pad2(a, r, c):
        return jnp.pad(a, ((0, r - a.shape[0]), (0, c - a.shape[1])))

    f32 = jnp.float32
    w1 = pad2(w_in[:, :F], Cp, Fp).astype(matmul_dtype)
    w2 = pad2(w_in[:, F:], Cp, Fp).astype(matmul_dtype)
    b1 = pad2(b_in[:, :F], 1, Fp).astype(f32)
    b2 = pad2(b_in[:, F:], 1, Fp).astype(f32)
    dwb1 = pad2(jnp.concatenate([w_dw[:, :F], b_dw[:, :F]], axis=0), 10, Fp).astype(f32)
    dwb2 = pad2(jnp.concatenate([w_dw[:, F:], b_dw[:, F:]], axis=0), 10, Fp).astype(f32)
    wo = pad2(w_out, Fp, Cp).astype(matmul_dtype)
    bo = pad2(b_out, 1, Cp).astype(f32)

    xp = jnp.pad(x_nhwc, ((0, 0), (0, 0), (0, 0), (0, Cp - C)))

    # Halo rows: H block size 1 -> block index == row index; clamp at the image edges
    # (the kernel zero-masks those rows in h-space, matching the dwconv's zero padding).
    top_map = lambda b, t: (b, jnp.maximum(t * TH - 1, 0), 0, 0)
    bot_map = lambda b, t: (b, jnp.minimum(t * TH + TH, H - 1), 0, 0)

    grid_spec = pltpu.PrefetchScalarGridSpec(
        num_scalar_prefetch=0,
        grid=(B, nt),
        in_specs=[
            pl.BlockSpec((1, TH, W, Cp), lambda b, t: (b, t, 0, 0)),
            pl.BlockSpec((1, 1, W, Cp), top_map),
            pl.BlockSpec((1, 1, W, Cp), bot_map),
            pl.BlockSpec((Cp, Fp), lambda b, t: (0, 0)),
            pl.BlockSpec((1, Fp), lambda b, t: (0, 0)),
            pl.BlockSpec((10, Fp), lambda b, t: (0, 0)),
            pl.BlockSpec((Cp, Fp), lambda b, t: (0, 0)),
            pl.BlockSpec((1, Fp), lambda b, t: (0, 0)),
            pl.BlockSpec((10, Fp), lambda b, t: (0, 0)),
            pl.BlockSpec((Fp, Cp), lambda b, t: (0, 0)),
            pl.BlockSpec((1, Cp), lambda b, t: (0, 0)),
        ],
        out_specs=pl.BlockSpec((1, TH, W, Cp), lambda b, t: (b, t, 0, 0)),
    )

    # Explicit VMEM budget (v7x only has 64 MiB physical VMEM; stay well inside it).
    itemsize = jnp.dtype(matmul_dtype).itemsize
    weight_bytes = (2 * Cp * Fp + Fp * Cp) * itemsize + (2 * Fp + 2 * 10 * Fp + Cp) * 4
    io_bytes = 2 * 2 * (TH + 2) * W * Cp * 4            # double-buffered in/out row tiles (+ halos)
    live_bytes = 12 * (TH + 2) * (W + 2) * max(Fp, Cp) * 4
    vmem_limit = int(min(max(2 * (weight_bytes + io_bytes + live_bytes), 16 * 2 ** 20), 48 * 2 ** 20))

    out_padded = pl.pallas_call(
        _gdfn_kernel,
        out_shape=jax.ShapeDtypeStruct((B, H, W, Cp), x_nhwc.dtype),
        grid_spec=grid_spec,
        compiler_params=pltpu.CompilerParams(
            dimension_semantics=("parallel", "parallel"),
            vmem_limit_bytes=vmem_limit),
    )(xp, xp, xp, w1, b1, dwb1, w2, b2, dwb2, wo, bo)
    return out_padded[..., :C]


def feedforward_ref(x_nhwc, params):
    """Pure-JAX reference (NHWC), same math as the PyTorch FeedForward module."""
    w_in, b_in, w_dw, b_dw, w_out, b_out = params
    B, H, W, _ = x_nhwc.shape
    C2 = w_in.shape[1]
    F = C2 // 2
    h = jnp.einsum('bhwc,cd->bhwd', x_nhwc, w_in) + b_in[0]
    hp = jnp.pad(h, ((0, 0), (1, 1), (1, 1), (0, 0)))
    acc = jnp.zeros((B, H, W, C2), jnp.float32)
    for dy in range(3):
        for dx in range(3):
            acc = acc + hp[:, dy:dy + H, dx:dx + W, :] * w_dw[dy * 3 + dx][None, None, None, :]
    acc = acc + b_dw[0]
    x1, x2 = acc[..., :F], acc[..., F:]
    g = 0.5 * x1 * (1.0 + jax.lax.erf(x1 / jnp.sqrt(2.0)))
    return jnp.einsum('bhwf,fc->bhwc', g * x2, w_out) + b_out[0]


def make_params(key, dim, ffn_expansion_factor):
    """Deterministic synthetic parameters in kernel-friendly layouts.

    PyTorch shapes:
      project_in.weight  (2F, C, 1, 1) -> w_in  (C, 2F)
      dwconv.weight      (2F, 1, 3, 3) -> w_dw  (9, 2F)   [tap = dy*3+dx]
      project_out.weight (C,  F, 1, 1) -> w_out (F, C)
    """
    hidden = int(dim * ffn_expansion_factor)
    C2 = hidden * 2
    ks = jax.random.split(key, 6)
    w_in = 0.1 * jax.random.normal(ks[0], (dim, C2), jnp.float32)
    b_in = 0.1 * jax.random.normal(ks[1], (1, C2), jnp.float32)
    w_dw = 0.1 * jax.random.normal(ks[2], (9, C2), jnp.float32)
    b_dw = 0.1 * jax.random.normal(ks[3], (1, C2), jnp.float32)
    w_out = 0.1 * jax.random.normal(ks[4], (hidden, dim), jnp.float32)
    b_out = 0.1 * jax.random.normal(ks[5], (1, dim), jnp.float32)
    return (w_in, b_in, w_dw, b_dw, w_out, b_out)


if __name__ == "__main__":
    B, dim, H, W = 2, 16, 16, 16
    ffn_expansion_factor = 2.0  # hidden_features = 32, project_in -> 64 channels

    key = jax.random.PRNGKey(0)
    kx, kp = jax.random.split(key)
    params = make_params(kp, dim, ffn_expansion_factor)

    # PyTorch-style NCHW input, converted to the kernel's NHWC layout.
    x_nchw = jax.random.normal(kx, (B, dim, H, W), jnp.float32)
    x_nhwc = jnp.transpose(x_nchw, (0, 2, 3, 1))

    ref_nhwc = feedforward_ref(x_nhwc, params)

    # (a) f32 matmul inputs + explicit 2-row-tile grid (exercises the cross-tile halo path).
    out_f32 = feedforward_pallas(x_nhwc, params, row_tile=8, matmul_dtype=jnp.float32)
    out_f32 = jax.block_until_ready(out_f32)
    assert out_f32.shape == (B, H, W, dim)
    assert jnp.allclose(out_f32, ref_nhwc, atol=1e-4, rtol=1e-4), (
        float(jnp.max(jnp.abs(out_f32 - ref_nhwc))))

    # (b) default fast path: bf16 MXU inputs (f32 accumulation), auto row tile.
    #     Tolerance is loosened vs the f32 reference because of the bf16 matmul inputs.
    out_bf16 = feedforward_pallas(x_nhwc, params)
    out_bf16 = jax.block_until_ready(out_bf16)
    assert out_bf16.shape == (B, H, W, dim)
    assert jnp.allclose(out_bf16, ref_nhwc, atol=2e-2, rtol=2e-2), (
        float(jnp.max(jnp.abs(out_bf16 - ref_nhwc))))

    out_nchw = jnp.transpose(out_f32, (0, 3, 1, 2))  # back to NCHW
    assert out_nchw.shape == (B, dim, H, W)
    print("KERNEL_OK")
</pallas_src>

<mosaic_0001>
module attributes {stable_mosaic.version = 11 : i64} {
  func.func @_gdfn_kernel(%arg0: i32, %arg1: i32, %arg2: memref<1x8x16x128xf32, #tpu.memory_space<vmem>>, %arg3: memref<1x1x16x128xf32, #tpu.memory_space<vmem>>, %arg4: memref<1x1x16x128xf32, #tpu.memory_space<vmem>>, %arg5: memref<128x128xf32, #tpu.memory_space<vmem>>, %arg6: memref<1x128xf32, #tpu.memory_space<vmem>>, %arg7: memref<10x128xf32, #tpu.memory_space<vmem>>, %arg8: memref<128x128xf32, #tpu.memory_space<vmem>>, %arg9: memref<1x128xf32, #tpu.memory_space<vmem>>, %arg10: memref<10x128xf32, #tpu.memory_space<vmem>>, %arg11: memref<128x128xf32, #tpu.memory_space<vmem>>, %arg12: memref<1x128xf32, #tpu.memory_space<vmem>>, %arg13: memref<1x8x16x128xf32, #tpu.memory_space<vmem>>) attributes {dimension_semantics = [#tpu.dimension_semantics<parallel>, #tpu.dimension_semantics<parallel>], iteration_bounds = array<i64: 2, 2>, scalar_prefetch = 0 : i64, scratch_operands = 0 : i64, tpu.core_type = #tpu.core_type<tc>, window_params = [{transform_indices = @transform_0, window_bounds = array<i64: 1, 8, 16, 128>}, {transform_indices = @transform_1, window_bounds = array<i64: 1, 1, 16, 128>}, {transform_indices = @transform_2, window_bounds = array<i64: 1, 1, 16, 128>}, {pipeline_mode = #tpu.pipeline_mode<synchronous>, transform_indices = @transform_3, window_bounds = array<i64: 128, 128>}, {pipeline_mode = #tpu.pipeline_mode<synchronous>, transform_indices = @transform_4, window_bounds = array<i64: 1, 128>}, {pipeline_mode = #tpu.pipeline_mode<synchronous>, transform_indices = @transform_5, window_bounds = array<i64: 10, 128>}, {pipeline_mode = #tpu.pipeline_mode<synchronous>, transform_indices = @transform_6, window_bounds = array<i64: 128, 128>}, {pipeline_mode = #tpu.pipeline_mode<synchronous>, transform_indices = @transform_7, window_bounds = array<i64: 1, 128>}, {pipeline_mode = #tpu.pipeline_mode<synchronous>, transform_indices = @transform_8, window_bounds = array<i64: 10, 128>}, {pipeline_mode = #tpu.pipeline_mode<synchronous>, transform_indices = @transform_9, window_bounds = array<i64: 128, 128>}, {pipeline_mode = #tpu.pipeline_mode<synchronous>, transform_indices = @transform_10, window_bounds = array<i64: 1, 128>}, {transform_indices = @transform_11, window_bounds = array<i64: 1, 8, 16, 128>}]} {
    %c0 = arith.constant 0 : index
    %c0_0 = arith.constant 0 : index
    %c0_1 = arith.constant 0 : index
    %c0_2 = arith.constant 0 : index
    %0 = vector.load %arg3[%c0, %c0_0, %c0_1, %c0_2] : memref<1x1x16x128xf32, #tpu.memory_space<vmem>>, vector<1x1x16x128xf32>
    %1 = vector.shape_cast %0 : vector<1x1x16x128xf32> to vector<1x16x128xf32>
    %c0_3 = arith.constant 0 : index
    %c0_4 = arith.constant 0 : index
    %c0_5 = arith.constant 0 : index
    %c0_6 = arith.constant 0 : index
    %2 = vector.load %arg2[%c0_3, %c0_4, %c0_5, %c0_6] : memref<1x8x16x128xf32, #tpu.memory_space<vmem>>, vector<1x8x16x128xf32>
    %3 = vector.shape_cast %2 : vector<1x8x16x128xf32> to vector<8x16x128xf32>
    %c0_7 = arith.constant 0 : index
    %c0_8 = arith.constant 0 : index
    %c0_9 = arith.constant 0 : index
    %c0_10 = arith.constant 0 : index
    %4 = vector.load %arg4[%c0_7, %c0_8, %c0_9, %c0_10] : memref<1x1x16x128xf32, #tpu.memory_space<vmem>>, vector<1x1x16x128xf32>
    %5 = vector.shape_cast %4 : vector<1x1x16x128xf32> to vector<1x16x128xf32>
    %6 = tpu.concatenate %1, %3, %5 in 0 : vector<1x16x128xf32>, vector<8x16x128xf32>, vector<1x16x128xf32> -> vector<10x16x128xf32>
    %7 = vector.shape_cast %6 : vector<10x16x128xf32> to vector<160x128xf32>
    %c0_11 = arith.constant 0 : index
    %c0_12 = arith.constant 0 : index
    %8 = vector.load %arg5[%c0_11, %c0_12] : memref<128x128xf32, #tpu.memory_space<vmem>>, vector<128x128xf32>
    %cst = arith.constant dense<0.000000e+00> : vector<160x128xf32>
    %9 = tpu.matmul %7, %8, %cst {dimension_numbers = #tpu.dot_dimension_numbers<[1], [0], [0], [1], [0, 0, 1, 1], [], []>} : vector<160x128xf32>, vector<128x128xf32>, vector<160x128xf32> -> vector<160x128xf32>
    %c0_13 = arith.constant 0 : index
    %c0_14 = arith.constant 0 : index
    %10 = vector.load %arg6[%c0_13, %c0_14] : memref<1x128xf32, #tpu.memory_space<vmem>>, vector<1x128xf32>
    %11 = vector.broadcast %10 : vector<1x128xf32> to vector<160x128xf32>
    %12 = arith.addf %9, %11 : vector<160x128xf32>
    %c0_15 = arith.constant 0 : index
    %c0_16 = arith.constant 0 : index
    %13 = vector.load %arg8[%c0_15, %c0_16] : memref<128x128xf32, #tpu.memory_space<vmem>>, vector<128x128xf32>
    %cst_17 = arith.constant dense<0.000000e+00> : vector<160x128xf32>
    %14 = tpu.matmul %7, %13, %cst_17 {dimension_numbers = #tpu.dot_dimension_numbers<[1], [0], [0], [1], [0, 0, 1, 1], [], []>} : vector<160x128xf32>, vector<128x128xf32>, vector<160x128xf32> -> vector<160x128xf32>
    %c0_18 = arith.constant 0 : index
    %c0_19 = arith.constant 0 : index
    %15 = vector.load %arg9[%c0_18, %c0_19] : memref<1x128xf32, #tpu.memory_space<vmem>>, vector<1x128xf32>
    %16 = vector.broadcast %15 : vector<1x128xf32> to vector<160x128xf32>
    %17 = arith.addf %14, %16 : vector<160x128xf32>
    %18 = vector.shape_cast %12 : vector<160x128xf32> to vector<10x16x128xf32>
    %19 = vector.shape_cast %17 : vector<160x128xf32> to vector<10x16x128xf32>
    %c0_i32 = arith.constant 0 : i32
    %20 = arith.cmpi eq, %arg1, %c0_i32 : i32
    %c1_i32 = arith.constant 1 : i32
    %c0_i32_20 = arith.constant 0 : i32
    %21 = arith.select %20, %c1_i32, %c0_i32_20 : i32
    %c1_i32_21 = arith.constant 1 : i32
    %22 = arith.cmpi eq, %arg1, %c1_i32_21 : i32
    %c8_i32 = arith.constant 8 : i32
    %c9_i32 = arith.constant 9 : i32
    %23 = arith.select %22, %c8_i32, %c9_i32 : i32
    %24 = tpu.iota {dimensions = array<i32: 0>} : vector<10x16x128xi32>
    %25 = vector.broadcast %21 : i32 to vector<10x16x128xi32>
    %26 = arith.cmpi sge, %24, %25 : vector<10x16x128xi32>
    %27 = vector.broadcast %23 : i32 to vector<10x16x128xi32>
    %28 = arith.cmpi sle, %24, %27 : vector<10x16x128xi32>
    %29 = arith.andi %26, %28 : vector<10x16x128xi1>
    %cst_22 = arith.constant 0.000000e+00 : f32
    %30 = vector.broadcast %cst_22 : f32 to vector<10x16x128xf32>
    %31 = arith.select %29, %18, %30 : vector<10x16x128xi1>, vector<10x16x128xf32>
    %cst_23 = arith.constant 0.000000e+00 : f32
    %32 = vector.broadcast %cst_23 : f32 to vector<10x16x128xf32>
    %33 = arith.select %29, %19, %32 : vector<10x16x128xi1>, vector<10x16x128xf32>
    %cst_24 = arith.constant 0.000000e+00 : f32
    %34 = vector.broadcast %cst_24 : f32 to vector<10x1x128xf32>
    %35 = vector.extract_strided_slice %31 {offsets = [0, 0, 0], sizes = [10, 15, 128], strides = [1, 1, 1]} : vector<10x16x128xf32> to vector<10x15x128xf32>
    %36 = tpu.concatenate %34, %35 in 1 : vector<10x1x128xf32>, vector<10x15x128xf32> -> vector<10x16x128xf32>
    %37 = vector.extract_strided_slice %31 {offsets = [0, 1, 0], sizes = [10, 15, 128], strides = [1, 1, 1]} : vector<10x16x128xf32> to vector<10x15x128xf32>
    %38 = tpu.concatenate %37, %34 in 1 : vector<10x15x128xf32>, vector<10x1x128xf32> -> vector<10x16x128xf32>
    %39 = vector.extract_strided_slice %33 {offsets = [0, 0, 0], sizes = [10, 15, 128], strides = [1, 1, 1]} : vector<10x16x128xf32> to vector<10x15x128xf32>
    %40 = tpu.concatenate %34, %39 in 1 : vector<10x1x128xf32>, vector<10x15x128xf32> -> vector<10x16x128xf32>
    %41 = vector.extract_strided_slice %33 {offsets = [0, 1, 0], sizes = [10, 15, 128], strides = [1, 1, 1]} : vector<10x16x128xf32> to vector<10x15x128xf32>
    %42 = tpu.concatenate %41, %34 in 1 : vector<10x15x128xf32>, vector<10x1x128xf32> -> vector<10x16x128xf32>
    %c0_25 = arith.constant 0 : index
    %c0_26 = arith.constant 0 : index
    %43 = vector.load %arg7[%c0_25, %c0_26] : memref<10x128xf32, #tpu.memory_space<vmem>>, vector<10x128xf32>
    %c0_27 = arith.constant 0 : index
    %c0_28 = arith.constant 0 : index
    %44 = vector.load %arg10[%c0_27, %c0_28] : memref<10x128xf32, #tpu.memory_space<vmem>>, vector<10x128xf32>
    %45 = vector.extract_strided_slice %43 {offsets = [9, 0], sizes = [1, 128], strides = [1, 1]} : vector<10x128xf32> to vector<1x128xf32>
    %46 = vector.shape_cast %45 : vector<1x128xf32> to vector<1x1x128xf32>
    %47 = vector.shape_cast %46 : vector<1x1x128xf32> to vector<1x1x128xf32>
    %48 = vector.broadcast %47 : vector<1x1x128xf32> to vector<8x16x128xf32>
    %49 = vector.extract_strided_slice %44 {offsets = [9, 0], sizes = [1, 128], strides = [1, 1]} : vector<10x128xf32> to vector<1x128xf32>
    %50 = vector.shape_cast %49 : vector<1x128xf32> to vector<1x1x128xf32>
    %51 = vector.shape_cast %50 : vector<1x1x128xf32> to vector<1x1x128xf32>
    %52 = vector.broadcast %51 : vector<1x1x128xf32> to vector<8x16x128xf32>
    %53 = vector.extract_strided_slice %43 {offsets = [0, 0], sizes = [1, 128], strides = [1, 1]} : vector<10x128xf32> to vector<1x128xf32>
    %54 = vector.shape_cast %53 : vector<1x128xf32> to vector<1x1x128xf32>
    %55 = vector.extract_strided_slice %44 {offsets = [0, 0], sizes = [1, 128], strides = [1, 1]} : vector<10x128xf32> to vector<1x128xf32>
    %56 = vector.shape_cast %55 : vector<1x128xf32> to vector<1x1x128xf32>
    %57 = vector.extract_strided_slice %36 {offsets = [0, 0, 0], sizes = [8, 16, 128], strides = [1, 1, 1]} : vector<10x16x128xf32> to vector<8x16x128xf32>
    %58 = vector.broadcast %54 : vector<1x1x128xf32> to vector<8x16x128xf32>
    %59 = arith.mulf %57, %58 : vector<8x16x128xf32>
    %60 = arith.addf %48, %59 : vector<8x16x128xf32>
    %61 = vector.extract_strided_slice %40 {offsets = [0, 0, 0], sizes = [8, 16, 128], strides = [1, 1, 1]} : vector<10x16x128xf32> to vector<8x16x128xf32>
    %62 = vector.broadcast %56 : vector<1x1x128xf32> to vector<8x16x128xf32>
    %63 = arith.mulf %61, %62 : vector<8x16x128xf32>
    %64 = arith.addf %52, %63 : vector<8x16x128xf32>
    %65 = vector.extract_strided_slice %43 {offsets = [1, 0], sizes = [1, 128], strides = [1, 1]} : vector<10x128xf32> to vector<1x128xf32>
    %66 = vector.shape_cast %65 : vector<1x128xf32> to vector<1x1x128xf32>
    %67 = vector.extract_strided_slice %44 {offsets = [1, 0], sizes = [1, 128], strides = [1, 1]} : vector<10x128xf32> to vector<1x128xf32>
    %68 = vector.shape_cast %67 : vector<1x128xf32> to vector<1x1x128xf32>
    %69 = vector.extract_strided_slice %31 {offsets = [0, 0, 0], sizes = [8, 16, 128], strides = [1, 1, 1]} : vector<10x16x128xf32> to vector<8x16x128xf32>
    %70 = vector.broadcast %66 : vector<1x1x128xf32> to vector<8x16x128xf32>
    %71 = arith.mulf %69, %70 : vector<8x16x128xf32>
    %72 = arith.addf %60, %71 : vector<8x16x128xf32>
    %73 = vector.extract_strided_slice %33 {offsets = [0, 0, 0], sizes = [8, 16, 128], strides = [1, 1, 1]} : vector<10x16x128xf32> to vector<8x16x128xf32>
    %74 = vector.broadcast %68 : vector<1x1x128xf32> to vector<8x16x128xf32>
    %75 = arith.mulf %73, %74 : vector<8x16x128xf32>
    %76 = arith.addf %64, %75 : vector<8x16x128xf32>
    %77 = vector.extract_strided_slice %43 {offsets = [2, 0], sizes = [1, 128], strides = [1, 1]} : vector<10x128xf32> to vector<1x128xf32>
    %78 = vector.shape_cast %77 : vector<1x128xf32> to vector<1x1x128xf32>
    %79 = vector.extract_strided_slice %44 {offsets = [2, 0], sizes = [1, 128], strides = [1, 1]} : vector<10x128xf32> to vector<1x128xf32>
    %80 = vector.shape_cast %79 : vector<1x128xf32> to vector<1x1x128xf32>
    %81 = vector.extract_strided_slice %38 {offsets = [0, 0, 0], sizes = [8, 16, 128], strides = [1, 1, 1]} : vector<10x16x128xf32> to vector<8x16x128xf32>
    %82 = vector.broadcast %78 : vector<1x1x128xf32> to vector<8x16x128xf32>
    %83 = arith.mulf %81, %82 : vector<8x16x128xf32>
    %84 = arith.addf %72, %83 : vector<8x16x128xf32>
    %85 = vector.extract_strided_slice %42 {offsets = [0, 0, 0], sizes = [8, 16, 128], strides = [1, 1, 1]} : vector<10x16x128xf32> to vector<8x16x128xf32>
    %86 = vector.broadcast %80 : vector<1x1x128xf32> to vector<8x16x128xf32>
    %87 = arith.mulf %85, %86 : vector<8x16x128xf32>
    %88 = arith.addf %76, %87 : vector<8x16x128xf32>
    %89 = vector.extract_strided_slice %43 {offsets = [3, 0], sizes = [1, 128], strides = [1, 1]} : vector<10x128xf32> to vector<1x128xf32>
    %90 = vector.shape_cast %89 : vector<1x128xf32> to vector<1x1x128xf32>
    %91 = vector.extract_strided_slice %44 {offsets = [3, 0], sizes = [1, 128], strides = [1, 1]} : vector<10x128xf32> to vector<1x128xf32>
    %92 = vector.shape_cast %91 : vector<1x128xf32> to vector<1x1x128xf32>
    %93 = vector.extract_strided_slice %36 {offsets = [1, 0, 0], sizes = [8, 16, 128], strides = [1, 1, 1]} : vector<10x16x128xf32> to vector<8x16x128xf32>
    %94 = vector.broadcast %90 : vector<1x1x128xf32> to vector<8x16x128xf32>
    %95 = arith.mulf %93, %94 : vector<8x16x128xf32>
    %96 = arith.addf %84, %95 : vector<8x16x128xf32>
    %97 = vector.extract_strided_slice %40 {offsets = [1, 0, 0], sizes = [8, 16, 128], strides = [1, 1, 1]} : vector<10x16x128xf32> to vector<8x16x128xf32>
    %98 = vector.broadcast %92 : vector<1x1x128xf32> to vector<8x16x128xf32>
    %99 = arith.mulf %97, %98 : vector<8x16x128xf32>
    %100 = arith.addf %88, %99 : vector<8x16x128xf32>
    %101 = vector.extract_strided_slice %43 {offsets = [4, 0], sizes = [1, 128], strides = [1, 1]} : vector<10x128xf32> to vector<1x128xf32>
    %102 = vector.shape_cast %101 : vector<1x128xf32> to vector<1x1x128xf32>
    %103 = vector.extract_strided_slice %44 {offsets = [4, 0], sizes = [1, 128], strides = [1, 1]} : vector<10x128xf32> to vector<1x128xf32>
    %104 = vector.shape_cast %103 : vector<1x128xf32> to vector<1x1x128xf32>
    %105 = vector.extract_strided_slice %31 {offsets = [1, 0, 0], sizes = [8, 16, 128], strides = [1, 1, 1]} : vector<10x16x128xf32> to vector<8x16x128xf32>
    %106 = vector.broadcast %102 : vector<1x1x128xf32> to vector<8x16x128xf32>
    %107 = arith.mulf %105, %106 : vector<8x16x128xf32>
    %108 = arith.addf %96, %107 : vector<8x16x128xf32>
    %109 = vector.extract_strided_slice %33 {offsets = [1, 0, 0], sizes = [8, 16, 128], strides = [1, 1, 1]} : vector<10x16x128xf32> to vector<8x16x128xf32>
    %110 = vector.broadcast %104 : vector<1x1x128xf32> to vector<8x16x128xf32>
    %111 = arith.mulf %109, %110 : vector<8x16x128xf32>
    %112 = arith.addf %100, %111 : vector<8x16x128xf32>
    %113 = vector.extract_strided_slice %43 {offsets = [5, 0], sizes = [1, 128], strides = [1, 1]} : vector<10x128xf32> to vector<1x128xf32>
    %114 = vector.shape_cast %113 : vector<1x128xf32> to vector<1x1x128xf32>
    %115 = vector.extract_strided_slice %44 {offsets = [5, 0], sizes = [1, 128], strides = [1, 1]} : vector<10x128xf32> to vector<1x128xf32>
    %116 = vector.shape_cast %115 : vector<1x128xf32> to vector<1x1x128xf32>
    %117 = vector.extract_strided_slice %38 {offsets = [1, 0, 0], sizes = [8, 16, 128], strides = [1, 1, 1]} : vector<10x16x128xf32> to vector<8x16x128xf32>
    %118 = vector.broadcast %114 : vector<1x1x128xf32> to vector<8x16x128xf32>
    %119 = arith.mulf %117, %118 : vector<8x16x128xf32>
    %120 = arith.addf %108, %119 : vector<8x16x128xf32>
    %121 = vector.extract_strided_slice %42 {offsets = [1, 0, 0], sizes = [8, 16, 128], strides = [1, 1, 1]} : vector<10x16x128xf32> to vector<8x16x128xf32>
    %122 = vector.broadcast %116 : vector<1x1x128xf32> to vector<8x16x128xf32>
    %123 = arith.mulf %121, %122 : vector<8x16x128xf32>
    %124 = arith.addf %112, %123 : vector<8x16x128xf32>
    %125 = vector.extract_strided_slice %43 {offsets = [6, 0], sizes = [1, 128], strides = [1, 1]} : vector<10x128xf32> to vector<1x128xf32>
    %126 = vector.shape_cast %125 : vector<1x128xf32> to vector<1x1x128xf32>
    %127 = vector.extract_strided_slice %44 {offsets = [6, 0], sizes = [1, 128], strides = [1, 1]} : vector<10x128xf32> to vector<1x128xf32>
    %128 = vector.shape_cast %127 : vector<1x128xf32> to vector<1x1x128xf32>
    %129 = vector.extract_strided_slice %36 {offsets = [2, 0, 0], sizes = [8, 16, 128], strides = [1, 1, 1]} : vector<10x16x128xf32> to vector<8x16x128xf32>
    %130 = vector.broadcast %126 : vector<1x1x128xf32> to vector<8x16x128xf32>
    %131 = arith.mulf %129, %130 : vector<8x16x128xf32>
    %132 = arith.addf %120, %131 : vector<8x16x128xf32>
    %133 = vector.extract_strided_slice %40 {offsets = [2, 0, 0], sizes = [8, 16, 128], strides = [1, 1, 1]} : vector<10x16x128xf32> to vector<8x16x128xf32>
    %134 = vector.broadcast %128 : vector<1x1x128xf32> to vector<8x16x128xf32>
    %135 = arith.mulf %133, %134 : vector<8x16x128xf32>
    %136 = arith.addf %124, %135 : vector<8x16x128xf32>
    %137 = vector.extract_strided_slice %43 {offsets = [7, 0], sizes = [1, 128], strides = [1, 1]} : vector<10x128xf32> to vector<1x128xf32>
    %138 = vector.shape_cast %137 : vector<1x128xf32> to vector<1x1x128xf32>
    %139 = vector.extract_strided_slice %44 {offsets = [7, 0], sizes = [1, 128], strides = [1, 1]} : vector<10x128xf32> to vector<1x128xf32>
    %140 = vector.shape_cast %139 : vector<1x128xf32> to vector<1x1x128xf32>
    %141 = vector.extract_strided_slice %31 {offsets = [2, 0, 0], sizes = [8, 16, 128], strides = [1, 1, 1]} : vector<10x16x128xf32> to vector<8x16x128xf32>
    %142 = vector.broadcast %138 : vector<1x1x128xf32> to vector<8x16x128xf32>
    %143 = arith.mulf %141, %142 : vector<8x16x128xf32>
    %144 = arith.addf %132, %143 : vector<8x16x128xf32>
    %145 = vector.extract_strided_slice %33 {offsets = [2, 0, 0], sizes = [8, 16, 128], strides = [1, 1, 1]} : vector<10x16x128xf32> to vector<8x16x128xf32>
    %146 = vector.broadcast %140 : vector<1x1x128xf32> to vector<8x16x128xf32>
    %147 = arith.mulf %145, %146 : vector<8x16x128xf32>
    %148 = arith.addf %136, %147 : vector<8x16x128xf32>
    %149 = vector.extract_strided_slice %43 {offsets = [8, 0], sizes = [1, 128], strides = [1, 1]} : vector<10x128xf32> to vector<1x128xf32>
    %150 = vector.shape_cast %149 : vector<1x128xf32> to vector<1x1x128xf32>
    %151 = vector.extract_strided_slice %44 {offsets = [8, 0], sizes = [1, 128], strides = [1, 1]} : vector<10x128xf32> to vector<1x128xf32>
    %152 = vector.shape_cast %151 : vector<1x128xf32> to vector<1x1x128xf32>
    %153 = vector.extract_strided_slice %38 {offsets = [2, 0, 0], sizes = [8, 16, 128], strides = [1, 1, 1]} : vector<10x16x128xf32> to vector<8x16x128xf32>
    %154 = vector.broadcast %150 : vector<1x1x128xf32> to vector<8x16x128xf32>
    %155 = arith.mulf %153, %154 : vector<8x16x128xf32>
    %156 = arith.addf %144, %155 : vector<8x16x128xf32>
    %157 = vector.extract_strided_slice %42 {offsets = [2, 0, 0], sizes = [8, 16, 128], strides = [1, 1, 1]} : vector<10x16x128xf32> to vector<8x16x128xf32>
    %158 = vector.broadcast %152 : vector<1x1x128xf32> to vector<8x16x128xf32>
    %159 = arith.mulf %157, %158 : vector<8x16x128xf32>
    %160 = arith.addf %148, %159 : vector<8x16x128xf32>
    %cst_29 = arith.constant 5.000000e-01 : f32
    %161 = vector.broadcast %cst_29 : f32 to vector<8x16x128xf32>
    %162 = arith.mulf %161, %156 : vector<8x16x128xf32>
    %cst_30 = arith.constant 0.707106769 : f32
    %163 = vector.broadcast %cst_30 : f32 to vector<8x16x128xf32>
    %164 = arith.mulf %156, %163 : vector<8x16x128xf32>
    %165 = math.erf %164 : vector<8x16x128xf32>
    %cst_31 = arith.constant 1.000000e+00 : f32
    %166 = vector.broadcast %cst_31 : f32 to vector<8x16x128xf32>
    %167 = arith.addf %166, %165 : vector<8x16x128xf32>
    %168 = arith.mulf %162, %167 : vector<8x16x128xf32>
    %169 = arith.mulf %168, %160 : vector<8x16x128xf32>
    %170 = vector.shape_cast %169 : vector<8x16x128xf32> to vector<128x128xf32>
    %c0_32 = arith.constant 0 : index
    %c0_33 = arith.constant 0 : index
    %171 = vector.load %arg11[%c0_32, %c0_33] : memref<128x128xf32, #tpu.memory_space<vmem>>, vector<128x128xf32>
    %cst_34 = arith.constant dense<0.000000e+00> : vector<128x128xf32>
    %172 = tpu.matmul %170, %171, %cst_34 {dimension_numbers = #tpu.dot_dimension_numbers<[1], [0], [0], [1], [0, 0, 1, 1], [], []>} : vector<128x128xf32>, vector<128x128xf32>, vector<128x128xf32> -> vector<128x128xf32>
    %c0_35 = arith.constant 0 : index
    %c0_36 = arith.constant 0 : index
    %173 = vector.load %arg12[%c0_35, %c0_36] : memref<1x128xf32, #tpu.memory_space<vmem>>, vector<1x128xf32>
    %174 = vector.broadcast %173 : vector<1x128xf32> to vector<128x128xf32>
    %175 = arith.addf %172, %174 : vector<128x128xf32>
    %176 = vector.shape_cast %175 : vector<128x128xf32> to vector<8x16x128xf32>
    %c0_37 = arith.constant 0 : index
    %c0_38 = arith.constant 0 : index
    %c0_39 = arith.constant 0 : index
    %c0_40 = arith.constant 0 : index
    %177 = vector.load %arg13[%c0_37, %c0_38, %c0_39, %c0_40] : memref<1x8x16x128xf32, #tpu.memory_space<vmem>>, vector<1x8x16x128xf32>
    %178 = vector.shape_cast %177 : vector<1x8x16x128xf32> to vector<8x16x128xf32>
    %179 = vector.shape_cast %176 : vector<8x16x128xf32> to vector<1x8x16x128xf32>
    tpu.vector_store %arg13[%c0_37, %c0_38, %c0_39, %c0_40], %179 {strides = array<i32>} : memref<1x8x16x128xf32, #tpu.memory_space<vmem>>, vector<1x8x16x128xf32>,
    return
  }
  func.func @transform_0(%arg0: i32, %arg1: i32) -> (i32, i32, i32, i32) {
    %c0_i32 = arith.constant 0 : i32
    %c0_i32_0 = arith.constant 0 : i32
    %c0_i32_1 = arith.constant 0 : i32
    return %arg0, %arg1, %c0_i32, %c0_i32_0 : i32, i32, i32, i32
  }
  func.func @transform_1(%arg0: i32, %arg1: i32) -> (i32, i32, i32, i32) {
    %c8_i32 = arith.constant 8 : i32
    %0 = arith.muli %arg1, %c8_i32 : i32
    %c1_i32 = arith.constant 1 : i32
    %1 = arith.subi %0, %c1_i32 : i32
    %c0_i32 = arith.constant 0 : i32
    %2 = arith.maxsi %1, %c0_i32 : i32
    %c0_i32_0 = arith.constant 0 : i32
    %c0_i32_1 = arith.constant 0 : i32
    %c0_i32_2 = arith.constant 0 : i32
    return %arg0, %2, %c0_i32_0, %c0_i32_1 : i32, i32, i32, i32
  }
  func.func @transform_2(%arg0: i32, %arg1: i32) -> (i32, i32, i32, i32) {
    %c8_i32 = arith.constant 8 : i32
    %0 = arith.muli %arg1, %c8_i32 : i32
    %c8_i32_0 = arith.constant 8 : i32
    %1 = arith.addi %0, %c8_i32_0 : i32
    %c15_i32 = arith.constant 15 : i32
    %2 = arith.minsi %1, %c15_i32 : i32
    %c0_i32 = arith.constant 0 : i32
    %c0_i32_1 = arith.constant 0 : i32
    %c0_i32_2 = arith.constant 0 : i32
    return %arg0, %2, %c0_i32, %c0_i32_1 : i32, i32, i32, i32
  }
  func.func @transform_3(%arg0: i32, %arg1: i32) -> (i32, i32) {
    %c0_i32 = arith.constant 0 : i32
    %c0_i32_0 = arith.constant 0 : i32
    %c0_i32_1 = arith.constant 0 : i32
    return %c0_i32, %c0_i32_0 : i32, i32
  }
  func.func @transform_4(%arg0: i32, %arg1: i32) -> (i32, i32) {
    %c0_i32 = arith.constant 0 : i32
    %c0_i32_0 = arith.constant 0 : i32
    %c0_i32_1 = arith.constant 0 : i32
    return %c0_i32, %c0_i32_0 : i32, i32
  }
  func.func @transform_5(%arg0: i32, %arg1: i32) -> (i32, i32) {
    %c0_i32 = arith.constant 0 : i32
    %c0_i32_0 = arith.constant 0 : i32
    %c0_i32_1 = arith.constant 0 : i32
    return %c0_i32, %c0_i32_0 : i32, i32
  }
  func.func @transform_6(%arg0: i32, %arg1: i32) -> (i32, i32) {
    %c0_i32 = arith.constant 0 : i32
    %c0_i32_0 = arith.constant 0 : i32
    %c0_i32_1 = arith.constant 0 : i32
    return %c0_i32, %c0_i32_0 : i32, i32
  }
  func.func @transform_7(%arg0: i32, %arg1: i32) -> (i32, i32) {
    %c0_i32 = arith.constant 0 : i32
    %c0_i32_0 = arith.constant 0 : i32
    %c0_i32_1 = arith.constant 0 : i32
    return %c0_i32, %c0_i32_0 : i32, i32
  }
  func.func @transform_8(%arg0: i32, %arg1: i32) -> (i32, i32) {
    %c0_i32 = arith.constant 0 : i32
    %c0_i32_0 = arith.constant 0 : i32
    %c0_i32_1 = arith.constant 0 : i32
    return %c0_i32, %c0_i32_0 : i32, i32
  }
  func.func @transform_9(%arg0: i32, %arg1: i32) -> (i32, i32) {
    %c0_i32 = arith.constant 0 : i32
    %c0_i32_0 = arith.constant 0 : i32
    %c0_i32_1 = arith.constant 0 : i32
    return %c0_i32, %c0_i32_0 : i32, i32
  }
  func.func @transform_10(%arg0: i32, %arg1: i32) -> (i32, i32) {
    %c0_i32 = arith.constant 0 : i32
    %c0_i32_0 = arith.constant 0 : i32
    %c0_i32_1 = arith.constant 0 : i32
    return %c0_i32, %c0_i32_0 : i32, i32
  }
  func.func @transform_11(%arg0: i32, %arg1: i32) -> (i32, i32, i32, i32) {
    %c0_i32 = arith.constant 0 : i32
    %c0_i32_0 = arith.constant 0 : i32
    %c0_i32_1 = arith.constant 0 : i32
    return %arg0, %arg1, %c0_i32, %c0_i32_0 : i32, i32, i32, i32
  }
}

</mosaic_0001>

<bundles_post_ra>
// kernel: tpu_custom_call.1
= control target key start
LH: loop header
LB: loop body
LE: loop exit
PB: predicated region body
PF: predicated region fallthrough
CT: control target
= control target key end

     0   :  { %s5562_s0 = inlined_call_operand.hbm [shape: f32[2,16,16,128], index: 0, kind: input, shape index: {}]   ;;  %s5563_s1 = inlined_call_operand.hbm [shape: f32[2,16,16,128], index: 1, kind: input, shape index: {}]   ;;  %s5564_s2 = inlined_call_operand.hbm [shape: f32[2,16,16,128], index: 2, kind: input, shape index: {}]   ;;  %s5565_s3 = inlined_call_operand.hbm [shape: f32[128,128], index: 3, kind: input, shape index: {}]   ;;  %s5566_s4 = inlined_call_operand.vmem [shape: f32[1,128], index: 4, kind: input, shape index: {}]   ;;  %s5567_s5 = inlined_call_operand.hbm [shape: f32[10,128], index: 5, kind: input, shape index: {}]   ;;  %s5568_s6 = inlined_call_operand.hbm [shape: f32[128,128], index: 6, kind: input, shape index: {}]   ;;  %s5569_s7 = inlined_call_operand.vmem [shape: f32[1,128], index: 7, kind: input, shape index: {}]   ;;  %s5570_s8 = inlined_call_operand.hbm [shape: f32[10,128], index: 8, kind: input, shape index: {}]   ;;  %s5571_s9 = inlined_call_operand.hbm [shape: f32[128,128], index: 9, kind: input, shape index: {}]   ;;  %s5572_s10 = inlined_call_operand.vmem [shape: f32[1,128], index: 10, kind: input, shape index: {}]   ;;  %s5573_s11 = inlined_call_operand.hbm [shape: f32[2,16,16,128], index: 11, kind: output, shape index: {}]  }
   0x1   :  { %5644 = sst [smem:[#allocation157_spill]] %s5562_s0 }
   0x2   :  { %5645 = sst [smem:[#allocation158_spill]] %s5563_s1 }
   0x3   :  { %5646 = sst [smem:[#allocation159_spill]] %s5564_s2 }
   0x4   :  { %5647 = sst [smem:[#allocation160_spill]] %s5565_s3 }
   0x5   :  { %5648 = sst [smem:[#allocation161_spill]] %s5566_s4 }
   0x6   :  { %5649 = sst [smem:[#allocation162_spill]] %s5567_s5 }
   0x7   :  { %5650 = sst [smem:[#allocation163_spill]] %s5568_s6 }
   0x8   :  { %5651 = sst [smem:[#allocation164_spill]] %s5569_s7 }
   0x9   :  { %5652 = sst [smem:[#allocation165_spill]] %s5570_s8 }
   0xa   :  { %5653 = sst [smem:[#allocation166_spill]] %s5571_s9 }
   0xb   :  { %5654 = sst [smem:[#allocation167_spill]] %s5572_s10 }
   0xc   :  { %5655 = sst [smem:[#allocation168_spill]] %s5573_s11 }
   0xd   :  { %16 = vsyncpa [#allocation3], 0 }
   0xe   :  { %18 = vsyncpa [#allocation3 + $0x1], 0 }
   0xf   :  { %19 = vsyncpa [#allocation6], 0 }
  0x10   :  { %21 = vsyncpa [#allocation6 + $0x1], 0 }
  0x11   :  { %22 = vsyncpa [#allocation9], 0 }
  0x12   :  { %23 = vsyncpa [#allocation12], 0 }
  0x13   :  { %24 = vsyncpa [#allocation15], 0 }
  0x14   :  { %25 = vsyncpa [#allocation4], 0 }
  0x15   :  { %27 = vsyncpa [#allocation4 + $0x1], 0  ;;  %s3561_s17 = smov 0   ;;  %s3563_s18 = smov 0  }
  0x16   :  { %s3565_s19 = smov 0   ;;  %s3567_s20 = smov 0  }
  0x17   :  { %s3569_s21 = smov 0   ;;  %s3571_s22 = smov 0  }
  0x18   :  { %s3573_s23 = smov 0   ;;  %s3575_s24 = smov 0  }
  0x19   :  { %s3577_s25 = smov 0   ;;  %s3579_s26 = smov 0  }
  0x1a   :  { %s3581_s27 = smov 0   ;;  %s3583_s28 = smov 0  }
  0x1b   :  { %s3585_s29 = smov 0   ;;  %s3587_s30 = smov 0  }
  0x1c LB: > { %5656 = sst [smem:[#allocation24_spill]] %s3434_s17  ;;  %s3632_s12 = sadd.s32 4294967295, %s3486_s30   ;;  %s3486_s30 = sphi %s3587_s30, %s33_s30   ;;  %s3482_s29 = sphi %s3585_s29, %s6039_s29   ;;  %s3478_s28 = sphi %s3583_s28, %s6029_s28   ;;  %s3474_s27 = sphi %s3581_s27, %s6028_s27   ;;  %s3470_s26 = sphi %s3579_s26, %s6038_s26   ;;  %s3466_s25 = sphi %s3577_s25, %s6037_s25   ;;  %s3462_s24 = sphi %s3575_s24, %s6036_s24   ;;  %s3458_s23 = sphi %s3573_s23, %s6035_s23   ;;  %s3454_s22 = sphi %s3571_s22, %s6034_s22   ;;  %s3450_s21 = sphi %s3569_s21, %s6033_s21   ;;  %s3446_s20 = sphi %s3567_s20, %s6025_s20   ;;  %s3442_s19 = sphi %s3565_s19, %s6032_s19   ;;  %s3438_s18 = sphi %s3563_s18, %s6024_s18   ;;  %s3434_s17 = sphi %s3561_s17, %s6023_s17  }
  0x1d   : > { %5657 = sst [smem:[#allocation25_spill]] %s3438_s18  ;;  %p2522_p0 = scmp.ge.s32.totalorder %s3486_s30, 1 }
  0x1e   : > { %5658 = sst [smem:[#allocation26_spill]] %s3442_s19  ;;  %p5596_p1 = scmp.eq.s32.totalorder %s3632_s12, 0 }
  0x1f   : > { %5659 = sst [smem:[#allocation27_spill]] %s3450_s21  ;;  %p346_p2 = scmp.lt.s32.totalorder %s3486_s30, 5 }
  0x20   : > { %5660 = sst [smem:[#allocation28_spill]] %s3470_s26  ;;  %s3488_s14 = smov [#allocation8]  }
  0x21   : > { %5661 = sst [smem:[#allocation29_spill]] %s3474_s27  ;;  %p3637_p3 = pnand %p2522_p0, %p346_p2 }
  0x22   : > { %5662 = sst [smem:[#allocation30_spill]] %s3478_s28  ;;  %s358_s15 = sshll.u32 %s3488_s14, 4  ;;  %s359_s15 = int_to_ptr.vmem [resolvable:$true] %s358_s15 }
  0x23   : > { %5663 = sst [smem:[#allocation31_spill]] %s3482_s29  ;;  %p2911_p4 = pneg %p3637_p3 }
  0x24   : > { %s5664_s13 = scalar_select %p3637_p3, 1, 0 }
  0x25   : > { %p3645_p5 = pnand %p2911_p4, %p5596_p1  ;;  %s3489_s11 = smov [#allocation11]  }
  0x26   : > { %5665 = sst [smem:[#allocation32_spill]] %s5664_s13  ;;  %s387_s27 = sshll.u32 %s3489_s11, 4  ;;  %s388_s27 = int_to_ptr.vmem [resolvable:$true] %s387_s27 }
  0x27   : > { %p3651_p6 = pneg %p3645_p5  ;;  %s3119_s7 = scalar_lea.vmem %s359_s15, 2048 }
  0x28   : > { %p3120_p7 = scmp.ne.s32.totalorder %s359_s15, %s3119_s7  ;;  %p3127_p10 = scmp.lt.s32.totalorder %s359_s15, %s359_s15 }
  0x29   : > { %p3128_p11 = scmp.lt.s32.totalorder %s3119_s7, %s3119_s7 }
  0x2a   : > { %p3122_p8 = pnand %p3120_p7, %p3651_p6 }
  0x2b   : > { %p3129_p12 = por %p3128_p11, %p3127_p10 }
  0x2c   : > { %p3123_p9 = pneg %p3122_p8 }
  0x2e   : > { %p3130_p13 = pnand %p3129_p12, %p3123_p9 }
  0x30   : > { %3133 = shalt.err (!%p3130_p13)
}
  0x31   : > { %s5579_s14 = smov 128   ;;  %s5581_s11 = smov 8  }
  0x32   : > { %s5668_s3 = sld [smem:[#allocation160_spill]]  ;;  %s3145_s13 = scalar_lea.vmem %s388_s27, 2048 }
  0x33   : > { %p3146_p0 = scmp.ne.s32.totalorder %s388_s27, %s3145_s13  ;;  %p3153_p7 = scmp.lt.s32.totalorder %s388_s27, %s388_s27 }
  0x34   : > { %p3154_p8 = scmp.lt.s32.totalorder %s3145_s13, %s3145_s13 }
  0x35   : > { %p3148_p2 = pnand %p3146_p0, %p3651_p6 }
  0x36   : > { %p3155_p9 = por %p3154_p8, %p3153_p7 }
  0x37   : > { %p3149_p4 = pneg %p3148_p2 }
  0x38   : > { %2914 = dma.hbm_to_vmem [thread:$0]  (!%p3645_p5), %s5668_s3, 2048, %s359_s15, [#allocation9], %s5579_s14, %s5579_s14, %s5581_s11  }
  0x39   : > { %p3156_p10 = pnand %p3155_p9, %p3149_p4 }
  0x3b   : > { %3159 = shalt.err (!%p3156_p10)
}
  0x3c   : > { %s5669_s6 = sld [smem:[#allocation163_spill]]  ;;  %s42_s4 = sadd.s32 1, %s3478_s28 }
  0x3d   : > { %s45_s26 = sadd.s32 1, %s3482_s29  ;;  %p43_p11 = scmp.ge.s32.totalorder %s42_s4, 2 }
  0x3e   : > { %p5597_p12 = scmp.eq.s32.totalorder %s3486_s30, 0  ;;  %s2516_s13 = sshll.u32 %s3478_s28, 3 }
  0x3f   : > { %s90_s15 = sadd.s32 1, %s3454_s22  ;;  %s6041_s4 = smov (%p43_p11, %s42_s4), 0 }
  0x40   : > { %5670 = sst [smem:[#allocation33_spill]] %s6041_s4  ;;  %s6043_s26 = smov (!%p43_p11, %s45_s26), %s3482_s29 }
  0x41   : > { %s50_s2 = ssub.s32 %s3478_s28, %s6041_s4  ;;  %s2517_s7 = sadd.s32 4294967295, %s2516_s13 }
  0x42   : > { %2920 = dma.hbm_to_vmem [thread:$0]  (!%p3645_p5), %s5669_s6, 2048, %s388_s27, [#allocation12], %s5579_s14, %s5579_s14, %s5581_s11  }
  0x43   : > { %p47_p13 = scmp.ge.s32.totalorder %s6043_s26, 2  ;;  %p79_p0 = scmp.gt.s32.totalorder %s2517_s7, 0 }
  0x44   : > { %s2518_s27 = sshll.u32 %s6041_s4, 3  ;;  %p97_p2 = scmp.ne.s32.totalorder %s3454_s22, %s3450_s21 }
  0x45   : > { %s6045_s26 = smov (%p47_p13, %s6043_s26), 0  ;;  %s6047_s7 = smov (!%p79_p0, %s2517_s7), 0 }
  0x46   : > { %5671 = sst [smem:[#allocation34_spill]] %s6045_s26  ;;  %s3692_s14 = ssub.s32 %s3482_s29, %s6045_s26 }
  0x47   : > { %5672 = sst [smem:[#allocation35_spill]] %s3692_s14  ;;  %s2519_s11 = sadd.s32 4294967295, %s2518_s27 }
  0x48   : > { %s3695_s3 = sor.u32 %s50_s2, %s3692_s14  ;;  %p83_p4 = scmp.gt.s32.totalorder %s2519_s11, 0 }
  0x49   : > { %p52_p7 = scmp.eq.s32.totalorder %s3695_s3, 0  ;;  %p3700_p8 = por %p97_p2, %p5597_p12 }
  0x4a   : > { %s6049_s11 = smov (!%p83_p4, %s2519_s11), 0  ;;  %p103_p9 = scmp.ne.s32.totalorder %s3450_s21, %s3446_s20 }
  0x4b   : > { %s3706_s26 = sadd.s32 8, %s2516_s13  ;;  %s86_s4 = ssub.s32 %s6047_s7, %s6049_s11 }
  0x4c   : > { %5674 = sst [smem:[#allocation36_spill]] %s3706_s26  ;;  %s87_s2 = sor.u32 %s86_s4, %s3692_s14 }
  0x4d   : > { %p3712_p11 = por %p103_p9, %p5596_p1  ;;  %p88_p13 = scmp.eq.s32.totalorder %s87_s2, 0 }
  0x4e   : > { %s3716_s18 = sadd.s32 8, %s2518_s27  ;;  %p5595_p2 = scmp.lt.s32.totalorder %s3486_s30, 4 }
  0x4f   : > { %s5675_s17 = scalar_select %p3712_p11, 1, 0 }
  0x50   : > { %s3721_s20 = scalar_select %p88_p13, %s3454_s22, %s90_s15  }
  0x51   : > { %5676 = sst [smem:[#allocation37_spill]] %s5675_s17  ;;  %s3724_s13 = sshll.u32 %s3482_s29, 5 }
  0x52   : > { %5677 = sst [smem:[#allocation38_spill]] %s3721_s20  ;;  %s457_s11 = sand.u32 1, %s3486_s30  }
  0x53   : > { %s459_s4 = sand.u32 1, %s3454_s22   ;;  %s2537_s14 = sshll.u32 %s6047_s7, 1 }
  0x54   : > { %s2534_s21 = sshll.u32 %s459_s4, 4  ;;  %s471_s26 = sadd.s32 %s2537_s14, %s3724_s13 }
  0x55   : > { %s2539_s19 = sshll.u32 %s471_s26, 7  ;;  %s461_s17 = scalar_lea.vmem [#allocation5], %s2534_s21 }
  0x56   : > { %s474_s2 = sshll.u32 %s461_s17, 4  ;;  %s5678_s1 = sld [smem:[#allocation158_spill]]  ;;  %s475_s2 = int_to_ptr.vmem [resolvable:$true] %s474_s2 }
  0x57   : > { %p3736_p4 = pnand %p5595_p2, %p3700_p8  ;;  %s3492_s29 = smov [#allocation10]  }
  0x58   : > { %s374_s20 = sshll.u32 %s3492_s29, 4  ;;  %s3742_s14 = scalar_lea.sflag [#allocation6], %s457_s11  ;;  %s3740_s20 = int_to_ptr.vmem [resolvable:$true] %s374_s20 }
  0x59   : > { %p3162_p9 = pneg %p3736_p4  ;;  %s3173_s17 = scalar_lea.vmem %s475_s2, 256 }
  0x5a   : > { %p3174_p13 = scmp.ne.s32.totalorder %s475_s2, %s3173_s17  ;;  %s3493_s0 = smov [#allocation5]  }
  0x5b   : > { %s3178_s6 = sshll.u32 %s3493_s0, 4  ;;  %s3179_s6 = int_to_ptr.vmem [resolvable:$false] %s3178_s6 }
  0x5c   : > { %s473_s27 = scalar_lea.hbm %s5678_s1, %s2539_s19  ;;  %p3176_p0 = pnand %p3174_p13, %p3162_p9 }
  0x5d   : > { %s3180_s19 = scalar_lea.vmem %s3179_s6, 512  ;;  %p3181_p8 = scmp.lt.s32.totalorder %s475_s2, %s3179_s6 }
  0x5e   : > { %p3177_p10 = pneg %p3176_p0  ;;  %p3182_p2 = scmp.lt.s32.totalorder %s3180_s19, %s3173_s17 }
  0x60   : > { %p3183_p1 = por %p3182_p2, %p3181_p8 }
  0x62   : > { %p3184_p12 = pnand %p3183_p1, %p3177_p10 }
  0x64   : > { %3187 = shalt.err (!%p3184_p12)
}
  0x65   : > { %s5680_s21 = smov 8   ;;  %s5681_s28 = smov 128  }
  0x66   : > { %2933 = dma.hbm_to_vmem [thread:$0]  (!%p3736_p4), %s473_s27, 256, %s475_s2, %s3742_s14, %s5681_s28, %s5681_s28, %s5680_s21  }
  0x67   : > { %s3199_s29 = scalar_lea.vmem %s3740_s20, 256  ;;  %p3207_p2 = scmp.lt.s32.totalorder %s3740_s20, %s3740_s20 }
  0x68   : > { %p3200_p0 = scmp.ne.s32.totalorder %s3740_s20, %s3199_s29  ;;  %p3208_p1 = scmp.lt.s32.totalorder %s3199_s29, %s3199_s29 }
  0x6a   : > { %p3202_p9 = pnand %p3200_p0, %p3651_p6  ;;  %p3209_p12 = por %p3208_p1, %p3207_p2 }
  0x6c   : > { %p3203_p13 = pneg %p3202_p9 }
  0x6e   : > { %p3210_p10 = pnand %p3209_p12, %p3203_p13 }
  0x70   : > { %3213 = shalt.err (!%p3210_p10)
}
  0x71   : > { %s5682_s5 = sld [smem:[#allocation162_spill]]  ;;  %s3494_s11 = smov [#allocation13]  }
  0x72   : > { %s403_s4 = sshll.u32 %s3494_s11, 4  ;;  %s3495_s2 = smov [#allocation14]   ;;  %s404_s4 = int_to_ptr.vmem [resolvable:$true] %s403_s4 }
  0x73   : > { %s416_s27 = sshll.u32 %s3495_s2, 4  ;;  %s3225_s15 = scalar_lea.vmem %s404_s4, 256  ;;  %s417_s27 = int_to_ptr.vmem [resolvable:$true] %s416_s27 }
  0x74   : > { %p3226_p4 = scmp.ne.s32.totalorder %s404_s4, %s3225_s15  ;;  %p3233_p9 = scmp.lt.s32.totalorder %s404_s4, %s404_s4 }
  0x75   : > { %p3234_p13 = scmp.lt.s32.totalorder %s3225_s15, %s3225_s15 }
  0x76   : > { %p3228_p8 = pnand %p3226_p4, %p3651_p6 }
  0x77   : > { %2917 = dma.hbm_to_vmem [thread:$0]  (!%p3645_p5), %s5682_s5, 256, %s3740_s20, [#allocation9], %s5681_s28, %s5681_s28, %s5680_s21  }
  0x78   : > { %p3229_p0 = pneg %p3228_p8  ;;  %p3235_p2 = por %p3234_p13, %p3233_p9 }
  0x7a   : > { %p3236_p1 = pnand %p3235_p2, %p3229_p0 }
  0x7c   : > { %3239 = shalt.err (!%p3236_p1)
}
  0x7d   : > { %s5683_s8 = sld [smem:[#allocation165_spill]]  ;;  %s3251_s0 = scalar_lea.vmem %s417_s27, 2048 }
  0x7e   : > { %p3252_p12 = scmp.ne.s32.totalorder %s417_s27, %s3251_s0  ;;  %p3259_p8 = scmp.lt.s32.totalorder %s417_s27, %s417_s27 }
  0x7f   : > { %p3260_p9 = scmp.lt.s32.totalorder %s3251_s0, %s3251_s0 }
  0x80   : > { %p3254_p10 = pnand %p3252_p12, %p3651_p6 }
  0x81   : > { %p3261_p0 = por %p3260_p9, %p3259_p8 }
  0x82   : > { %p3255_p4 = pneg %p3254_p10 }
  0x83   : > { %2923 = dma.hbm_to_vmem [thread:$0]  (!%p3645_p5), %s5683_s8, 256, %s404_s4, [#allocation12], %s5681_s28, %s5681_s28, %s5680_s21  }
  0x84   : > { %p3262_p13 = pnand %p3261_p0, %p3255_p4 }
  0x86   : > { %3265 = shalt.err (!%p3262_p13)
}
  0x87   : > { %s5684_s9 = sld [smem:[#allocation166_spill]]  ;;  %s2515_s16 = sadd.s32 4294967294, %s3486_s30  }
  0x88   : > { %s5685_s10 = sld [smem:[#allocation30_spill]]  ;;  %s54_s29 = sadd.s32 1, %s3466_s25 }
  0x89   : > { %p61_p6 = scmp.ne.s32.totalorder %s3466_s25, %s3462_s24  ;;  %p5686_p2 = scmp.eq.s32.totalorder %s3486_s30, 0 }
  0x8a   : > { %s3794_s26 = scalar_select %p52_p7, %s3466_s25, %s54_s29  }
  0x8b   : > { %p3798_p1 = por %p5686_p2, %p61_p6  ;;  %p67_p12 = scmp.ne.s32.totalorder %s3462_s24, %s3458_s23 }
  0x8c   : > { %p333_p10 = scmp.eq.s32.totalorder %s3632_s12, 3  ;;  %p339_p4 = scmp.eq.s32.totalorder %s2515_s16, 3 }
  0x8d   : > { %2926 = dma.hbm_to_vmem [thread:$0]  (!%p3645_p5), %s5684_s9, 2048, %s417_s27, [#allocation15], %s5681_s28, %s5681_s28, %s5680_s21  }
  0x8e   : > { %p5688_p8 = scmp.eq.s32.totalorder %s3632_s12, 0  ;;  %s433_s4 = sand.u32 1, %s3466_s25  }
  0x8f   : > { %p3812_p5 = por %p333_p10, %p61_p6  ;;  %p3816_p7 = por %p339_p4, %p67_p12 }
  0x90   : > { %p3807_p9 = por %p5688_p8, %p67_p12  ;;  %s2529_s27 = sshll.u32 %s433_s4, 7 }
  0x91   : > { %s5690_s3 = scalar_select %p3812_p5, 1, 0 }
  0x92   : > { %s5691_s2 = scalar_select %p3816_p7, 1, 0 }
  0x93   : > { %s2565_s15 = sshll.u32 %s5685_s10, 4  ;;  %s437_s17 = scalar_lea.vmem [#allocation2], %s2529_s27 }
  0x94   : > { %s444_s20 = sadd.s32 %s2565_s15, %s3724_s13  ;;  %s447_s0 = sshll.u32 %s437_s17, 4  ;;  %s448_s0 = int_to_ptr.vmem [resolvable:$true] %s447_s0 }
  0x95   : > { %s2533_s6 = sshll.u32 %s444_s20, 7  ;;  %s5692_s29 = sld [smem:[#allocation157_spill]] }
  0x96   : > { %p5693_p0 = scmp.lt.s32.totalorder %s3486_s30, 4  ;;  %s434_s8 = scalar_lea.sflag [#allocation3], %s433_s4 }
  0x97   : > { %s3279_s10 = scalar_lea.vmem %s448_s0, 2048  ;;  %s3496_s27 = smov [#allocation2]  }
  0x98   : > { %p3829_p13 = pnand %p5693_p0, %p3798_p1  ;;  %p3280_p2 = scmp.ne.s32.totalorder %s448_s0, %s3279_s10 }
  0x99   : > { %s3284_s15 = sshll.u32 %s3496_s27, 4  ;;  %s3285_s15 = int_to_ptr.vmem [resolvable:$false] %s3284_s15 }
  0x9a   : > { %p3268_p6 = pneg %p3829_p13  ;;  %s3286_s20 = scalar_lea.vmem %s3285_s15, 4096 }
  0x9b   : > { %s446_s1 = scalar_lea.hbm %s5692_s29, %s2533_s6  ;;  %p3287_p4 = scmp.lt.s32.totalorder %s448_s0, %s3285_s15 }
  0x9c   : > { %p3282_p12 = pnand %p3280_p2, %p3268_p6  ;;  %p3288_p8 = scmp.lt.s32.totalorder %s3286_s20, %s3279_s10 }
  0x9e   : > { %p3283_p10 = pneg %p3282_p12  ;;  %p3289_p7 = por %p3288_p8, %p3287_p4 }
  0xa0   : > { %p3290_p5 = pnand %p3289_p7, %p3283_p10 }
  0xa2   : > { %3293 = shalt.err (!%p3290_p5)
}
  0xa3   : > { %s5695_s7 = sld [smem:[#allocation26_spill]]  ;;  %p5701_p5 = scmp.lt.s32.totalorder %s3716_s18, 15 }
  0xa4   : > { %s5696_s4 = sld [smem:[#allocation36_spill]]  ;;  %p5702_p6 = scmp.eq.s32.totalorder %s3486_s30, 0 }
  0xa5   : > { %s5697_s17 = sld [smem:[#allocation25_spill]]  ;;  %s6053_s18 = smov (!%p5701_p5, %s3716_s18), 15 }
  0xa6   : > { %s5698_s6 = sld [smem:[#allocation24_spill]]  ;;  %p5703_p10 = scmp.eq.s32.totalorder %s3632_s12, 0 }
  0xa7   : > { %s5699_s19 = sld [smem:[#allocation35_spill]] }
  0xa8   : > { %2930 = dma.hbm_to_vmem [thread:$0]  (!%p3829_p13), %s446_s1, 2048, %s448_s0, %s434_s8, %s5681_s28, %s5681_s28, %s5680_s21  }
  0xa9   : > { %s126_s5 = sadd.s32 1, %s5695_s7  ;;  %s486_s29 = sand.u32 1, %s5695_s7  }
  0xaa   : > { %p5700_p1 = scmp.lt.s32.totalorder %s5696_s4, 15  ;;  %s2540_s1 = sshll.u32 %s486_s29, 4 }
  0xab   : > { %p133_p7 = scmp.ne.s32.totalorder %s5695_s7, %s5697_s17  ;;  %s488_s20 = scalar_lea.vmem [#allocation7], %s2540_s1 }
  0xac   : > { %s6051_s4 = smov (!%p5700_p1, %s5696_s4), 15  ;;  %p139_p0 = scmp.ne.s32.totalorder %s5697_s17, %s5698_s6 }
  0xad   : > { %s122_s16 = ssub.s32 %s6051_s4, %s6053_s18  ;;  %p135_p2 = por %p133_p7, %p5702_p6 }
  0xae   : > { %s123_s10 = sor.u32 %s122_s16, %s5699_s19  ;;  %p3857_p4 = por %p139_p0, %p5703_p10 }
  0xaf   : > { %p124_p12 = scmp.eq.s32.totalorder %s123_s10, 0  ;;  %s2542_s8 = sshll.u32 %s6051_s4, 1 }
  0xb0   : > { %s5704_s27 = scalar_select %p3857_p4, 1, 0 }
  0xb1   : > { %s6055_s7 = smov (!%p124_p12, %s5695_s7), %s126_s5  ;;  %s498_s0 = sadd.s32 %s2542_s8, %s3724_s13 }
  0xb2   : > { %s2544_s15 = sshll.u32 %s498_s0, 7  ;;  %s501_s17 = sshll.u32 %s488_s20, 4  ;;  %s502_s17 = int_to_ptr.vmem [resolvable:$true] %s501_s17 }
  0xb3   : > { %s5705_s9 = sld [smem:[#allocation159_spill]]  ;;  %p5706_p13 = scmp.lt.s32.totalorder %s3486_s30, 4 }
  0xb4   : > { %s3307_s4 = scalar_lea.vmem %s502_s17, 256  ;;  %s3497_s13 = smov [#allocation7]  }
  0xb5   : > { %p3870_p8 = pnand %p5706_p13, %p135_p2  ;;  %p3308_p5 = scmp.ne.s32.totalorder %s502_s17, %s3307_s4 }
  0xb6   : > { %s3312_s5 = sshll.u32 %s3497_s13, 4  ;;  %s3313_s5 = int_to_ptr.vmem [resolvable:$false] %s3312_s5 }
  0xb7   : > { %p3296_p1 = pneg %p3870_p8  ;;  %s3314_s29 = scalar_lea.vmem %s3313_s5, 512 }
  0xb8   : > { %p3315_p6 = scmp.lt.s32.totalorder %s502_s17, %s3313_s5  ;;  %p3316_p12 = scmp.lt.s32.totalorder %s3314_s29, %s3307_s4 }
  0xb9   : > { %s500_s19 = scalar_lea.hbm %s5705_s9, %s2544_s15  ;;  %p3310_p7 = pnand %p3308_p5, %p3296_p1 }
  0xba   : > { %p3317_p10 = por %p3316_p12, %p3315_p6 }
  0xbb   : > { %p3311_p0 = pneg %p3310_p7 }
  0xbd   : > { %p3318_p4 = pnand %p3317_p10, %p3311_p0 }
  0xbf   : > { %3321 = shalt.err (!%p3318_p4)
}
  0xc0   : > { %2936 = dma.hbm_to_vmem [thread:$0]  (!%p3870_p8), %s500_s19, 256, %s502_s17, %s3742_s14, %s5681_s28, %s5681_s28, %s5680_s21  }
  0xc1   : > { %513 = sbr.rel (%p3637_p3) target bundleno = 914 (0x392), region = 64 }
  0xc6   : > { %s3885_s10 = sand.u32 1, %s3462_s24  }
  0xc7   : > { %s2546_s1 = sshll.u32 %s3885_s10, 7  ;;  %s516_s8 = scalar_lea.sflag [#allocation3], %s3885_s10 }
  0xc8   : > { %s3891_s0 = scalar_lea.vmem [#allocation2], %s2546_s1 }
  0xc9   : > { %3405 = dma.done.wait (%p3807_p9), %s516_s8, 2048  }
  0xca   : > { %3407 = vsyncadd (%p3807_p9), %s516_s8, 4294965248  ;;  %s5709_s14 = sld [smem:[#allocation27_spill]]  ;;  %s524_s28 = sand.u32 1, %s3632_s12  }
  0xcb   : > { %s525_s17 = scalar_lea.sflag [#allocation6], %s524_s28 }
  0xd0   : > { %s526_s15 = sand.u32 1, %s5709_s14  }
  0xd1   : > { %s3899_s20 = sshll.u32 %s526_s15, 4 }
  0xd2   : > { %s528_s6 = scalar_lea.vmem [#allocation5], %s3899_s20 }
  0xd3   : > { %3409 = dma.done.wait (%p3712_p11), %s525_s17, 256  }
  0xd4   : > { %3411 = vsyncadd (%p3712_p11), %s525_s17, 4294967040  ;;  %s5711_s18 = sld [smem:[#allocation25_spill]]  ;;  %p5712_p3 = scmp.ne.s32.totalorder %s5704_s27, 0 }
  0xda   : > { %s535_s19 = sand.u32 1, %s5711_s18  }
  0xdb   : > { %s3907_s11 = sshll.u32 %s535_s19, 4 }
  0xdc   : > { %s537_s16 = scalar_lea.vmem [#allocation7], %s3907_s11 }
  0xdd   : > { %3413 = dma.done.wait (%p5712_p3), %s525_s17, 256  }
  0xde   : > { %3415 = vsyncadd (%p5712_p3), %s525_s17, 4294967040  ;;  %p5713_p9 = scmp.eq.s32.totalorder %s3632_s12, 0 }
  0xe0   : > { %3417 = dma.done.wait (%p5713_p9), [#allocation9], 2304   ;;  %p5714_p2 = pmov %p5713_p9 }
  0xe2   : > { %3419 = vsyncadd (%p5714_p2), [#allocation9], 4294964992  ;;  %p5715_p11 = pmov %p5714_p2 }
  0xe3   : > { %p5716_p4 = pmov %p5714_p2 }
  0xe4   : > { %3421 = dma.done.wait (%p5715_p11), [#allocation12], 2304  }
  0xe5   : > { %3423 = vsyncadd (%p5716_p4), [#allocation12], 4294964992  ;;  %p5717_p13 = pmov %p5714_p2 }
  0xe6   : > { %p5718_p8 = pmov %p5714_p2 }
  0xe7   : > { %3425 = dma.done.wait (%p5717_p13), [#allocation15], 2048  }
  0xe8   : > { %3427 = vsyncadd (%p5718_p8), [#allocation15], 4294965248  ;;  %v651_v0 = vld [vmem:[#allocation8 + $0x78] sm:$0xff]  ;;  %v650_v1 = vld [vmem:[#allocation8 + $0x70] sm:$0xff]  ;;  %s5719_s12 = sld [smem:[#allocation28_spill]]  ;;  %v1374_v63 = vlaneseq  ;;  %vm1108_vm3 = vcmask 1040384  }
  0xe9   : > { %2671 = vmatprep.subr.mxu0 %v651_v0  ;;  %v839_v2 = vld [vmem:[#allocation11 + $0x78] sm:$0xff]  ;;  %v838_v4 = vld [vmem:[#allocation11 + $0x70] sm:$0xff]  ;;  %v837_v5 = vld [vmem:[#allocation11 + $0x68] sm:$0xff]  ;;  %s5720_s29 = sld [smem:[#allocation161_spill]]  ;;  %vm1169_vm7 = vcmask 1046528   ;;  %s5459_s19 = scalar_lea.vmem [#allocation16], %s2546_s1 }
  0xea   : > { %2672 = vmatpush3.msra.mxu0 %v651_v0  ;;  %v649_v3 = vld [vmem:[#allocation8 + $0x68] sm:$0xff]  ;;  %2733 = vmatprep.subr.mxu1 %v839_v2  ;;  %v648_v6 = vld [vmem:[#allocation8 + $0x60] sm:$0xff]  ;;  %v836_v7 = vld [vmem:[#allocation11 + $0x60] sm:$0xff]  ;;  %s5727_s14 = sld [smem:[#allocation164_spill]]  ;;  %s2311_s21 = scalar_lea.sflag [#allocation4], %s3885_s10 }
  0xeb   : > { %2673 = vmatprep.subr.mxu0 %v650_v1  ;;  %2734 = vmatpush3.msra.mxu1 %v839_v2  ;;  %v647_v8 = vld [vmem:[#allocation8 + $0x58] sm:$0xff]  ;;  %v835_v9 = vld [vmem:[#allocation11 + $0x58] sm:$0xff]  ;;  %v646_v10 = vld [vmem:[#allocation8 + $0x50] sm:$0xff]  ;;  %s6016_s18 = sld [smem:[#allocation167_spill]]  ;;  %p6020_p0 = scmp.ne.s32.totalorder %s5690_s3, 0 }
  0xec   : > { %2674 = vmatpush3.msra.mxu0 %v650_v1  ;;  %2735 = vmatprep.subr.mxu1 %v838_v4  ;;  %v834_v11 = vld [vmem:[#allocation11 + $0x50] sm:$0xff]  ;;  %v645_v12 = vld [vmem:[#allocation8 + $0x48] sm:$0xff]  ;;  %v833_v13 = vld [vmem:[#allocation11 + $0x48] sm:$0xff]  ;;  %v3963_v1 = vshrl.u32 %v1374_v63, 7  ;;  %s6017_s1 = sld [smem:[#allocation29_spill]]  ;;  %s3498_s15 = smov [#allocation16]  }
  0xed   : > { %2675 = vmatprep.subr.mxu0 %v649_v3  ;;  %2736 = vmatpush3.msra.mxu1 %v838_v4  ;;  %v644_v14 = vld [vmem:[#allocation8 + $0x40] sm:$0xff]  ;;  %v832_v15 = vld [vmem:[#allocation11 + $0x40] sm:$0xff]  ;;  %v643_v16 = vld [vmem:[#allocation8 + $0x38] sm:$0xff]  ;;  %s3326_s20 = sshll.u32 %s3498_s15, 4  ;;  %s3327_s20 = int_to_ptr.vmem [resolvable:$false] %s3326_s20 }
  0xee   : > { %2676 = vmatpush3.msra.mxu0 %v649_v3  ;;  %2737 = vmatprep.subr.mxu1 %v837_v5  ;;  %v831_v17 = vld [vmem:[#allocation11 + $0x38] sm:$0xff]  ;;  %v642_v18 = vld [vmem:[#allocation8 + $0x30] sm:$0xff]  ;;  %v830_v19 = vld [vmem:[#allocation11 + $0x30] sm:$0xff]  ;;  %p1012_p1 = scmp.eq.s32.totalorder %s5719_s12, 0  ;;  %p1014_p5 = scmp.eq.s32.totalorder %s5719_s12, 1 }
  0xef   : > { %2677 = vmatprep.subr.mxu0 %v648_v6  ;;  %2738 = vmatpush3.msra.mxu1 %v837_v5  ;;  %v641_v20 = vld [vmem:[#allocation8 + $0x28] sm:$0xff]  ;;  %v829_v21 = vld [vmem:[#allocation11 + $0x28] sm:$0xff]  ;;  %v640_v22 = vld [vmem:[#allocation8 + $0x20] sm:$0xff]  ;;  %s5721_s9 = smov %s5720_s29  ;;  %s2566_s11 = sshll.u32 %s5719_s12, 4 }
  0xf0   : > { %2678 = vmatpush3.msra.mxu0 %v648_v6  ;;  %2739 = vmatprep.subr.mxu1 %v836_v7  ;;  %v616_v23 = vld [vmem:[%s528_s6] sm:$0xff]  ;;  %v639_v24 = vld [vmem:[#allocation8 + $0x18] sm:$0xff]  ;;  %v827_v27 = vld [vmem:[#allocation11 + $0x18] sm:$0xff]  ;;  %s1013_s27 = scalar_select %p1012_p1, 1, 0  ;;  %v3971_v6 = vsub.s32 0, %v3963_v1 }
  0xf1   : > { %2679 = vmatprep.subr.mxu0 %v647_v8  ;;  %2740 = vmatpush3.msra.mxu1 %v836_v7  ;;  %v828_v25 = vld [vmem:[#allocation11 + $0x20] sm:$0xff]  ;;  %v637_v28 = vld [vmem:[#allocation8 + $0x8] sm:$0xff]  ;;  %v826_v29 = vld [vmem:[#allocation11 + $0x10] sm:$0xff]  ;;  %s1015_s4 = scalar_select %p1014_p5, 8, 9 }
  0xf2   : > { %2680 = vmatpush3.msra.mxu0 %v647_v8  ;;  %2741 = vmatprep.subr.mxu1 %v835_v9  ;;  %v638_v26 = vld [vmem:[#allocation8 + $0x10] sm:$0xff]  ;;  %v636_v30 = vld [vmem:[#allocation8] sm:$0xff]  ;;  %v825_v31 = vld [vmem:[#allocation11 + $0x8] sm:$0xff]  ;;  %v3952_v61 = vstv %s1013_s27  ;;  %s3328_s17 = scalar_lea.vmem %s3327_s20, 4096 }
  0xf3   : > { %2681 = vmatprep.subr.mxu0 %v646_v10  ;;  %2742 = vmatpush3.msra.mxu1 %v835_v9  ;;  %v617_v32 = vld [vmem:[%s528_s6 + $0x8] sm:$0xff]  ;;  %v824_v33 = vld [vmem:[#allocation11] sm:$0xff]  ;;  %v618_v34 = vld [vmem:[%s3891_s0] sm:$0xff]  ;;  %v3954_v62 = vstv %s1015_s4  ;;  %vm1017_vm0 = vcmp.le.s32.totalorder %v3952_v61, 0  ;;  %vm1018_vm4 = vcmp.le.s32.totalorder %v3952_v61, 1  ;;  %vm1019_vm8 = vcmp.le.s32.totalorder %v3952_v61, 2 }
  0xf4   : > { %2682 = vmatpush3.msra.mxu0 %v646_v10  ;;  %2743 = vmatprep.subr.mxu1 %v834_v11  ;;  %v619_v35 = vld [vmem:[%s3891_s0 + $0x8] sm:$0xff]  ;;  %v620_v36 = vld [vmem:[%s3891_s0 + $0x10] sm:$0xff]  ;;  %v621_v37 = vld [vmem:[%s3891_s0 + $0x18] sm:$0xff]  ;;  %vm1028_vm1 = vcmp.ge.s32.totalorder %v3954_v62, 0  ;;  %vm1029_vm5 = vcmp.ge.s32.totalorder %v3954_v62, 1  ;;  %vm1030_vm9 = vcmp.ge.s32.totalorder %v3954_v62, 2 }
  0xf5   : > { %2683 = vmatprep.subr.mxu0 %v645_v12  ;;  %2744 = vmatpush3.msra.mxu1 %v834_v11  ;;  %v622_v38 = vld [vmem:[%s3891_s0 + $0x20] sm:$0xff]  ;;  %v623_v39 = vld [vmem:[%s3891_s0 + $0x28] sm:$0xff]  ;;  %v624_v40 = vld [vmem:[%s3891_s0 + $0x30] sm:$0xff]  ;;  %vm1020_vm11 = vcmp.le.s32.totalorder %v3952_v61, 3  ;;  %vm1031_vm12 = vcmp.ge.s32.totalorder %v3954_v62, 3  ;;  %vm1021_vm14 = vcmp.le.s32.totalorder %v3952_v61, 4 }
  0xf6   : > { %2684 = vmatpush3.msra.mxu0 %v645_v12  ;;  %2745 = vmatprep.subr.mxu1 %v833_v13  ;;  %v625_v41 = vld [vmem:[%s3891_s0 + $0x38] sm:$0xff]  ;;  %v626_v42 = vld [vmem:[%s3891_s0 + $0x40] sm:$0xff]  ;;  %v627_v43 = vld [vmem:[%s3891_s0 + $0x48] sm:$0xff]  ;;  %vm1032_vm15 = vcmp.ge.s32.totalorder %v3954_v62, 4  ;;  %s2327_s4 = sshll.u32 %s5459_s19, 4  ;;  %s5478_s4 = int_to_ptr.vmem [resolvable:$true] %s2327_s4 }
  0xf7   : > { %2685 = vmatprep.subr.mxu0 %v644_v14  ;;  %2746 = vmatpush3.msra.mxu1 %v833_v13  ;;  %v628_v44 = vld [vmem:[%s3891_s0 + $0x50] sm:$0xff]  ;;  %v629_v45 = vld [vmem:[%s3891_s0 + $0x58] sm:$0xff]  ;;  %v630_v46 = vld [vmem:[%s3891_s0 + $0x60] sm:$0xff]  ;;  %s3322_s28 = scalar_lea.vmem %s5478_s4, 2048  ;;  %p3329_p10 = scmp.lt.s32.totalorder %s5478_s4, %s3327_s20 }
  0xf8   : > { %2686 = vmatpush3.msra.mxu0 %v644_v14  ;;  %2747 = vmatprep.subr.mxu1 %v832_v15  ;;  %v631_v47 = vld [vmem:[%s3891_s0 + $0x68] sm:$0xff]  ;;  %v632_v48 = vld [vmem:[%s3891_s0 + $0x70] sm:$0xff]  ;;  %v633_v49 = vld [vmem:[%s3891_s0 + $0x78] sm:$0xff]  ;;  %p3323_p7 = scmp.ne.s32.totalorder %s5478_s4, %s3322_s28  ;;  %p3330_p3 = scmp.lt.s32.totalorder %s3328_s17, %s3322_s28 }
  0xf9   : > { %2687 = vmatprep.subr.mxu0 %v643_v16  ;;  %2748 = vmatpush3.msra.mxu1 %v832_v15  ;;  %v634_v50 = vld [vmem:[%s537_s16] sm:$0xff]  ;;  %v635_v51 = vld [vmem:[%s537_s16 + $0x8] sm:$0xff]  ;;  %vm3965_vm2 = vmand %vm1017_vm0, %vm1028_vm1  ;;  %vm1022_vm1 = vcmp.le.s32.totalorder %v3952_v61, 5  ;;  %s2561_s16 = sshll.u32 %s6017_s1, 5 }
  0xfa   : > { %2688 = vmatpush3.msra.mxu0 %v643_v16  ;;  %2749 = vmatprep.subr.mxu1 %v831_v17  ;;  %v2141_v52 = vld [vmem:[#allocation14 + $0x78] sm:$0xff]  ;;  %v2140_v53 = vld [vmem:[#allocation14 + $0x70] sm:$0xff]  ;;  %v2139_v54 = vld [vmem:[#allocation14 + $0x68] sm:$0xff]  ;;  %s2324_s27 = sadd.s32 %s2566_s11, %s2561_s16  ;;  %p3324_p6 = pnand %p3323_p7, %p6020_p0 }
  0xfb   : > { %2689 = vmatprep.subr.mxu0 %v642_v18  ;;  %2750 = vmatpush3.msra.mxu1 %v831_v17  ;;  %v2138_v55 = vld [vmem:[#allocation14 + $0x60] sm:$0xff]  ;;  %v2137_v56 = vld [vmem:[#allocation14 + $0x58] sm:$0xff]  ;;  %v2136_v57 = vld [vmem:[#allocation14 + $0x50] sm:$0xff]  ;;  %s2562_s13 = sshll.u32 %s2324_s27, 7  ;;  %p3331_p9 = por %p3330_p3, %p3329_p10 }
  0xfc   : > { %2690 = vmatpush3.msra.mxu0 %v642_v18  ;;  %2751 = vmatprep.subr.mxu1 %v830_v19  ;;  %v2135_v58 = vld [vmem:[#allocation14 + $0x48] sm:$0xff]  ;;  %v2134_v59 = vld [vmem:[#allocation14 + $0x40] sm:$0xff]  ;;  %v2133_v60 = vld [vmem:[#allocation14 + $0x38] sm:$0xff]  ;;  %p3325_p12 = pneg %p3324_p6 }
  0xfd   : > { %2691 = vmatprep.subr.mxu0 %v641_v20  ;;  %2752 = vmatpush3.msra.mxu1 %v830_v19  ;;  %v3961_v0 = vld [vmem:[%s5720_s29] ss:$0 sm:$0xff]  ;;  %v2132_v4 = vld [vmem:[#allocation14 + $0x30] sm:$0xff]  ;;  %v2131_v14 = vld [vmem:[#allocation14 + $0x28] sm:$0xff]  ;;  %v3989_v19 = vsub.s32 1, %v3963_v1  ;;  %s6018_s29 = sld [smem:[#allocation168_spill]] }
  0xfe   : > { %2692 = vmatpush3.msra.mxu0 %v641_v20  ;;  %2753 = vmatprep.subr.mxu1 %v829_v21  ;;  %v3976_v10 = vld [vmem:[#allocation10] sm:$0xff]  ;;  %v3984_v17 = vld [vmem:[#allocation10 + $0x8] sm:$0x3]  ;;  %vm4006_vm6 = vmand %vm1018_vm4, %vm1029_vm5  ;;  %vm1023_vm5 = vcmp.le.s32.totalorder %v3952_v61, 6  ;;  %p3332_p2 = pnand %p3331_p9, %p3325_p12 }
  0xff   : > { %2693 = vmatprep.subr.mxu0 %v640_v22  ;;  %2754 = vmatpush3.msra.mxu1 %v829_v21  ;;  %v3982_v13 = vrot.slane %v3976_v10, %v3971_v6  ;;  %v2127_v63 = vld [vmem:[#allocation14 + $0x8] sm:$0xff]  ;;  %vm4094_vm10 = vmand %vm1019_vm8, %vm1030_vm9  ;;  %vm1024_vm9 = vcmp.le.s32.totalorder %v3952_v61, 7 }
 0x100   : > { %2694 = vmatpush3.msra.mxu0 %v640_v22  ;;  %2703 = vmatprep.mubr.f32.mxu0 %v616_v23  ;;  %vm4218_vm13 = vmand %vm1020_vm11, %vm1031_vm12  ;;  %vm1025_vm12 = vcmp.le.s32.totalorder %v3952_v61, 8 }
 0x101   : > { %2695 = vmatprep.subr.mxu0 %v639_v24  ;;  %2755 = vmatprep.subr.mxu1 %v828_v25  ;;  %vm4310_vm0 = vmand %vm1021_vm14, %vm1032_vm15  ;;  %vm1026_vm15 = vcmp.le.s32.totalorder %v3952_v61, 9 }
 0x102   : > { %2696 = vmatpush3.msra.mxu0 %v639_v24  ;;  %2756 = vmatpush3.msra.mxu1 %v828_v25  ;;  %v1528_v24 = vsub.s32 2, %v3963_v1  ;;  %v3998_v25 = vrot.slane %v3984_v17, %v3989_v19 }
 0x103   : > { %2697 = vmatprep.subr.mxu0 %v638_v26  ;;  %2757 = vmatprep.subr.mxu1 %v827_v27  ;;  %s6019_s8 = smov %s6018_s29  ;;  %s5484_s0 = scalar_lea.hbm %s6018_s29, %s2562_s13 }
 0x104   : > { %2698 = vmatpush3.msra.mxu0 %v638_v26  ;;  %2758 = vmatpush3.msra.mxu1 %v827_v27 }
 0x105   : > { %2699 = vmatprep.subr.mxu0 %v637_v28  ;;  %2759 = vmatprep.subr.mxu1 %v826_v29 }
 0x106   : > { %2700 = vmatpush3.msra.mxu0 %v637_v28  ;;  %2760 = vmatpush3.msra.mxu1 %v826_v29  ;;  %v2130_v29 = vld [vmem:[#allocation14 + $0x20] sm:$0xff] }
 0x107   : > { %2701 = vmatprep.subr.mxu0 %v636_v30  ;;  %2761 = vmatprep.subr.mxu1 %v825_v31 }
 0x108   : > { %2702 = vmatpush3.msra.mxu0 %v636_v30  ;;  %2762 = vmatpush3.msra.mxu1 %v825_v31  ;;  %v1672_v30 = vsub.s32 4, %v3963_v1  ;;  %v1744_v31 = vsub.s32 5, %v3963_v1 }
 0x109   : > { %2704 = vmatmul.mubr.f32.vlgmr.msra.gmra.mxu0 %v617_v32  ;;  %2763 = vmatprep.subr.mxu1 %v824_v33 }
 0x10a   : > { %2706 = vmatprep.mubr.f32.mxu0 %v618_v34  ;;  %2764 = vmatpush3.msra.mxu1 %v824_v33  ;;  %v1600_v33 = vsub.s32 3, %v3963_v1 }
 0x10b   : > { %2765 = vmatprep.mubr.f32.mxu1 %v616_v23  ;;  %2795 = vmatprep.subr.mxu0 %v2141_v52 }
 0x10c   : > { %2766 = vmatmul.mubr.f32.vlgmr.msra.gmra.mxu1 %v617_v32  ;;  %2851 = vmatprep.subr.mxu1 %v2141_v52 }
 0x10d   : > { %2707 = vmatmul.mubr.f32.gmra.mxu0 %v619_v35  ;;  %2768 = vmatprep.mubr.f32.mxu1 %v618_v34  ;;  %v4019_v34 = vrot.slane %v3976_v10, %v3989_v19 }
 0x10e   : > { %2709 = vmatprep.mubr.f32.mxu0 %v620_v36  ;;  %2796 = vmatpush3.msra.mxu0 %v2141_v52 }
 0x10f   : > { %2867 = vmatpush3.msra.mxu1 %v2141_v52  ;;  %2797 = vmatprep.subr.mxu0 %v2140_v53  ;;  %v2128_v52 = vld [vmem:[#allocation14 + $0x10] sm:$0xff] }
 0x110   : > { %2769 = vmatmul.mubr.f32.gmra.mxu1 %v619_v35  ;;  %2852 = vmatprep.subr.mxu1 %v2140_v53 }
 0x111   : > { %2710 = vmatmul.mubr.f32.gmra.mxu0 %v621_v37  ;;  %2771 = vmatprep.mubr.f32.mxu1 %v620_v36 }
 0x112   : > { %2712 = vmatprep.mubr.f32.mxu0 %v622_v38  ;;  %2798 = vmatpush3.msra.mxu0 %v2140_v53 }
 0x113   : > { %2868 = vmatpush3.msra.mxu1 %v2140_v53  ;;  %2799 = vmatprep.subr.mxu0 %v2139_v54 }
 0x114   : > { %2772 = vmatmul.mubr.f32.gmra.mxu1 %v621_v37  ;;  %2853 = vmatprep.subr.mxu1 %v2139_v54 }
 0x115   : > { %2713 = vmatmul.mubr.f32.gmra.mxu0 %v623_v39  ;;  %2774 = vmatprep.mubr.f32.mxu1 %v622_v38  ;;  %v1888_v38 = vsub.s32 7, %v3963_v1 }
 0x116   : > { %2715 = vmatprep.mubr.f32.mxu0 %v624_v40  ;;  %2800 = vmatpush3.msra.mxu0 %v2139_v54 }
 0x117   : > { %2869 = vmatpush3.msra.mxu1 %v2139_v54  ;;  %2801 = vmatprep.subr.mxu0 %v2138_v55 }
 0x118   : > { %2775 = vmatmul.mubr.f32.gmra.mxu1 %v623_v39  ;;  %2854 = vmatprep.subr.mxu1 %v2138_v55 }
 0x119   : > { %2716 = vmatmul.mubr.f32.gmra.mxu0 %v625_v41  ;;  %2777 = vmatprep.mubr.f32.mxu1 %v624_v40 }
 0x11a   : > { %2718 = vmatprep.mubr.f32.mxu0 %v626_v42  ;;  %2802 = vmatpush3.msra.mxu0 %v2138_v55 }
 0x11b   : > { %2870 = vmatpush3.msra.mxu1 %v2138_v55  ;;  %2803 = vmatprep.subr.mxu0 %v2137_v56  ;;  %v4057_v55 = vrot.slane %v3976_v10, %v1888_v38 }
 0x11c   : > { %2778 = vmatmul.mubr.f32.gmra.mxu1 %v625_v41  ;;  %2855 = vmatprep.subr.mxu1 %v2137_v56 }
 0x11d   : > { %2719 = vmatmul.mubr.f32.gmra.mxu0 %v627_v43  ;;  %2780 = vmatprep.mubr.f32.mxu1 %v626_v42  ;;  %v2129_v42 = vld [vmem:[#allocation14 + $0x18] sm:$0xff] }
 0x11e   : > { %2721 = vmatprep.mubr.f32.mxu0 %v628_v44  ;;  %2804 = vmatpush3.msra.mxu0 %v2137_v56 }
 0x11f   : > { %2871 = vmatpush3.msra.mxu1 %v2137_v56  ;;  %2805 = vmatprep.subr.mxu0 %v2136_v57  ;;  %v1372_v56 = vld [vmem:[#allocation13] sm:$0xff] }
 0x120   : > { %2781 = vmatmul.mubr.f32.gmra.mxu1 %v627_v43  ;;  %2856 = vmatprep.subr.mxu1 %v2136_v57  ;;  %v4030_v43 = vrot.slane %v3976_v10, %v1528_v24 }
 0x121   : > { %2722 = vmatmul.mubr.f32.gmra.mxu0 %v629_v45  ;;  %2783 = vmatprep.mubr.f32.mxu1 %v628_v44  ;;  %v4035_v44 = vrot.slane %v3976_v10, %v1672_v30 }
 0x122   : > { %2724 = vmatprep.mubr.f32.mxu0 %v630_v46  ;;  %2806 = vmatpush3.msra.mxu0 %v2136_v57 }
 0x123   : > { %2872 = vmatpush3.msra.mxu1 %v2136_v57  ;;  %2807 = vmatprep.subr.mxu0 %v2135_v58 }
 0x124   : > { %2784 = vmatmul.mubr.f32.gmra.mxu1 %v629_v45  ;;  %2857 = vmatprep.subr.mxu1 %v2135_v58  ;;  %v4040_v45 = vrot.slane %v3976_v10, %v1744_v31 }
 0x125   : > { %2725 = vmatmul.mubr.f32.gmra.mxu0 %v631_v47  ;;  %2786 = vmatprep.mubr.f32.mxu1 %v630_v46  ;;  %v4045_v46 = vrot.slane %v3976_v10, %v1600_v33 }
 0x126   : > { %2727 = vmatprep.mubr.f32.mxu0 %v632_v48  ;;  %2808 = vmatpush3.msra.mxu0 %v2135_v58 }
 0x127   : > { %2873 = vmatpush3.msra.mxu1 %v2135_v58  ;;  %2809 = vmatprep.subr.mxu0 %v2134_v59 }
 0x128   : > { %2787 = vmatmul.mubr.f32.gmra.mxu1 %v631_v47  ;;  %2858 = vmatprep.subr.mxu1 %v2134_v59 }
 0x129   : > { %2728 = vmatmul.mubr.f32.gmra.mxu0 %v633_v49  ;;  %2789 = vmatprep.mubr.f32.mxu1 %v632_v48 }
 0x12a   : > { %2730 = vmatprep.mubr.f32.mxu0 %v634_v50  ;;  %2810 = vmatpush3.msra.mxu0 %v2134_v59 }
 0x12b   : > { %2874 = vmatpush3.msra.mxu1 %v2134_v59  ;;  %2811 = vmatprep.subr.mxu0 %v2133_v60 }
 0x12c   : > { %2790 = vmatmul.mubr.f32.gmra.mxu1 %v633_v49  ;;  %2859 = vmatprep.subr.mxu1 %v2133_v60 }
 0x12d   : > { %2731 = vmatmul.mubr.f32.gmra.mxu0 %v635_v51  ;;  %2792 = vmatprep.mubr.f32.mxu1 %v634_v50 }
 0x12e   : > { %2812 = vmatpush3.msra.mxu0 %v2133_v60  ;;  %2875 = vmatpush3.msra.mxu1 %v2133_v60 }
 0x12f   : > { %2813 = vmatprep.subr.mxu0 %v2132_v4  ;;  %2860 = vmatprep.subr.mxu1 %v2132_v4 }
 0x130   : > { %2793 = vmatmul.mubr.f32.gmra.mxu1 %v635_v51  ;;  %2814 = vmatpush3.msra.mxu0 %v2132_v4  ;;  %v1816_v51 = vsub.s32 6, %v3963_v1 }
 0x131   : > { %2876 = vmatpush3.msra.mxu1 %v2132_v4  ;;  %2815 = vmatprep.subr.mxu0 %v2131_v14 }
 0x132   : > { %2861 = vmatprep.subr.mxu1 %v2131_v14  ;;  %2816 = vmatpush3.msra.mxu0 %v2131_v14 }
 0x133   : > { %2877 = vmatpush3.msra.mxu1 %v2131_v14  ;;  %2817 = vmatprep.subr.mxu0 %v2130_v29  ;;  %v4076_v14 = vrot.slane %v3976_v10, %v1816_v51 }
 0x134   : > { %2862 = vmatprep.subr.mxu1 %v2130_v29  ;;  %2818 = vmatpush3.msra.mxu0 %v2130_v29 }
 0x135   : > { %2878 = vmatpush3.msra.mxu1 %v2130_v29  ;;  %2819 = vmatprep.subr.mxu0 %v2129_v42 }
 0x136   : > { %2820 = vmatpush3.msra.mxu0 %v2129_v42  ;;  %2863 = vmatprep.subr.mxu1 %v2129_v42 }
 0x137   : > { %2821 = vmatprep.subr.mxu0 %v2128_v52  ;;  %2879 = vmatpush3.msra.mxu1 %v2129_v42 }
 0x138   : > { %2822 = vmatpush3.msra.mxu0 %v2128_v52  ;;  %2864 = vmatprep.subr.mxu1 %v2128_v52 }
 0x139   : > { %2823 = vmatprep.subr.mxu0 %v2127_v63  ;;  %2880 = vmatpush3.msra.mxu1 %v2128_v52 }
 0x13a   : > { %2824 = vmatpush3.msra.mxu0 %v2127_v63  ;;  %2865 = vmatprep.subr.mxu1 %v2127_v63 }
 0x13b   : > { %2881 = vmatpush3.msra.mxu1 %v2127_v63 }
 0x1c9   : > { %v2705_v2 = vpop.f32.mrf.mxu0 }
 0x1ca   : > { %v731_v5 = vadd.f32 %v2705_v2, %v3961_v0  ;;  %v4064_v2 = vrot.slane %v3984_v17, %v3971_v6 }
 0x1cb   : > { %v725_v7 = vpop.f32.mrf.mxu0 }
 0x1cc   : > { %v1049_v8 = vsel %vm3965_vm2, %v731_v5, 0.0  ;;  %v726_v9 = vadd.f32 %v3961_v0, %v725_v7  ;;  %5726 = vst [vmem:[#allocation39_spill] sm:$0xff] %v4064_v2  ;;  %v2767_v4 = vpop.f32.mrf.mxu1  ;;  %v4067_v5 = vrot.slane %v1372_v56, %v3989_v19  ;;  %v4069_v7 = vrot.slane %v1372_v56, %v1528_v24 }
 0x1cd   : > { %v2708_v11 = vpop.f32.mrf.mxu0  ;;  %v1110_v15 = vrot.slane %v1049_v8, 7  ;;  %v1171_v35 = vrot.slane %v1049_v8, 1  ;;  %v1459_v47 = vmul.f32 %v4019_v34, %v1049_v8  ;;  %v1373_v8 = vld [vmem:[#allocation13 + $0x8] sm:$0x3] }
 0x1ce   : > { %v1048_v12 = vsel %vm3965_vm2, %v726_v9, 0.0  ;;  %v741_v23 = vadd.f32 %v2708_v11, %v3961_v0 }
 0x1cf   : > { %v1109_v16 = vrot.slane %v1048_v12, 7  ;;  %v735_v18 = vpop.f32.mrf.mxu0  ;;  %v1170_v36 = vrot.slane %v1048_v12, 1  ;;  %v1458_v48 = vmul.f32 %v4019_v34, %v1048_v12  ;;  %v1220_v53 = vsel %vm1169_vm7, %v1171_v35, 0.0 }
 0x1d0   : > { %v736_v20 = vadd.f32 %v3961_v0, %v735_v18  ;;  %v4023_v37 = vsel %vm4006_vm6, %v741_v23, 0.0  ;;  %v1531_v9 = vmul.f32 %v4030_v43, %v1220_v53 }
 0x1d1   : > { %v1111_v21 = vsel %vm1108_vm3, %v1109_v16, %v1110_v15  ;;  %v1159_v22 = vsel %vm1108_vm3, 0.0, %v1109_v16  ;;  %v1113_v49 = vrot.slane %v4023_v37, 7  ;;  %v2711_v50 = vpop.f32.mrf.mxu0  ;;  %v1172_v54 = vsel %vm1169_vm7, %v1170_v36, %v1171_v35  ;;  %v2126_v16 = vld [vmem:[#allocation14] sm:$0xff]  ;;  %v913_v35 = vpop.f32.mrf.mxu1 }
 0x1d2   : > { %v1386_v26 = vmul.f32 %v3982_v13, %v1159_v22  ;;  %v1387_v27 = vmul.f32 %v3982_v13, %v1111_v21  ;;  %v4014_v32 = vsel %vm4006_vm6, %v736_v20, 0.0  ;;  %v1530_v11 = vmul.f32 %v4030_v43, %v1172_v54  ;;  %v4088_v22 = vld [vmem:[%s5727_s14] ss:$0 sm:$0xff]  ;;  %2825 = vmatprep.subr.mxu0 %v2126_v16  ;;  %2866 = vmatprep.subr.mxu1 %v2126_v16 }
 0x1d3   : > { %v1112_v41 = vrot.slane %v4014_v32, 7  ;;  %v745_v12 = vpop.f32.mrf.mxu0  ;;  %v4079_v15 = vrot.slane %v1372_v56, %v3971_v6  ;;  %v1174_v17 = vrot.slane %v4023_v37, 1  ;;  %v751_v21 = vadd.f32 %v2711_v50, %v3961_v0  ;;  %2826 = vmatpush3.msra.mxu0 %v2126_v16  ;;  %2882 = vmatpush3.msra.mxu1 %v2126_v16 }
 0x1d4   : > { %v1402_v39 = vadd.f32 %v1386_v26, %v3998_v25  ;;  %v1403_v40 = vadd.f32 %v1387_v27, %v3998_v25  ;;  %v4099_v26 = vrot.slane %v1373_v8, %v3989_v19  ;;  %v4103_v27 = vrot.slane %v1372_v56, %v1672_v30 }
 0x1d5   : > { %v1114_v59 = vsel %vm1108_vm3, %v1112_v41, %v1113_v49  ;;  %v1160_v60 = vsel %vm1108_vm3, 0.0, %v1112_v41  ;;  %v746_v29 = vadd.f32 %v3961_v0, %v745_v12  ;;  %v4108_v36 = vrot.slane %v1372_v56, %v1744_v31 }
 0x1d6   : > { %v1474_v57 = vadd.f32 %v1458_v48, %v1402_v39  ;;  %v1475_v58 = vadd.f32 %v1459_v47, %v1403_v40  ;;  %v1388_v18 = vmul.f32 %v3982_v13, %v1160_v60  ;;  %v1389_v20 = vmul.f32 %v3982_v13, %v1114_v59 }
 0x1d7   : > { %v4112_v39 = vrot.slane %v1372_v56, %v1600_v33  ;;  %v4116_v19 = vrot.slane %v1372_v56, %v1888_v38  ;;  %v1173_v30 = vrot.slane %v4014_v32, 1  ;;  %v1602_v40 = vmul.f32 %v4045_v46, %v1160_v60 }
 0x1d8   : > { %v1546_v10 = vadd.f32 %v1530_v11, %v1474_v57  ;;  %v1547_v23 = vadd.f32 %v1531_v9, %v1475_v58  ;;  %v1603_v41 = vmul.f32 %v4045_v46, %v1114_v59  ;;  %v919_v42 = vadd.f32 %v2767_v4, %v4088_v22  ;;  %v2714_v57 = vpop.f32.mrf.mxu0 }
 0x1d9   : > { %5730 = vst [vmem:[#allocation40_spill] sm:$0xff] %v4112_v39  ;;  %5731 = vst [vmem:[#allocation41_spill] sm:$0xff] %v4116_v19  ;;  %v1221_v31 = vsel %vm1169_vm7, %v1174_v17, 0.0  ;;  %v1404_v47 = vadd.f32 %v1388_v18, %v3998_v25  ;;  %v1405_v33 = vadd.f32 %v1389_v20, %v3998_v25  ;;  %v4127_v38 = vsel %vm4094_vm10, %v751_v21, 0.0  ;;  %v2770_v20 = vpop.f32.mrf.mxu1 }
 0x1da   : > { %v1618_v48 = vadd.f32 %v1602_v40, %v1546_v10  ;;  %v1619_v49 = vadd.f32 %v1603_v41, %v1547_v23  ;;  %v4131_v50 = vsel %vm4094_vm10, %v746_v29, 0.0  ;;  %v914_v52 = vadd.f32 %v4088_v22, %v913_v35  ;;  %v755_v21 = vpop.f32.mrf.mxu0 }
 0x1db   : > { %v1461_v53 = vmul.f32 %v4019_v34, %v4023_v37  ;;  %v1460_v54 = vmul.f32 %v4019_v34, %v4014_v32  ;;  %v4139_v58 = vrot.slane %v1373_v8, %v3971_v6  ;;  %v4143_v59 = vrot.slane %v1372_v56, %v1816_v51 }
 0x1dc   : > { %v1675_v60 = vmul.f32 %v4035_v44, %v4023_v37  ;;  %v1175_v63 = vsel %vm1169_vm7, %v1173_v30, %v1174_v17  ;;  %v1674_v4 = vmul.f32 %v4035_v44, %v4014_v32  ;;  %v1177_v9 = vrot.slane %v4127_v38, 1 }
 0x1dd   : > { %5732 = vst [vmem:[#allocation42_spill] sm:$0xff] %v4139_v58  ;;  %5733 = vst [vmem:[#allocation43_spill] sm:$0xff] %v4143_v59  ;;  %v1533_v6 = vmul.f32 %v4030_v43, %v1221_v31  ;;  %v1476_v1 = vadd.f32 %v1460_v54, %v1404_v47  ;;  %v4156_v51 = vsel %vm3965_vm2, %v919_v42, 0.0  ;;  %v1115_v37 = vrot.slane %v4131_v50, 7  ;;  %v923_v54 = vpop.f32.mrf.mxu1 }
 0x1de   : > { %v1477_v56 = vadd.f32 %v1461_v53, %v1405_v33  ;;  %v1690_v8 = vadd.f32 %v1674_v4, %v1618_v48  ;;  %v1691_v11 = vadd.f32 %v1675_v60, %v1619_v49  ;;  %v4161_v32 = vsel %vm3965_vm2, %v914_v52, 0.0  ;;  %v2717_v60 = vpop.f32.mrf.mxu0 }
 0x1df   : > { %v1747_v12 = vmul.f32 %v4040_v45, %v1221_v31  ;;  %v1532_v16 = vmul.f32 %v4030_v43, %v1175_v63  ;;  %v1746_v17 = vmul.f32 %v4040_v45, %v1175_v63  ;;  %v1311_v18 = vrot.slane %v4156_v51, 1 }
 0x1e0   : > { %v1116_v10 = vrot.slane %v4127_v38, 7  ;;  %v1222_v23 = vsel %vm1169_vm7, %v1177_v9, 0.0  ;;  %v1463_v29 = vmul.f32 %v4019_v34, %v4127_v38  ;;  %v1251_v3 = vrot.slane %v4156_v51, 7 }
 0x1e1   : > { %v1548_v35 = vadd.f32 %v1532_v16, %v1476_v1  ;;  %v4174_v30 = vmul.f32 %v4035_v44, %v4127_v38  ;;  %v1161_v40 = vsel %vm1108_vm3, 0.0, %v1115_v37  ;;  %v1250_v41 = vrot.slane %v4161_v32, 7 }
 0x1e2   : > { %v1549_v42 = vadd.f32 %v1533_v6, %v1477_v56  ;;  %v1762_v31 = vadd.f32 %v1746_v17, %v1690_v8  ;;  %v1763_v47 = vadd.f32 %v1747_v12, %v1691_v11  ;;  %v1891_v33 = vmul.f32 %v4057_v55, %v4127_v38 }
 0x1e3   : > { %5734 = vst [vmem:[#allocation44_spill] sm:$0xff] %v4174_v30  ;;  %v4181_v48 = vmul.f32 %v4030_v43, %v1222_v23  ;;  %v1360_v49 = vsel %vm1169_vm7, %v1311_v18, 0.0  ;;  %v1117_v52 = vsel %vm1108_vm3, %v1115_v37, %v1116_v10  ;;  %v1176_v53 = vrot.slane %v4131_v50, 1 }
 0x1e4   : > { %v4187_v63 = vmul.f32 %v4040_v45, %v1222_v23  ;;  %v4190_v4 = vmul.f32 %v4064_v2, %v1222_v23  ;;  %v1495_v38 = vmul.f32 %v4067_v5, %v4156_v51  ;;  %v1390_v6 = vmul.f32 %v3982_v13, %v1161_v40 }
 0x1e5   : > { %v1300_v1 = vsel %vm1108_vm3, 0.0, %v1250_v41  ;;  %v761_v56 = vadd.f32 %v2714_v57, %v3961_v0  ;;  %v929_v37 = vadd.f32 %v2770_v20, %v4088_v22  ;;  %v756_v8 = vadd.f32 %v3961_v0, %v755_v21 }
 0x1e6   : > { %5735 = vst [vmem:[#allocation45_spill] sm:$0xff] %v4187_v63  ;;  %5736 = vst [vmem:[#allocation46_spill] sm:$0xff] %v4190_v4  ;;  %v4200_v11 = vmul.f32 %v4069_v7, %v1360_v49  ;;  %v1391_v12 = vmul.f32 %v3982_v13, %v1117_v52  ;;  %v924_v16 = vadd.f32 %v4088_v22, %v923_v54  ;;  %vm1033_vm2 = vcmp.ge.s32.totalorder %v3954_v62, 5 }
 0x1e7   : > { %v4205_v17 = vadd.f32 %v2717_v60, %v3961_v0  ;;  %v4208_v51 = vsel %vm1169_vm7, %v1176_v53, %v1177_v9  ;;  %v1462_v57 = vmul.f32 %v4019_v34, %v4131_v50  ;;  %v1604_v20 = vmul.f32 %v4045_v46, %v1161_v40  ;;  %vm4430_vm4 = vmand %vm1022_vm1, %vm1033_vm2 }
 0x1e8   : > { %5737 = vst [vmem:[#allocation47_spill] sm:$0xff] %v4208_v51  ;;  %v1252_v21 = vsel %vm1108_vm3, %v1250_v41, %v1251_v3  ;;  %v1406_v23 = vadd.f32 %v1390_v6, %v3998_v25  ;;  %v1676_v9 = vmul.f32 %v4035_v44, %v4131_v50  ;;  %v1890_v49 = vmul.f32 %v4057_v55, %v4131_v50 }
 0x1e9   : > { %v1422_v53 = vmul.f32 %v4079_v15, %v1300_v1  ;;  %v1620_v54 = vadd.f32 %v1604_v20, %v1548_v35  ;;  %v1818_v3 = vmul.f32 %v4076_v14, %v1161_v40  ;;  %v1819_v41 = vmul.f32 %v4076_v14, %v1117_v52 }
 0x1ea   : > { %v1310_v60 = vrot.slane %v4161_v32, 1  ;;  %v1407_v63 = vadd.f32 %v1391_v12, %v3998_v25  ;;  %v1534_v6 = vmul.f32 %v4030_v43, %v4208_v51  ;;  %v1423_v30 = vmul.f32 %v4079_v15, %v1252_v21 }
 0x1eb   : > { %v1055_v4 = vsel %vm4218_vm13, %v761_v56, 0.0  ;;  %v1605_v50 = vmul.f32 %v4045_v46, %v1117_v52  ;;  %v1748_v35 = vmul.f32 %v4040_v45, %v4208_v51  ;;  %v1834_v40 = vadd.f32 %v1818_v3, %v1762_v31 }
 0x1ec   : > { %v1835_v1 = vadd.f32 %v1819_v41, %v1763_v47  ;;  %v1478_v20 = vadd.f32 %v1462_v57, %v1406_v23  ;;  %v1438_v2 = vadd.f32 %v1422_v53, %v4099_v26  ;;  %v1494_v12 = vmul.f32 %v4067_v5, %v4161_v32 }
 0x1ed   : > { %v1054_v59 = vsel %vm4218_vm13, %v756_v8, 0.0  ;;  %v4245_v21 = vadd.f32 %v1605_v50, %v1549_v42  ;;  %v1692_v58 = vadd.f32 %v1676_v9, %v1620_v54  ;;  %v1312_v56 = vsel %vm1169_vm7, %v1310_v60, %v1311_v18 }
 0x1ee   : > { %v1180_v52 = vrot.slane %v1055_v4, 1  ;;  %v1479_v31 = vadd.f32 %v1463_v29, %v1407_v63  ;;  %v1439_v47 = vadd.f32 %v1423_v30, %v4099_v26  ;;  %v1071_v57 = vsel %vm4006_vm6, %v929_v37, 0.0 }
 0x1ef   : > { %5740 = vst [vmem:[#allocation48_spill] sm:$0xff] %v4245_v21  ;;  %v1070_v32 = vsel %vm4006_vm6, %v924_v16, 0.0  ;;  %v4255_v8 = vadd.f32 %v1890_v49, %v1834_v40  ;;  %v4257_v42 = vadd.f32 %v1891_v33, %v1835_v1  ;;  %v1314_v23 = vrot.slane %v1071_v57, 1 }
 0x1f0   : > { %v1118_v18 = vrot.slane %v1054_v59, 7  ;;  %v1550_v9 = vadd.f32 %v1534_v6, %v1478_v20  ;;  %v1510_v53 = vadd.f32 %v1494_v12, %v1438_v2  ;;  %v1566_v54 = vmul.f32 %v4069_v7, %v1312_v56 }
 0x1f1   : > { %5741 = vst [vmem:[#allocation49_spill] sm:$0xff] %v4255_v8  ;;  %5742 = vst [vmem:[#allocation50_spill] sm:$0xff] %v4257_v42  ;;  %v1179_v3 = vrot.slane %v1054_v59, 1  ;;  %v1764_v29 = vadd.f32 %v1748_v35, %v1692_v58  ;;  %v1119_v63 = vrot.slane %v1055_v4, 7  ;;  %v4261_v30 = vsel %vm1169_vm7, %v1180_v52, 0.0 }
 0x1f2   : > { %5743 = vst [vmem:[#allocation51_spill] sm:$0xff] %v4261_v30  ;;  %v1253_v37 = vrot.slane %v1070_v32, 7  ;;  %v1511_v41 = vadd.f32 %v1495_v38, %v1439_v47  ;;  %v1465_v28 = vmul.f32 %v4019_v34, %v1055_v4  ;;  %v4265_v16 = vmul.f32 %v4035_v44, %v1055_v4 }
 0x1f3   : > { %v4268_v33 = vmul.f32 %v4057_v55, %v1055_v4  ;;  %v1254_v49 = vrot.slane %v1071_v57, 7  ;;  %v1361_v2 = vsel %vm1169_vm7, %v1314_v23, 0.0  ;;  %v1120_v60 = vsel %vm1108_vm3, %v1118_v18, %v1119_v63 }
 0x1f4   : > { %5744 = vst [vmem:[#allocation52_spill] sm:$0xff] %v4265_v16  ;;  %v1162_v58 = vsel %vm1108_vm3, 0.0, %v1118_v18  ;;  %v1582_v6 = vadd.f32 %v1566_v54, %v1510_v53  ;;  %v4275_v50 = vmul.f32 %v4030_v43, %v4261_v30  ;;  %v4278_v38 = vmul.f32 %v4067_v5, %v1071_v57 }
 0x1f5   : > { %5745 = vst [vmem:[#allocation53_spill] sm:$0xff] %v4268_v33  ;;  %v4281_v35 = vsel %vm1169_vm7, %v1179_v3, %v1180_v52  ;;  %v4285_v4 = vmul.f32 %v4040_v45, %v4261_v30  ;;  %v1711_v40 = vmul.f32 %v4103_v27, %v1071_v57  ;;  %v1464_v1 = vmul.f32 %v4019_v34, %v1054_v59 }
 0x1f6   : > { %5746 = vst [vmem:[#allocation54_spill] sm:$0xff] %v4281_v35  ;;  %v1301_v20 = vsel %vm1108_vm3, 0.0, %v1253_v37  ;;  %v4291_v12 = vmul.f32 %v4069_v7, %v1361_v2  ;;  %v4294_v56 = vmul.f32 %v4108_v36, %v1361_v2  ;;  %v1392_v47 = vmul.f32 %v3982_v13, %v1162_v58 }
 0x1f7   : > { %5747 = vst [vmem:[#allocation55_spill] sm:$0xff] %v4285_v4  ;;  %v1393_v52 = vmul.f32 %v3982_v13, %v1120_v60  ;;  %v1536_v18 = vmul.f32 %v4030_v43, %v4281_v35  ;;  %v1551_v53 = vadd.f32 %v4181_v48, %v1479_v31  ;;  %v1678_v57 = vmul.f32 %v4035_v44, %v1054_v59  ;;  %v2773_v48 = vpop.f32.mrf.mxu1  ;;  %v765_v31 = vpop.f32.mrf.mxu0 }
 0x1f8   : > { %5748 = vst [vmem:[#allocation56_spill] sm:$0xff] %v4291_v12  ;;  %v1892_v54 = vmul.f32 %v4057_v55, %v1054_v59  ;;  %v1606_v3 = vmul.f32 %v4045_v46, %v1162_v58  ;;  %v1255_v63 = vsel %vm1108_vm3, %v1253_v37, %v1254_v49  ;;  %v1313_v4 = vrot.slane %v1070_v32, 1 }
 0x1f9   : > { %v1424_v2 = vmul.f32 %v4079_v15, %v1301_v20  ;;  %v1607_v30 = vmul.f32 %v4045_v46, %v1120_v60  ;;  %v1583_v59 = vadd.f32 %v4200_v11, %v1511_v41  ;;  %v1638_v33 = vmul.f32 %v4112_v39, %v1301_v20 }
 0x1fa   : > { %v1639_v37 = vmul.f32 %v4112_v39, %v1255_v63  ;;  %v1408_v49 = vadd.f32 %v1392_v47, %v3998_v25  ;;  %v1409_v21 = vadd.f32 %v1393_v52, %v3998_v25  ;;  %v1750_v12 = vmul.f32 %v4040_v45, %v4281_v35  ;;  %v933_v39 = vpop.f32.mrf.mxu1 }
 0x1fb   : > { %v1820_v8 = vmul.f32 %v4076_v14, %v1162_v58  ;;  %v1622_v42 = vadd.f32 %v1606_v3, %v1550_v9  ;;  %v1425_v51 = vmul.f32 %v4079_v15, %v1255_v63  ;;  %v4327_v11 = vsel %vm4310_vm0, %v4205_v17, 0.0 }
 0x1fc   : > { %v766_v41 = vadd.f32 %v3961_v0, %v765_v31  ;;  %v1315_v20 = vsel %vm1169_vm7, %v1313_v4, %v1314_v23  ;;  %v1440_v47 = vadd.f32 %v1424_v2, %v4099_v26  ;;  %v1496_v52 = vmul.f32 %v4067_v5, %v1070_v32 }
 0x1fd   : > { %v1710_v35 = vmul.f32 %v4103_v27, %v1070_v32  ;;  %v1654_v58 = vadd.f32 %v1638_v33, %v1582_v6  ;;  %v1655_v9 = vadd.f32 %v1639_v37, %v1583_v59  ;;  %v939_v3 = vadd.f32 %v2773_v48, %v4088_v22 }
 0x1fe   : > { %v4337_v63 = vsel %vm4310_vm0, %v766_v41, 0.0  ;;  %v1480_v17 = vadd.f32 %v1464_v1, %v1408_v49  ;;  %v4340_v31 = vmul.f32 %v4076_v14, %v1120_v60  ;;  %v1836_v23 = vadd.f32 %v1820_v8, %v1764_v29 }
 0x1ff   : > { %v1183_v4 = vrot.slane %v4327_v11, 1  ;;  %v4345_v32 = vadd.f32 %v1607_v30, %v1551_v53  ;;  %v1694_v33 = vadd.f32 %v1678_v57, %v1622_v42  ;;  %v1441_v6 = vadd.f32 %v1425_v51, %v4099_v26 }
 0x200   : > { %5751 = vst [vmem:[#allocation57_spill] sm:$0xff] %v4340_v31  ;;  %v934_v2 = vadd.f32 %v4088_v22, %v933_v39  ;;  %v1481_v48 = vadd.f32 %v1465_v28, %v1409_v21  ;;  %v1512_v59 = vadd.f32 %v1496_v52, %v1440_v47  ;;  %v1568_v1 = vmul.f32 %v4069_v7, %v1315_v20  ;;  %v2720_v21 = vpop.f32.mrf.mxu0 }
 0x201   : > { %5752 = vst [vmem:[#allocation58_spill] sm:$0xff] %v4345_v32  ;;  %v1121_v60 = vrot.slane %v4337_v63, 7  ;;  %v1726_v8 = vadd.f32 %v1710_v35, %v1654_v58  ;;  %v1727_v29 = vadd.f32 %v1711_v40, %v1655_v9  ;;  %v1782_v37 = vmul.f32 %v4108_v36, %v1315_v20 }
 0x202   : > { %v4354_v49 = vsel %vm4094_vm10, %v939_v3, 0.0  ;;  %v1552_v30 = vadd.f32 %v1536_v18, %v1480_v17  ;;  %v4356_v42 = vadd.f32 %v1892_v54, %v1836_v23  ;;  %v4359_v51 = vsel %vm1169_vm7, %v1183_v4, 0.0  ;;  %v775_v9 = vpop.f32.mrf.mxu0 }
 0x203   : > { %5754 = vst [vmem:[#allocation60_spill] sm:$0xff] %v4359_v51  ;;  %v5609_v39 = vrot.slane %v4354_v49, 1  ;;  %v1766_v28 = vadd.f32 %v1750_v12, %v1694_v33  ;;  %v4363_v53 = vadd.f32 %v4278_v38, %v1441_v6  ;;  %v1122_v35 = vrot.slane %v4327_v11, 7 }
 0x204   : > { %5753 = vst [vmem:[#allocation59_spill] sm:$0xff] %v4356_v42  ;;  %v4368_v40 = vsel %vm4094_vm10, %v934_v2, 0.0  ;;  %v4370_v57 = vadd.f32 %v1568_v1, %v1512_v59  ;;  %v4374_v18 = vmul.f32 %v4019_v34, %v4327_v11  ;;  %v4378_v54 = vmul.f32 %v4035_v44, %v4327_v11  ;;  %v2776_v1 = vpop.f32.mrf.mxu1 }
 0x205   : > { %5755 = vst [vmem:[#allocation61_spill] sm:$0xff] %v4363_v53  ;;  %v1163_v12 = vsel %vm1108_vm3, 0.0, %v1121_v60  ;;  %v4381_v38 = vadd.f32 %v1782_v37, %v1726_v8  ;;  %v4384_v41 = vadd.f32 %v4294_v56, %v1727_v29  ;;  %v4388_v24 = vmul.f32 %v4030_v43, %v4359_v51 }
 0x206   : > { %5756 = vst [vmem:[#allocation62_spill] sm:$0xff] %v4378_v54  ;;  %v4392_v20 = vmul.f32 %v4057_v55, %v4327_v11  ;;  %v4396_v47 = vmul.f32 %v4040_v45, %v4359_v51  ;;  %v1257_v52 = vrot.slane %v4354_v49, 7  ;;  %v1362_v58 = vsel %vm1169_vm7, %v5609_v39, 0.0 }
 0x207   : > { %5757 = vst [vmem:[#allocation63_spill] sm:$0xff] %v4381_v38  ;;  %v1256_v56 = vrot.slane %v4368_v40, 7  ;;  %v4405_v3 = vmul.f32 %v4067_v5, %v4354_v49  ;;  %v4409_v11 = vmul.f32 %v4103_v27, %v4354_v49  ;;  %v1182_v17 = vrot.slane %v4337_v63, 1 }
 0x208   : > { %5758 = vst [vmem:[#allocation64_spill] sm:$0xff] %v4392_v20  ;;  %5759 = vst [vmem:[#allocation65_spill] sm:$0xff] %v4396_v47  ;;  %v1394_v23 = vmul.f32 %v3982_v13, %v1163_v12  ;;  %v4415_v33 = vmul.f32 %v4116_v19, %v4354_v49  ;;  %v1123_v6 = vsel %vm1108_vm3, %v1121_v60, %v1122_v35  ;;  %vm1034_vm6 = vcmp.ge.s32.totalorder %v3954_v62, 6 }
 0x209   : > { %5760 = vst [vmem:[#allocation66_spill] sm:$0xff] %v4409_v11  ;;  %v1553_v2 = vadd.f32 %v4275_v50, %v1481_v48  ;;  %v781_v59 = vadd.f32 %v2720_v21, %v3961_v0  ;;  %v4421_v8 = vmul.f32 %v4069_v7, %v1362_v58  ;;  %v4424_v29 = vmul.f32 %v4108_v36, %v1362_v58  ;;  %v5766_v48 = vld [vmem:[#allocation42_spill] sm:$0xff]  ;;  %vm4578_vm8 = vmand %vm1023_vm5, %vm1034_vm6 }
 0x20a   : > { %5761 = vst [vmem:[#allocation67_spill] sm:$0xff] %v4415_v33  ;;  %v949_v60 = vadd.f32 %v2776_v1, %v4088_v22  ;;  %v776_v50 = vadd.f32 %v3961_v0, %v775_v9  ;;  %v4437_v21 = vmul.f32 %v5766_v48, %v1362_v58  ;;  %v1466_v35 = vmul.f32 %v4019_v34, %v4337_v63 }
 0x20b   : > { %5762 = vst [vmem:[#allocation68_spill] sm:$0xff] %v4421_v8  ;;  %5763 = vst [vmem:[#allocation69_spill] sm:$0xff] %v4424_v29  ;;  %v1608_v39 = vmul.f32 %v4045_v46, %v1163_v12  ;;  %v4443_v47 = vsel %vm1108_vm3, 0.0, %v1256_v56  ;;  %v4446_v54 = vsel %vm1169_vm7, %v1182_v17, %v1183_v4  ;;  %v1395_v51 = vmul.f32 %v3982_v13, %v1123_v6 }
 0x20c   : > { %5767 = vst [vmem:[#allocation42_spill] sm:$0xff] %v4437_v21  ;;  %5768 = vst [vmem:[#allocation70_spill] sm:$0xff] %v4446_v54  ;;  %v1410_v1 = vadd.f32 %v1394_v23, %v3998_v25  ;;  %v1258_v9 = vsel %vm1108_vm3, %v1256_v56, %v1257_v52  ;;  %v1680_v58 = vmul.f32 %v4035_v44, %v4337_v63  ;;  %v4457_v32 = vsel %vm4430_vm4, %v781_v59, 0.0  ;;  %v943_v59 = vpop.f32.mrf.mxu1 }
 0x20d   : > { %v1624_v20 = vadd.f32 %v1608_v39, %v1552_v30  ;;  %v1894_v8 = vmul.f32 %v4057_v55, %v4337_v63  ;;  %v1822_v4 = vmul.f32 %v4076_v14, %v1163_v12  ;;  %v1426_v17 = vmul.f32 %v4079_v15, %v4443_v47  ;;  %v5770_v12 = vld [vmem:[#allocation40_spill] sm:$0xff] }
 0x20e   : > { %v4464_v23 = vsel %vm4218_vm13, %v949_v60, 0.0  ;;  %v4468_v30 = vsel %vm4430_vm4, %v776_v50, 0.0  ;;  %v1538_v63 = vmul.f32 %v4030_v43, %v4446_v54  ;;  %v1609_v39 = vmul.f32 %v4045_v46, %v1123_v6 }
 0x20f   : > { %5769 = vst [vmem:[#allocation71_spill] sm:$0xff] %v4464_v23  ;;  %v1427_v52 = vmul.f32 %v4079_v15, %v1258_v9  ;;  %v1640_v56 = vmul.f32 %v5770_v12, %v4443_v47  ;;  %v1411_v29 = vadd.f32 %v1395_v51, %v3998_v25  ;;  %v1482_v11 = vadd.f32 %v1466_v35, %v1410_v1 }
 0x210   : > { %v1752_v60 = vmul.f32 %v4040_v45, %v4446_v54  ;;  %v1838_v31 = vadd.f32 %v1822_v4, %v1766_v28  ;;  %v4479_v50 = vadd.f32 %v1609_v39, %v1553_v2  ;;  %v1696_v21 = vadd.f32 %v1680_v58, %v1624_v20  ;;  %v5773_v2 = vld [vmem:[#allocation43_spill] sm:$0xff]  ;;  %v2723_v58 = vpop.f32.mrf.mxu0 }
 0x211   : > { %v4482_v53 = vmul.f32 %v4076_v14, %v1123_v6  ;;  %v1124_v42 = vrot.slane %v4468_v30, 7  ;;  %v1442_v33 = vadd.f32 %v1426_v17, %v4099_v26  ;;  %v1498_v38 = vmul.f32 %v4067_v5, %v4368_v40 }
 0x212   : > { %5771 = vst [vmem:[#allocation40_spill] sm:$0xff] %v4479_v50  ;;  %v1186_v51 = vrot.slane %v4457_v32, 1  ;;  %v944_v35 = vadd.f32 %v4088_v22, %v943_v59  ;;  %v1443_v28 = vadd.f32 %v1427_v52, %v4099_v26  ;;  %v1656_v20 = vadd.f32 %v1640_v56, %v4370_v57 }
 0x213   : > { %5772 = vst [vmem:[#allocation72_spill] sm:$0xff] %v4482_v53  ;;  %v1712_v6 = vmul.f32 %v4103_v27, %v4368_v40  ;;  %v1855_v1 = vmul.f32 %v5773_v2, %v1258_v9  ;;  %v1483_v4 = vadd.f32 %v4374_v18, %v1411_v29  ;;  %v1554_v17 = vadd.f32 %v1538_v63, %v1482_v11 }
 0x214   : > { %v4498_v39 = vadd.f32 %v1894_v8, %v1838_v31  ;;  %v1768_v50 = vadd.f32 %v1752_v60, %v1696_v21  ;;  %v4502_v53 = vmul.f32 %v5770_v12, %v1258_v9  ;;  %v1125_v52 = vrot.slane %v4457_v32, 7 }
 0x215   : > { %v1164_v57 = vsel %vm1108_vm3, 0.0, %v1124_v42  ;;  %v4506_v56 = vadd.f32 %v1498_v38, %v1442_v33  ;;  %v4510_v54 = vmul.f32 %v4116_v19, %v4368_v40  ;;  %v4513_v18 = vsel %vm1169_vm7, %v1186_v51, 0.0  ;;  %v785_v33 = vpop.f32.mrf.mxu0 }
 0x216   : > { %5774 = vst [vmem:[#allocation43_spill] sm:$0xff] %v4498_v39  ;;  %5775 = vst [vmem:[#allocation73_spill] sm:$0xff] %v4502_v53  ;;  %v4517_v31 = vsel %vm4218_vm13, %v944_v35, 0.0  ;;  %v4520_v11 = vadd.f32 %v4405_v3, %v1443_v28  ;;  %v4522_v8 = vadd.f32 %v1712_v6, %v1656_v20  ;;  %v4525_v29 = vadd.f32 %v1855_v1, %v4384_v41  ;;  %v2779_v6 = vpop.f32.mrf.mxu1 }
 0x217   : > { %5776 = vst [vmem:[#allocation74_spill] sm:$0xff] %v4510_v54  ;;  %5777 = vst [vmem:[#allocation75_spill] sm:$0xff] %v4513_v18  ;;  %v1126_v38 = vsel %vm1108_vm3, %v1124_v42, %v1125_v52  ;;  %v1469_v21 = vmul.f32 %v4019_v34, %v4457_v32  ;;  %v1683_v9 = vmul.f32 %v4035_v44, %v4457_v32  ;;  %v1260_v41 = vrot.slane %v4464_v23, 7 }
 0x218   : > { %5778 = vst [vmem:[#allocation76_spill] sm:$0xff] %v4517_v31  ;;  %5779 = vst [vmem:[#allocation77_spill] sm:$0xff] %v4520_v11  ;;  %v4534_v10 = vmul.f32 %v4057_v55, %v4457_v32  ;;  %v1396_v3 = vmul.f32 %v3982_v13, %v1164_v57  ;;  %v4539_v63 = vmul.f32 %v4030_v43, %v4513_v18  ;;  %v1259_v60 = vrot.slane %v4517_v31, 7  ;;  %v953_v54 = vpop.f32.mrf.mxu1 }
 0x219   : > { %5780 = vst [vmem:[#allocation78_spill] sm:$0xff] %v4522_v8  ;;  %5781 = vst [vmem:[#allocation79_spill] sm:$0xff] %v4525_v29  ;;  %v4543_v42 = vmul.f32 %v4040_v45, %v4513_v18  ;;  %v1185_v35 = vrot.slane %v4468_v30, 1  ;;  %v1397_v28 = vmul.f32 %v3982_v13, %v1126_v38  ;;  %v1610_v32 = vmul.f32 %v4045_v46, %v1164_v57 }
 0x21a   : > { %5782 = vst [vmem:[#allocation80_spill] sm:$0xff] %v4534_v10  ;;  %v786_v20 = vadd.f32 %v3961_v0, %v785_v33  ;;  %v4554_v1 = vmul.f32 %v4067_v5, %v4464_v23  ;;  %v4558_v52 = vmul.f32 %v4103_v27, %v4464_v23  ;;  %v1555_v59 = vadd.f32 %v4388_v24, %v1483_v4 }
 0x21b   : > { %v4563_v18 = vmul.f32 %v4116_v19, %v4464_v23  ;;  %v1412_v10 = vadd.f32 %v1396_v3, %v3998_v25  ;;  %v1626_v11 = vadd.f32 %v1610_v32, %v1554_v17  ;;  %v791_v33 = vadd.f32 %v2723_v58, %v3961_v0 }
 0x21c   : > { %5783 = vst [vmem:[#allocation81_spill] sm:$0xff] %v4554_v1  ;;  %5784 = vst [vmem:[#allocation82_spill] sm:$0xff] %v4558_v52  ;;  %v1468_v39 = vmul.f32 %v4019_v34, %v4468_v30  ;;  %v1611_v1 = vmul.f32 %v4045_v46, %v1126_v38  ;;  %v1824_v53 = vmul.f32 %v4076_v14, %v1164_v57  ;;  %v4572_v52 = vsel %vm1108_vm3, 0.0, %v1259_v60 }
 0x21d   : > { %5785 = vst [vmem:[#allocation83_spill] sm:$0xff] %v4563_v18  ;;  %5786 = vst [vmem:[#allocation84_spill] sm:$0xff] %v4572_v52  ;;  %v4583_v58 = vsel %vm1169_vm7, %v1185_v35, %v1186_v51  ;;  %v1413_v4 = vadd.f32 %v1397_v28, %v3998_v25  ;;  %v1682_v17 = vmul.f32 %v4035_v44, %v4468_v30  ;;  %v4590_v57 = vsel %vm4578_vm8, %v786_v20, 0.0 }
 0x21e   : > { %5789 = vst [vmem:[#allocation85_spill] sm:$0xff] %v4583_v58  ;;  %v1627_v3 = vadd.f32 %v1611_v1, %v1555_v59  ;;  %v1840_v32 = vadd.f32 %v1824_v53, %v1768_v50  ;;  %v1896_v18 = vmul.f32 %v4057_v55, %v4468_v30  ;;  %v4595_v23 = vsel %vm1108_vm3, %v1259_v60, %v1260_v41 }
 0x21f   : > { %5790 = vst [vmem:[#allocation86_spill] sm:$0xff] %v4595_v23  ;;  %v1484_v8 = vadd.f32 %v1468_v39, %v1412_v10  ;;  %v1698_v51 = vadd.f32 %v1682_v17, %v1626_v11  ;;  %v1428_v35 = vmul.f32 %v4079_v15, %v4572_v52  ;;  %v4601_v28 = vsel %vm4578_vm8, %v791_v33, 0.0 }
 0x220   : > { %v1540_v59 = vmul.f32 %v4030_v43, %v4583_v58  ;;  %v1754_v53 = vmul.f32 %v4040_v45, %v4583_v58  ;;  %v959_v30 = vadd.f32 %v2779_v6, %v4088_v22  ;;  %v1127_v50 = vrot.slane %v4590_v57, 7 }
 0x221   : > { %v1485_v39 = vadd.f32 %v1469_v21, %v1413_v4  ;;  %v4610_v11 = vmul.f32 %v4076_v14, %v1126_v38  ;;  %v1429_v41 = vmul.f32 %v4079_v15, %v4595_v23  ;;  %vm1035_vm10 = vcmp.ge.s32.totalorder %v3954_v62, 7 }
 0x222   : > { %v1699_v60 = vadd.f32 %v1683_v9, %v1627_v3  ;;  %v1500_v20 = vmul.f32 %v4067_v5, %v4517_v31  ;;  %v1189_v6 = vrot.slane %v4601_v28, 1  ;;  %v954_v21 = vadd.f32 %v4088_v22, %v953_v54  ;;  %vm4707_vm11 = vmand %vm1024_vm9, %vm1035_vm10 }
 0x223   : > { %5791 = vst [vmem:[#allocation87_spill] sm:$0xff] %v4610_v11  ;;  %v1556_v1 = vadd.f32 %v1540_v59, %v1484_v8  ;;  %v1770_v38 = vadd.f32 %v1754_v53, %v1698_v51  ;;  %v4621_v33 = vadd.f32 %v1896_v18, %v1840_v32  ;;  %v1444_v4 = vadd.f32 %v1428_v35, %v4099_v26  ;;  %v2726_v8 = vpop.f32.mrf.mxu0 }
 0x224   : > { %v4626_v17 = vmul.f32 %v5770_v12, %v4572_v52  ;;  %v4630_v9 = vmul.f32 %v5770_v12, %v4595_v23  ;;  %v4634_v3 = vmul.f32 %v4103_v27, %v4517_v31  ;;  %v1165_v54 = vsel %vm1108_vm3, 0.0, %v1127_v50 }
 0x225   : > { %5792 = vst [vmem:[#allocation88_spill] sm:$0xff] %v4621_v33  ;;  %v4638_v18 = vadd.f32 %v1429_v41, %v4099_v26  ;;  %v4642_v32 = vmul.f32 %v4116_v19, %v4517_v31  ;;  %v1128_v51 = vrot.slane %v4601_v28, 7  ;;  %v4647_v35 = vsel %vm4310_vm0, %v959_v30, 0.0 }
 0x226   : > { %5793 = vst [vmem:[#allocation89_spill] sm:$0xff] %v4626_v17  ;;  %5794 = vst [vmem:[#allocation90_spill] sm:$0xff] %v4630_v9  ;;  %v1226_v59 = vsel %vm1169_vm7, %v1189_v6, 0.0  ;;  %v1471_v53 = vmul.f32 %v4019_v34, %v4601_v28  ;;  %v4654_v10 = vmul.f32 %v4035_v44, %v4601_v28  ;;  %v4658_v41 = vsel %vm4310_vm0, %v954_v21, 0.0 }
 0x227   : > { %5795 = vst [vmem:[#allocation91_spill] sm:$0xff] %v4634_v3  ;;  %5796 = vst [vmem:[#allocation92_spill] sm:$0xff] %v4638_v18  ;;  %v4660_v11 = vadd.f32 %v1500_v20, %v1444_v4  ;;  %v1899_v33 = vmul.f32 %v4057_v55, %v4601_v28  ;;  %v1129_v30 = vsel %vm1108_vm3, %v1127_v50, %v1128_v51  ;;  %v1263_v58 = vrot.slane %v4647_v35, 7  ;;  %v795_v20 = vpop.f32.mrf.mxu0  ;;  %v2782_v51 = vpop.f32.mrf.mxu1  ;;  %v5805_v18 = vld [vmem:[#allocation39_spill] sm:$0xff] }
 0x228   : > { %5797 = vst [vmem:[#allocation93_spill] sm:$0xff] %v4642_v32  ;;  %5798 = vst [vmem:[#allocation94_spill] sm:$0xff] %v4647_v35  ;;  %v1398_v9 = vmul.f32 %v3982_v13, %v1165_v54  ;;  %v4674_v16 = vmul.f32 %v4103_v27, %v4647_v35  ;;  %v4677_v21 = vmul.f32 %v4030_v43, %v1226_v59  ;;  %v1262_v4 = vrot.slane %v4658_v41, 7 }
 0x229   : > { %5799 = vst [vmem:[#allocation95_spill] sm:$0xff] %v4654_v10  ;;  %5800 = vst [vmem:[#allocation96_spill] sm:$0xff] %v4660_v11  ;;  %v4670_v10 = vmul.f32 %v4067_v5, %v4647_v35  ;;  %v4680_v28 = vmul.f32 %v4040_v45, %v1226_v59  ;;  %v4684_v50 = vmul.f32 %v4116_v19, %v4647_v35  ;;  %v1188_v11 = vrot.slane %v4590_v57, 1 }
 0x22a   : > { %5802 = vst [vmem:[#allocation98_spill] sm:$0xff] %v4674_v16  ;;  %v1399_v16 = vmul.f32 %v3982_v13, %v1129_v30  ;;  %v1470_v32 = vmul.f32 %v4019_v34, %v4590_v57  ;;  %v1414_v23 = vadd.f32 %v1398_v9, %v3998_v25  ;;  %v1771_v35 = vadd.f32 %v4543_v42, %v1699_v60 }
 0x22b   : > { %5801 = vst [vmem:[#allocation97_spill] sm:$0xff] %v4670_v10  ;;  %5803 = vst [vmem:[#allocation99_spill] sm:$0xff] %v4680_v28  ;;  %v4688_v10 = vmul.f32 %v5805_v18, %v1226_v59  ;;  %v1612_v28 = vmul.f32 %v4045_v46, %v1165_v54  ;;  %v1557_v3 = vadd.f32 %v4539_v63, %v1485_v39  ;;  %v4713_v63 = vsel %vm1108_vm3, 0.0, %v1262_v4 }
 0x22c   : > { %5804 = vst [vmem:[#allocation100_spill] sm:$0xff] %v4684_v50  ;;  %v796_v50 = vadd.f32 %v3961_v0, %v795_v20  ;;  %v1684_v59 = vmul.f32 %v4035_v44, %v4590_v57  ;;  %v801_v31 = vadd.f32 %v2726_v8, %v3961_v0  ;;  %v1827_v60 = vmul.f32 %v4076_v14, %v1129_v30 }
 0x22d   : > { %5806 = vst [vmem:[#allocation39_spill] sm:$0xff] %v4688_v10  ;;  %v1826_v10 = vmul.f32 %v4076_v14, %v1165_v54  ;;  %v1628_v42 = vadd.f32 %v1612_v28, %v1556_v1  ;;  %v963_v54 = vpop.f32.mrf.mxu1  ;;  %vm1036_vm13 = vcmp.ge.s32.totalorder %v3954_v62, 8  ;;  %v4722_v0 = vsel %vm1169_vm7, %v1188_v11, %v1189_v6 }
 0x22e   : > { %v4717_v39 = vsel %vm4707_vm11, %v796_v50, 0.0  ;;  %5809 = vst [vmem:[#allocation101_spill] sm:$0xff] %v4722_v0  ;;  %v1415_v8 = vadd.f32 %v1399_v16, %v3998_v25  ;;  %v1898_v20 = vmul.f32 %v4057_v55, %v4590_v57  ;;  %v1486_v28 = vadd.f32 %v1470_v32, %v1414_v23  ;;  %v2729_v16 = vpop.f32.mrf.mxu0  ;;  %vm4803_vm14 = vmand %vm1025_vm12, %vm1036_vm13 }
 0x22f   : > { %v1842_v1 = vadd.f32 %v1826_v10, %v1770_v38  ;;  %v1613_v17 = vmul.f32 %v4045_v46, %v1129_v30  ;;  %v1843_v52 = vadd.f32 %v1827_v60, %v1771_v35  ;;  %v4729_v50 = vsel %vm1108_vm3, %v1262_v4, %v1263_v58 }
 0x230   : > { %5810 = vst [vmem:[#allocation102_spill] sm:$0xff] %v4729_v50  ;;  %v1430_v29 = vmul.f32 %v4079_v15, %v4713_v63  ;;  %v1063_v11 = vsel %vm4707_vm11, %v801_v31, 0.0  ;;  %v1130_v6 = vrot.slane %v4717_v39, 7  ;;  %v964_v10 = vadd.f32 %v4088_v22, %v963_v54 }
 0x231   : > { %v1542_v57 = vmul.f32 %v4030_v43, %v4722_v0  ;;  %v4739_v23 = vadd.f32 %v1613_v17, %v1557_v3  ;;  %v1700_v38 = vadd.f32 %v1684_v59, %v1628_v42  ;;  %v1756_v58 = vmul.f32 %v4040_v45, %v4722_v0 }
 0x232   : > { %v1487_v32 = vadd.f32 %v1471_v53, %v1415_v8  ;;  %v4743_v35 = vadd.f32 %v1898_v20, %v1842_v1  ;;  %v1431_v31 = vmul.f32 %v4079_v15, %v4729_v50  ;;  %v4748_v60 = vadd.f32 %v1899_v33, %v1843_v52 }
 0x233   : > { %5811 = vst [vmem:[#allocation103_spill] sm:$0xff] %v4739_v23  ;;  %v1558_v4 = vadd.f32 %v1542_v57, %v1486_v28  ;;  %v1192_v54 = vrot.slane %v1063_v11, 1  ;;  %v969_v17 = vadd.f32 %v2782_v51, %v4088_v22  ;;  %v1446_v3 = vadd.f32 %v1430_v29, %v4099_v26 }
 0x234   : > { %5812 = vst [vmem:[#allocation104_spill] sm:$0xff] %v4743_v35  ;;  %5813 = vst [vmem:[#allocation105_spill] sm:$0xff] %v4748_v60  ;;  %v1502_v59 = vmul.f32 %v4067_v5, %v4658_v41  ;;  %v1166_v53 = vsel %vm1108_vm3, 0.0, %v1130_v6  ;;  %v4757_v42 = vsel %vm4430_vm4, %v964_v10, 0.0  ;;  %v1772_v8 = vadd.f32 %v1756_v58, %v1700_v38  ;;  %v805_v10 = vpop.f32.mrf.mxu0 }
 0x235   : > { %v4761_v1 = vmul.f32 %v5770_v12, %v4713_v63  ;;  %v4765_v52 = vmul.f32 %v5770_v12, %v4729_v50  ;;  %v4769_v29 = vmul.f32 %v4103_v27, %v4658_v41  ;;  %v4772_v33 = vadd.f32 %v1431_v31, %v4099_v26 }
 0x236   : > { %v4776_v51 = vmul.f32 %v4116_v19, %v4658_v41  ;;  %v1131_v20 = vrot.slane %v1063_v11, 7  ;;  %v4779_v28 = vmul.f32 %v4019_v34, %v1063_v11  ;;  %v4782_v57 = vsel %vm1169_vm7, %v1192_v54, 0.0 }
 0x237   : > { %5814 = vst [vmem:[#allocation106_spill] sm:$0xff] %v4761_v1  ;;  %5815 = vst [vmem:[#allocation107_spill] sm:$0xff] %v4765_v52  ;;  %v4786_v38 = vsel %vm4430_vm4, %v969_v17, 0.0  ;;  %v1400_v58 = vmul.f32 %v3982_v13, %v1166_v53  ;;  %v1265_v31 = vrot.slane %v4757_v42, 7  ;;  %v4790_v30 = vadd.f32 %v1502_v59, %v1446_v3  ;;  %v4812_v59 = vld [vmem:[%s5721_s9] ss:$0 sm:$0xff] }
 0x238   : > { %5816 = vst [vmem:[#allocation108_spill] sm:$0xff] %v4769_v29  ;;  %5817 = vst [vmem:[#allocation109_spill] sm:$0xff] %v4772_v33  ;;  %v4793_v23 = vmul.f32 %v4035_v44, %v1063_v11  ;;  %v4796_v35 = vmul.f32 %v4057_v55, %v1063_v11  ;;  %v1559_v60 = vadd.f32 %v4677_v21, %v1487_v32  ;;  %v1191_v3 = vrot.slane %v4717_v39, 1 }
 0x239   : > { %5818 = vst [vmem:[#allocation110_spill] sm:$0xff] %v4776_v51  ;;  %5819 = vst [vmem:[#allocation111_spill] sm:$0xff] %v4782_v57  ;;  %v1132_v17 = vsel %vm1108_vm3, %v1130_v6, %v1131_v20  ;;  %v811_v11 = vadd.f32 %v4812_v59, %v2729_v16  ;;  %v806_v21 = vadd.f32 %v4812_v59, %v805_v10  ;;  %vm1037_vm0 = vcmp.ge.s32.totalorder %v3954_v62, 9 }
 0x23a   : > { %5820 = vst [vmem:[#allocation112_spill] sm:$0xff] %v4786_v38  ;;  %5821 = vst [vmem:[#allocation113_spill] sm:$0xff] %v4790_v30  ;;  %v1545_v32 = vmul.f32 %v4030_v43, %v4782_v57  ;;  %v4822_v6 = vmul.f32 %v4040_v45, %v4782_v57  ;;  %v1266_v20 = vrot.slane %v4786_v38, 7  ;;  %v1614_v16 = vmul.f32 %v4045_v46, %v1166_v53  ;;  %v4848_v57 = vpop.f32.mrf.mxu0  ;;  %v2785_v30 = vpop.f32.mrf.mxu1 }
 0x23b   : > { %5822 = vst [vmem:[#allocation114_spill] sm:$0xff] %v4793_v23  ;;  %5823 = vst [vmem:[#allocation115_spill] sm:$0xff] %v4796_v35  ;;  %v1416_v23 = vadd.f32 %v1400_v58, %v3998_v25  ;;  %v4829_v10 = vsel %vm1108_vm3, 0.0, %v1265_v31  ;;  %v4833_v0 = vsel %vm4803_vm14, %v806_v21, 0.0  ;;  %v4837_v52 = vmul.f32 %v4067_v5, %v4786_v38 }
 0x23c   : > { %5826 = vst [vmem:[#allocation116_spill] sm:$0xff] %v4822_v6  ;;  %v4841_v6 = vmul.f32 %v4103_v27, %v4786_v38  ;;  %v4845_v58 = vmul.f32 %v4116_v19, %v4786_v38  ;;  %v1401_v35 = vmul.f32 %v3982_v13, %v1132_v17  ;;  %v4851_v50 = vsel %vm1169_vm7, %v1191_v3, %v1192_v54  ;;  %v973_v33 = vpop.f32.mrf.mxu1  ;;  %vm4898_vm1 = vmand %vm1026_vm15, %vm1037_vm0 }
 0x23d   : > { %5827 = vst [vmem:[#allocation117_spill] sm:$0xff] %v4837_v52  ;;  %5830 = vst [vmem:[#allocation120_spill] sm:$0xff] %v4851_v50  ;;  %v1472_v21 = vmul.f32 %v4019_v34, %v4717_v39  ;;  %v1615_v52 = vmul.f32 %v4045_v46, %v1132_v17  ;;  %v1630_v29 = vadd.f32 %v1614_v16, %v1558_v4  ;;  %v1065_v4 = vsel %vm4803_vm14, %v811_v11, 0.0  ;;  %v815_v16 = vpop.f32.mrf.mxu0 }
 0x23e   : > { %5828 = vst [vmem:[#allocation118_spill] sm:$0xff] %v4841_v6  ;;  %5829 = vst [vmem:[#allocation119_spill] sm:$0xff] %v4845_v58  ;;  %v1828_v6 = vmul.f32 %v4076_v14, %v1166_v53  ;;  %v4858_v1 = vsel %vm1108_vm3, %v1265_v31, %v1266_v20  ;;  %v1432_v13 = vmul.f32 %v4079_v15, %v4829_v10  ;;  %v1133_v58 = vrot.slane %v4833_v0, 7 }
 0x23f   : > { %v1488_v38 = vadd.f32 %v1472_v21, %v1416_v23  ;;  %v1686_v54 = vmul.f32 %v4035_v44, %v4717_v39  ;;  %v1900_v34 = vmul.f32 %v4057_v55, %v4717_v39  ;;  %v1417_v53 = vadd.f32 %v1401_v35, %v3998_v25 }
 0x240   : > { %v4870_v3 = vadd.f32 %v1615_v52, %v1559_v60  ;;  %v4873_v31 = vmul.f32 %v4076_v14, %v1132_v17  ;;  %v1844_v20 = vadd.f32 %v1828_v6, %v1772_v8  ;;  %v1433_v21 = vmul.f32 %v4079_v15, %v4858_v1 }
 0x241   : > { %v1702_v51 = vadd.f32 %v1686_v54, %v1630_v29  ;;  %v1544_v39 = vmul.f32 %v4030_v43, %v4851_v50  ;;  %v1448_v11 = vadd.f32 %v1432_v13, %v4099_v26  ;;  %v1504_v25 = vmul.f32 %v4067_v5, %v4757_v42 }
 0x242   : > { %5831 = vst [vmem:[#allocation121_spill] sm:$0xff] %v4870_v3  ;;  %5832 = vst [vmem:[#allocation122_spill] sm:$0xff] %v4873_v31  ;;  %v4885_v35 = vmul.f32 %v5770_v12, %v4829_v10  ;;  %v1167_v60 = vsel %vm1108_vm3, 0.0, %v1133_v58  ;;  %v1134_v8 = vrot.slane %v1065_v4, 7  ;;  %v1195_v52 = vrot.slane %v1065_v4, 1 }
 0x243   : > { %v1560_v29 = vadd.f32 %v1544_v39, %v1488_v38  ;;  %v816_v17 = vadd.f32 %v4812_v59, %v815_v16  ;;  %v4889_v6 = vadd.f32 %v1900_v34, %v1844_v20  ;;  %v1489_v43 = vadd.f32 %v4779_v28, %v1417_v53  ;;  %v2788_v53 = vpop.f32.mrf.mxu1 }
 0x244   : > { %v979_v13 = vadd.f32 %v2785_v30, %v4088_v22  ;;  %v974_v54 = vadd.f32 %v4088_v22, %v973_v33  ;;  %v4903_v38 = vadd.f32 %v1433_v21, %v4099_v26  ;;  %v4907_v34 = vmul.f32 %v5770_v12, %v4858_v1 }
 0x245   : > { %5833 = vst [vmem:[#allocation123_spill] sm:$0xff] %v4889_v6  ;;  %v4911_v30 = vmul.f32 %v4103_v27, %v4757_v42  ;;  %v1616_v22 = vmul.f32 %v4045_v46, %v1167_v60  ;;  %v4914_v62 = vadd.f32 %v1504_v25, %v1448_v11  ;;  %v4918_v61 = vmul.f32 %v4116_v19, %v4757_v42 }
 0x246   : > { %v1194_v33 = vrot.slane %v4833_v0, 1  ;;  %v1758_v28 = vmul.f32 %v4040_v45, %v4851_v50  ;;  %v1228_v20 = vsel %vm1169_vm7, %v1195_v52, 0.0  ;;  %v1135_v16 = vsel %vm1108_vm3, %v1133_v58, %v1134_v8 }
 0x247   : > { %v1632_v21 = vadd.f32 %v1616_v22, %v1560_v29  ;;  %v4927_v39 = vsel %vm4898_vm1, %v816_v17, 0.0  ;;  %v1561_v11 = vadd.f32 %v1545_v32, %v1489_v43  ;;  %v4931_v3 = vsel %vm4578_vm8, %v979_v13, 0.0  ;;  %v983_v17 = vpop.f32.mrf.mxu1 }
 0x248   : > { %v1774_v25 = vadd.f32 %v1758_v28, %v1702_v51  ;;  %v4935_v31 = vsel %vm4578_vm8, %v974_v54, 0.0  ;;  %v1689_v6 = vmul.f32 %v4035_v44, %v1065_v4  ;;  %v4939_v50 = vmul.f32 %v4057_v55, %v1065_v4 }
 0x249   : > { %v1688_v58 = vmul.f32 %v4035_v44, %v4833_v0  ;;  %v5627_v8 = vrot.slane %v4931_v3, 1  ;;  %v4945_v51 = vsel %vm1169_vm7, %v1194_v33, %v1195_v52  ;;  %v1617_v32 = vmul.f32 %v4045_v46, %v1135_v16 }
 0x24a   : > { %5836 = vst [vmem:[#allocation124_spill] sm:$0xff] %v4939_v50  ;;  %5837 = vst [vmem:[#allocation125_spill] sm:$0xff] %v4945_v51  ;;  %v1830_v29 = vmul.f32 %v4076_v14, %v1167_v60  ;;  %v1136_v24 = vrot.slane %v4927_v39, 7  ;;  %v1761_v43 = vmul.f32 %v4040_v45, %v1228_v20  ;;  %v1268_v4 = vrot.slane %v4935_v31, 7 }
 0x24b   : > { %v1704_v13 = vadd.f32 %v1688_v58, %v1632_v21  ;;  %v821_v44 = vadd.f32 %v4812_v59, %v4848_v57  ;;  %v4955_v54 = vmul.f32 %v5805_v18, %v1228_v20  ;;  %v1633_v52 = vadd.f32 %v1617_v32, %v1561_v11  ;;  %v4968_v57 = vld [vmem:[%s5727_s14] ss:$0 sm:$0xff] }
 0x24c   : > { %v1846_v22 = vadd.f32 %v1830_v29, %v1774_v25  ;;  %v1902_v46 = vmul.f32 %v4057_v55, %v4833_v0  ;;  %v1760_v60 = vmul.f32 %v4040_v45, %v4945_v51  ;;  %v1269_v33 = vrot.slane %v4931_v3, 7 }
 0x24d   : > { %5838 = vst [vmem:[#allocation126_spill] sm:$0xff] %v4955_v54  ;;  %v1366_v28 = vsel %vm1169_vm7, %v5627_v8, 0.0  ;;  %v984_v59 = vadd.f32 %v4968_v57, %v983_v17  ;;  %v4972_v20 = vmul.f32 %v4076_v14, %v1135_v16  ;;  %v1507_v0 = vmul.f32 %v4067_v5, %v4931_v3 }
 0x24e   : > { %v4978_v45 = vmul.f32 %v4103_v27, %v4931_v3  ;;  %v1168_v21 = vsel %vm1108_vm3, 0.0, %v1136_v24  ;;  %v1776_v11 = vadd.f32 %v1760_v60, %v1704_v13  ;;  %v4982_v25 = vsel %vm1108_vm3, 0.0, %v1268_v4  ;;  %v2791_v13 = vpop.f32.mrf.mxu1 }
 0x24f   : > { %5839 = vst [vmem:[#allocation127_spill] sm:$0xff] %v4972_v20  ;;  %v1067_v58 = vsel %vm4898_vm1, %v821_v44, 0.0  ;;  %v4988_v16 = vsel %vm4707_vm11, %v984_v59, 0.0  ;;  %v1705_v32 = vadd.f32 %v1689_v6, %v1633_v52  ;;  %v4990_v29 = vadd.f32 %v1902_v46, %v1846_v22 }
 0x250   : > { %5840 = vst [vmem:[#allocation128_spill] sm:$0xff] %v4978_v45  ;;  %v4993_v17 = vmul.f32 %v4069_v7, %v1366_v28  ;;  %v4997_v8 = vmul.f32 %v4116_v19, %v4931_v3  ;;  %v5000_v60 = vmul.f32 %v4108_v36, %v1366_v28  ;;  %v1270_v44 = vsel %vm1108_vm3, %v1268_v4, %v1269_v33  ;;  %v993_v20 = vpop.f32.mrf.mxu1 }
 0x251   : > { %5841 = vst [vmem:[#allocation129_spill] sm:$0xff] %v4990_v29  ;;  %v1832_v54 = vmul.f32 %v4076_v14, %v1168_v21  ;;  %v989_v59 = vadd.f32 %v4968_v57, %v2788_v53  ;;  %v1434_v6 = vmul.f32 %v4079_v15, %v4982_v25  ;;  %v1198_v52 = vrot.slane %v1067_v58, 1 }
 0x252   : > { %5842 = vst [vmem:[#allocation130_spill] sm:$0xff] %v4993_v17  ;;  %5843 = vst [vmem:[#allocation131_spill] sm:$0xff] %v4997_v8  ;;  %v1197_v22 = vrot.slane %v4927_v39, 1  ;;  %v1271_v46 = vrot.slane %v4988_v16, 7  ;;  %v5010_v45 = vmul.f32 %v5766_v48, %v1366_v28  ;;  %v1435_v4 = vmul.f32 %v4079_v15, %v1270_v44 }
 0x253   : > { %5844 = vst [vmem:[#allocation132_spill] sm:$0xff] %v5000_v60  ;;  %v1137_v60 = vrot.slane %v1067_v58, 7  ;;  %v1848_v17 = vadd.f32 %v1832_v54, %v1776_v11  ;;  %v1506_v53 = vmul.f32 %v4067_v5, %v4935_v31  ;;  %v5018_v33 = vmul.f32 %v4103_v27, %v4935_v31 }
 0x254   : > { %5845 = vst [vmem:[#allocation133_spill] sm:$0xff] %v5010_v45  ;;  %v5022_v21 = vmul.f32 %v4116_v19, %v4935_v31  ;;  %v5026_v28 = vmul.f32 %v5770_v12, %v4982_v25  ;;  %v5029_v54 = vmul.f32 %v4057_v55, %v1067_v58  ;;  %v1904_v11 = vmul.f32 %v4057_v55, %v4927_v39 }
 0x255   : > { %v5035_v50 = vsel %vm4707_vm11, %v989_v59, 0.0  ;;  %v1450_v29 = vadd.f32 %v1434_v6, %v4099_v26  ;;  %v1229_v45 = vsel %vm1169_vm7, %v1198_v52, 0.0  ;;  %v1199_v51 = vsel %vm1169_vm7, %v1197_v22, %v1198_v52 }
 0x256   : > { %5846 = vst [vmem:[#allocation134_spill] sm:$0xff] %v5022_v21  ;;  %5847 = vst [vmem:[#allocation135_spill] sm:$0xff] %v5029_v54  ;;  %v5041_v21 = vsel %vm1108_vm3, 0.0, %v1271_v46  ;;  %v5044_v8 = vmul.f32 %v5770_v12, %v1270_v44  ;;  %v1138_v58 = vsel %vm1108_vm3, %v1136_v24, %v1137_v60  ;;  %v1920_v54 = vadd.f32 %v1904_v11, %v1848_v17  ;;  %v5862_v11 = vld [vmem:[#allocation46_spill] sm:$0xff] }
 0x257   : > { %5848 = vst [vmem:[#allocation136_spill] sm:$0xff] %v5035_v50  ;;  %5849 = vst [vmem:[#allocation137_spill] sm:$0xff] %v5041_v21  ;;  %v994_v55 = vadd.f32 %v4968_v57, %v993_v20  ;;  %v1451_v9 = vadd.f32 %v1435_v4, %v4099_v26  ;;  %v5050_v39 = vmul.f32 %v5773_v2, %v1270_v44  ;;  %v1272_v59 = vrot.slane %v5035_v50, 7 }
 0x258   : > { %5850 = vst [vmem:[#allocation138_spill] sm:$0xff] %v5044_v8  ;;  %v999_v6 = vadd.f32 %v4968_v57, %v2791_v13  ;;  %v5055_v52 = vmul.f32 %v5805_v18, %v1229_v45  ;;  %v1777_v22 = vadd.f32 %v1761_v43, %v1705_v32  ;;  %v1976_v8 = vmul.f32 %v5805_v18, %v1199_v51 }
 0x259   : > { %v1436_v24 = vmul.f32 %v4079_v15, %v5041_v21  ;;  %v5060_v17 = vadd.f32 %v1506_v53, %v1450_v29  ;;  %v1833_v20 = vmul.f32 %v4076_v14, %v1138_v58  ;;  %v5629_v60 = vrot.slane %v5035_v50, 1  ;;  %v5857_v29 = vld [vmem:[#allocation47_spill] sm:$0xff] }
 0x25a   : > { %5851 = vst [vmem:[#allocation139_spill] sm:$0xff] %v5055_v52  ;;  %v1331_v44 = vrot.slane %v4988_v16, 1  ;;  %v5065_v4 = vadd.f32 %v1976_v8, %v1920_v54  ;;  %v5069_v45 = vsel %vm4803_vm14, %v994_v55, 0.0  ;;  %v5855_v43 = vrot.slane %v4354_v49, 1  ;;  %v5861_v54 = vld [vmem:[#allocation50_spill] sm:$0xff] }
 0x25b   : > { %5852 = vst [vmem:[#allocation140_spill] sm:$0xff] %v5060_v17  ;;  %5854 = vst [vmem:[#allocation142_spill] sm:$0xff] %v5069_v45  ;;  %v5856_v51 = vrot.slane %v4368_v40, 1  ;;  %v1962_v13 = vmul.f32 %v5805_v18, %v5857_v29  ;;  %v5078_v14 = vadd.f32 %v1507_v0, %v1451_v9  ;;  %v5081_v53 = vsel %vm1108_vm3, %v1271_v46, %v1272_v59 }
 0x25c   : > { %5853 = vst [vmem:[#allocation141_spill] sm:$0xff] %v5065_v4  ;;  %5859 = vst [vmem:[#allocation143_spill] sm:$0xff] %v5081_v53  ;;  %v5085_v8 = vsel %vm4803_vm14, %v999_v6, 0.0  ;;  %v1979_v58 = vadd.f32 %v5862_v11, %v5861_v54  ;;  %v5089_v49 = vadd.f32 %v1833_v20, %v1777_v22  ;;  %v1452_v40 = vadd.f32 %v1436_v24, %v4099_v26 }
 0x25d   : > { %v1318_v32 = vsel %vm1169_vm7, %v5856_v51, %v5855_v43  ;;  %5858 = vst [vmem:[#allocation47_spill] sm:$0xff] %v5078_v14  ;;  %5860 = vst [vmem:[#allocation144_spill] sm:$0xff] %v5085_v8  ;;  %v1508_v55 = vmul.f32 %v4067_v5, %v4988_v16  ;;  %v5864_v43 = vld [vmem:[#allocation49_spill] sm:$0xff]  ;;  %v5098_v46 = vsel %vm1169_vm7, %v1331_v44, %v5629_v60  ;;  %v1274_v37 = vrot.slane %v5069_v45, 7 }
 0x25e   : > { %5863 = vst [vmem:[#allocation50_spill] sm:$0xff] %v5089_v49  ;;  %v1978_v0 = vadd.f32 %v1962_v13, %v5864_v43  ;;  %5865 = vst [vmem:[#allocation46_spill] sm:$0xff] %v5098_v46  ;;  %v1570_v9 = vmul.f32 %v4069_v7, %v1318_v32  ;;  %v2047_v59 = vmul.f32 0.70710677, %v1979_v58  ;;  %v2060_v6 = vmul.f32 0.70710677, %v5065_v4 }
 0x25f   : > { %v1437_v22 = vmul.f32 %v4079_v15, %v5081_v53  ;;  %v1275_v24 = vrot.slane %v5085_v8, 7  ;;  %v1335_v51 = vrot.slane %v5085_v8, 1  ;;  %v1334_v29 = vrot.slane %v5069_v45, 1 }
 0x260   : > { %v2046_v20 = vmul.f32 0.70710677, %v1978_v0  ;;  %v1854_v44 = vmul.f32 %v5773_v2, %v4443_v47  ;;  %3074 = verf.f32 %v2047_v59  ;;  %v5112_v13 = vmul.f32 %v4067_v5, %v5035_v50  ;;  %v2794_v59 = vpop.f32.mrf.mxu1 }
 0x261   : > { %v1524_v54 = vadd.f32 %v1508_v55, %v1452_v40  ;;  %v1580_v11 = vmul.f32 %v4069_v7, %v5098_v46  ;;  %v5118_v15 = vmul.f32 %v4103_v27, %v5035_v50  ;;  %v5122_v43 = vmul.f32 %v4103_v27, %v4988_v16  ;;  %v5935_v50 = vld [vmem:[#allocation113_spill] sm:$0xff] }
 0x262   : > { %5866 = vst [vmem:[#allocation49_spill] sm:$0xff] %v5112_v13  ;;  %3076 = verf.f32 %v2046_v20  ;;  %v5126_v47 = vmul.f32 %v4116_v19, %v4988_v16  ;;  %v1308_v5 = vsel %vm1108_vm3, 0.0, %v1274_v37  ;;  %v5131_v40 = vmul.f32 %v5770_v12, %v5041_v21  ;;  %v5876_v19 = vld [vmem:[#allocation63_spill] sm:$0xff]  ;;  %v5938_v21 = vld [vmem:[#allocation112_spill] sm:$0xff] }
 0x263   : > { %5867 = vst [vmem:[#allocation145_spill] sm:$0xff] %v5118_v15  ;;  %5868 = vst [vmem:[#allocation146_spill] sm:$0xff] %v5122_v43  ;;  %v5135_v55 = vmul.f32 %v5770_v12, %v5081_v53  ;;  %v5139_v20 = vmul.f32 %v4103_v27, %v5085_v8  ;;  %v5142_v60 = vsel %vm1108_vm3, %v1274_v37, %v1275_v24  ;;  %3078 = verf.f32 %v2060_v6  ;;  %v5878_v8 = vld [vmem:[#allocation54_spill] sm:$0xff] }
 0x264   : > { %5869 = vst [vmem:[#allocation147_spill] sm:$0xff] %v5126_v47  ;;  %5870 = vst [vmem:[#allocation148_spill] sm:$0xff] %v5131_v40  ;;  %v5145_v16 = vadd.f32 %v1437_v22, %v4099_v26  ;;  %v5148_v4 = vsel %vm1169_vm7, %v1334_v29, %v1335_v51  ;;  %v1870_v52 = vadd.f32 %v1854_v44, %v5876_v19  ;;  %v5152_v15 = vsel %vm1169_vm7, %v1335_v51, 0.0  ;;  %v1003_v22 = vpop.f32.mrf.mxu1  ;;  %v5884_v29 = vld [vmem:[#allocation67_spill] sm:$0xff]  ;;  %v5912_v40 = vld [vmem:[#allocation93_spill] sm:$0xff] }
 0x265   : > { %5871 = vst [vmem:[#allocation149_spill] sm:$0xff] %v5135_v55  ;;  %5872 = vst [vmem:[#allocation150_spill] sm:$0xff] %v5139_v20  ;;  %v1596_v53 = vadd.f32 %v1580_v11, %v1524_v54  ;;  %v1652_v49 = vmul.f32 %v5770_v12, %v1308_v5  ;;  %v1964_v20 = vmul.f32 %v5805_v18, %v5878_v8  ;;  %v5883_v8 = vld [vmem:[#allocation79_spill] sm:$0xff]  ;;  %v5896_v55 = vld [vmem:[#allocation42_spill] sm:$0xff] }
 0x266   : > { %5873 = vst [vmem:[#allocation151_spill] sm:$0xff] %v5142_v60  ;;  %5874 = vst [vmem:[#allocation152_spill] sm:$0xff] %v5145_v16  ;;  %v5159_v37 = vmul.f32 %v5770_v12, %v5142_v60  ;;  %v5163_v26 = vmul.f32 %v4103_v27, %v5069_v45  ;;  %v1586_v6 = vadd.f32 %v1570_v9, %v4506_v56  ;;  %v5885_v44 = vld [vmem:[#allocation59_spill] sm:$0xff]  ;;  %v5886_v27 = vld [vmem:[#allocation74_spill] sm:$0xff] }
 0x267   : > { %5875 = vst [vmem:[#allocation153_spill] sm:$0xff] %v5148_v4  ;;  %5877 = vst [vmem:[#allocation63_spill] sm:$0xff] %v5152_v15  ;;  %v1784_v19 = vmul.f32 %v4108_v36, %v1318_v32  ;;  %v5169_v24 = vmul.f32 %v4108_v36, %v5148_v4  ;;  %v5172_v51 = vmul.f32 %v5773_v2, %v1308_v5  ;;  %v5887_v9 = vld [vmem:[#allocation61_spill] sm:$0xff]  ;;  %v5888_v60 = vld [vmem:[#allocation56_spill] sm:$0xff] }
 0x268   : > { %5879 = vst [vmem:[#allocation54_spill] sm:$0xff] %v5159_v37  ;;  %5880 = vst [vmem:[#allocation154_spill] sm:$0xff] %v5163_v26  ;;  %v1943_v12 = vadd.f32 %v5884_v29, %v5883_v8  ;;  %v5177_v54 = vadd.f32 %v1964_v20, %v5885_v44  ;;  %v1942_v11 = vadd.f32 %v5886_v27, %v1870_v52  ;;  %v5889_v15 = vld [vmem:[#allocation48_spill] sm:$0xff]  ;;  %v5892_v29 = vld [vmem:[#allocation78_spill] sm:$0xff]  ;;  %v2030_v26 = vmul.f32 0.5, %v1978_v0 }
 0x269   : > { %5881 = vst [vmem:[#allocation155_spill] sm:$0xff] %v5169_v24  ;;  %5882 = vst [vmem:[#allocation156_spill] sm:$0xff] %v5172_v51  ;;  %v1998_v56 = vmul.f32 %v5766_v48, %v1318_v32  ;;  %v1585_v45 = vadd.f32 %v5888_v60, %v5887_v9  ;;  %v5890_v37 = vld [vmem:[#allocation44_spill] sm:$0xff]  ;;  %v5185_v24 = vadd.f32 %v1652_v49, %v1596_v53  ;;  %v5894_v27 = vld [vmem:[#allocation73_spill] sm:$0xff]  ;;  %v2031_v53 = vmul.f32 0.5, %v1979_v58 }
 0x26a   : > { %v1693_v4 = vadd.f32 %v5890_v37, %v5889_v15  ;;  %v5188_v5 = vadd.f32 %v4968_v57, %v2794_v59  ;;  %v1004_v8 = vadd.f32 %v4968_v57, %v1003_v22  ;;  %v2048_v20 = vmul.f32 0.70710677, %v5177_v54  ;;  %v5893_v52 = vld [vmem:[#allocation84_spill] sm:$0xff]  ;;  %v5895_v60 = vld [vmem:[#allocation45_spill] sm:$0xff]  ;;  %v5898_v57 = vld [vmem:[#allocation71_spill] sm:$0xff] }
 0x26b   : > { %5891 = vst [vmem:[#allocation79_spill] sm:$0xff] %v5185_v24  ;;  %v1800_v44 = vadd.f32 %v1784_v19, %v5892_v29  ;;  %v1856_v32 = vmul.f32 %v5773_v2, %v5893_v52  ;;  %v1657_v51 = vadd.f32 %v5894_v27, %v1585_v45  ;;  %v2015_v15 = vadd.f32 %v5896_v55, %v1943_v12  ;;  %v5897_v49 = vld [vmem:[#allocation89_spill] sm:$0xff]  ;;  %v5900_v24 = vld [vmem:[#allocation76_spill] sm:$0xff]  ;;  %v5904_v55 = vld [vmem:[#allocation91_spill] sm:$0xff] }
 0x26c   : > { %v1765_v9 = vadd.f32 %v5895_v60, %v1693_v4  ;;  %3080 = verf.f32 %v2048_v20  ;;  %v1658_v59 = vadd.f32 %v5897_v49, %v1586_v6  ;;  %v2014_v37 = vadd.f32 %v1998_v56, %v1942_v11  ;;  %v5902_v29 = vld [vmem:[#allocation57_spill] sm:$0xff]  ;;  %v5903_v4 = vld [vmem:[#allocation66_spill] sm:$0xff] }
 0x26d   : > { %v5899_v22 = vrot.slane %v5898_v57, 1  ;;  %v5901_v43 = vrot.slane %v5900_v24, 1  ;;  %v3075_v47 = vpop.eup %3074  ;;  %v1729_v27 = vadd.f32 %v5903_v4, %v1657_v51  ;;  %v5905_v12 = vld [vmem:[#allocation70_spill] sm:$0xff]  ;;  %v1872_v56 = vadd.f32 %v1856_v32, %v1800_v44  ;;  %v5906_v20 = vld [vmem:[#allocation53_spill] sm:$0xff]  ;;  %v5907_v24 = vld [vmem:[#allocation51_spill] sm:$0xff] }
 0x26e   : > { %v1837_v52 = vadd.f32 %v5902_v29, %v1765_v9  ;;  %v1730_v58 = vadd.f32 %v5904_v55, %v1658_v59  ;;  %v1966_v6 = vmul.f32 %v5805_v18, %v5905_v12  ;;  %v2079_v0 = vadd.f32 1.0, %v3075_v47  ;;  %v5908_v29 = vld [vmem:[#allocation43_spill] sm:$0xff]  ;;  %v5909_v55 = vld [vmem:[#allocation86_spill] sm:$0xff] }
 0x26f   : > { %v1321_v19 = vsel %vm1169_vm7, %v5901_v43, %v5899_v22  ;;  %v3077_v11 = vpop.eup %3076  ;;  %v1965_v43 = vmul.f32 %v5805_v18, %v5907_v24  ;;  %v1363_v51 = vsel %vm1169_vm7, %v5899_v22, 0.0  ;;  %v1857_v12 = vmul.f32 %v5773_v2, %v5909_v55  ;;  %v5914_v55 = vld [vmem:[#allocation81_spill] sm:$0xff] }
 0x270   : > { %v1786_v45 = vmul.f32 %v4108_v36, %v1321_v19  ;;  %v1909_v60 = vadd.f32 %v5906_v20, %v1837_v52  ;;  %v2078_v49 = vadd.f32 1.0, %v3077_v11  ;;  %v1572_v9 = vmul.f32 %v4069_v7, %v1321_v19  ;;  %v5222_v32 = vpop.eup %3078  ;;  %v5911_v11 = vld [vmem:[#allocation69_spill] sm:$0xff] }
 0x271   : > { %v1982_v59 = vadd.f32 %v1966_v6, %v5908_v29  ;;  %v2095_v4 = vmul.f32 %v2079_v0, %v2031_v53  ;;  %v1858_v44 = vmul.f32 %v5773_v2, %v4713_v63  ;;  %5910 = vst [vmem:[#allocation67_spill] sm:$0xff] %v5222_v32  ;;  %v1801_v20 = vadd.f32 %v5911_v11, %v1729_v27  ;;  %v5913_v29 = vld [vmem:[#allocation92_spill] sm:$0xff] }
 0x272   : > { %v1981_v47 = vadd.f32 %v1965_v43, %v1909_v60  ;;  %v2094_v52 = vmul.f32 %v2078_v49, %v2030_v26  ;;  %v1802_v24 = vadd.f32 %v1786_v45, %v1730_v58  ;;  %v1944_v22 = vadd.f32 %v5912_v40, %v1872_v56  ;;  %v5915_v26 = vld [vmem:[#allocation94_spill] sm:$0xff]  ;;  %v5919_v27 = vld [vmem:[#allocation52_spill] sm:$0xff] }
 0x273   : > { %v2050_v14 = vmul.f32 0.70710677, %v1982_v59  ;;  %v2111_v57 = vmul.f32 %v2095_v4, %v2015_v15  ;;  %v2000_v6 = vmul.f32 %v5766_v48, %v1321_v19  ;;  %v1517_v60 = vadd.f32 %v5914_v55, %v5913_v29  ;;  %v5918_v19 = vld [vmem:[#allocation58_spill] sm:$0xff]  ;;  %v5920_v58 = vld [vmem:[#allocation96_spill] sm:$0xff]  ;;  %v5924_v55 = vld [vmem:[#allocation55_spill] sm:$0xff] }
 0x274   : > { %v2049_v53 = vmul.f32 0.70710677, %v1981_v47  ;;  %v2110_v0 = vmul.f32 %v2094_v52, %v2014_v37  ;;  %v1573_v43 = vmul.f32 %v4069_v7, %v1363_v51  ;;  %v5232_v63 = vsel %vm4898_vm1, %v1004_v8, 0.0  ;;  %v5933_v32 = vld [vmem:[#allocation60_spill] sm:$0xff] }
 0x275   : > { %3082 = verf.f32 %v2050_v14  ;;  %v5916_v45 = vrot.slane %v5915_v26, 1  ;;  %v5917_v15 = vrot.slane %v4658_v41, 1  ;;  %v1695_v37 = vadd.f32 %v5919_v27, %v5918_v19  ;;  %v5923_v41 = vld [vmem:[#allocation68_spill] sm:$0xff] }
 0x276   : > { %3084 = verf.f32 %v2049_v53  ;;  %2827 = vmatprep.mubr.f32.mxu0 %v2110_v0  ;;  %v1588_v56 = vadd.f32 %v1572_v9, %v5920_v58  ;;  %v1873_v49 = vadd.f32 %v1857_v12, %v1801_v20  ;;  %v1874_v4 = vadd.f32 %v1858_v44, %v1802_v24  ;;  %v5922_v53 = vld [vmem:[#allocation77_spill] sm:$0xff]  ;;  %v5927_v26 = vld [vmem:[#allocation72_spill] sm:$0xff]  ;;  %v5928_v58 = vld [vmem:[#allocation83_spill] sm:$0xff] }
 0x277   : > { %v1324_v40 = vsel %vm1169_vm7, %v5917_v15, %v5916_v45  ;;  %v5921_v14 = vmov %v5916_v45  ;;  %2828 = vmatmul.mubr.f32.vlgmr.msra.gmra.mxu0 %v2111_v57  ;;  %v2016_v52 = vadd.f32 %v2000_v6, %v1944_v22  ;;  %v1787_v11 = vmul.f32 %v4108_v36, %v1363_v51  ;;  %v5925_v24 = vld [vmem:[#allocation109_spill] sm:$0xff] }
 0x278   : > { %v1364_v8 = vsel %vm1169_vm7, %v5921_v14, 0.0  ;;  %v1587_v29 = vadd.f32 %v5923_v41, %v5922_v53  ;;  %v1767_v45 = vadd.f32 %v5924_v55, %v1695_v37  ;;  %v2032_v15 = vmul.f32 0.5, %v5177_v54  ;;  %v5926_v57 = vld [vmem:[#allocation97_spill] sm:$0xff]  ;;  %v5929_v14 = vld [vmem:[#allocation110_spill] sm:$0xff]  ;;  %v5932_v41 = vld [vmem:[#allocation64_spill] sm:$0xff] }
 0x279   : > { %v1589_v0 = vadd.f32 %v1573_v43, %v1517_v60  ;;  %v2001_v9 = vmul.f32 %v5766_v48, %v1363_v51  ;;  %v1574_v12 = vmul.f32 %v4069_v7, %v1324_v40  ;;  %v3081_v44 = vpop.eup %3080  ;;  %v2002_v20 = vmul.f32 %v5766_v48, %v1324_v40  ;;  %v5930_v60 = vld [vmem:[#allocation85_spill] sm:$0xff]  ;;  %v5931_v43 = vld [vmem:[#allocation90_spill] sm:$0xff] }
 0x27a   : > { %v1519_v22 = vadd.f32 %v5926_v57, %v5925_v24  ;;  %v1575_v6 = vmul.f32 %v4069_v7, %v1364_v8  ;;  %v1839_v19 = vadd.f32 %v5927_v26, %v1767_v45  ;;  %v2080_v27 = vadd.f32 1.0, %v3081_v44  ;;  %v5934_v24 = vld [vmem:[#allocation106_spill] sm:$0xff] }
 0x27b   : > { %v1945_v37 = vadd.f32 %v5928_v58, %v1873_v49  ;;  %v1946_v54 = vadd.f32 %v5929_v14, %v1874_v4  ;;  %v1968_v51 = vmul.f32 %v5805_v18, %v5930_v60  ;;  %v1659_v53 = vadd.f32 %v5931_v43, %v1587_v29  ;;  %v5936_v49 = vld [vmem:[#allocation88_spill] sm:$0xff] }
 0x27c   : > { %v1911_v55 = vadd.f32 %v5932_v41, %v1839_v19  ;;  %v1967_v13 = vmul.f32 %v5805_v18, %v5933_v32  ;;  %v1660_v57 = vadd.f32 %v5934_v24, %v1588_v56  ;;  %v2096_v16 = vmul.f32 %v2080_v27, %v2032_v15  ;;  %v5937_v41 = vld [vmem:[#allocation82_spill] sm:$0xff] }
 0x27d   : > { %v1590_v45 = vadd.f32 %v1574_v12, %v5935_v50  ;;  %v1788_v44 = vmul.f32 %v4108_v36, %v1324_v40  ;;  %v1984_v26 = vadd.f32 %v1968_v51, %v5936_v49  ;;  %v2033_v4 = vmul.f32 0.5, %v1981_v47  ;;  %v5941_v40 = vld [vmem:[#allocation108_spill] sm:$0xff]  ;;  %v5942_v47 = vld [vmem:[#allocation102_spill] sm:$0xff] }
 0x27e   : > { %v2034_v58 = vmul.f32 0.5, %v1982_v59  ;;  %v1591_v14 = vadd.f32 %v1575_v6, %v1519_v22  ;;  %v1983_v60 = vadd.f32 %v1967_v13, %v1911_v55  ;;  %v2112_v46 = vmul.f32 %v2096_v16, %v2016_v52  ;;  %v5943_v16 = vld [vmem:[#allocation40_spill] sm:$0xff]  ;;  %v5944_v52 = vld [vmem:[#allocation62_spill] sm:$0xff] }
 0x27f   : > { %v2017_v29 = vadd.f32 %v2001_v9, %v1945_v37  ;;  %v2018_v43 = vadd.f32 %v2002_v20, %v1946_v54  ;;  %v2052_v19 = vmul.f32 0.70710677, %v1984_v26  ;;  %v1731_v17 = vadd.f32 %v5937_v41, %v1659_v53  ;;  %v5946_v53 = vld [vmem:[#allocation65_spill] sm:$0xff]  ;;  %v5948_v41 = vld [vmem:[#allocation87_spill] sm:$0xff] }
 0x280   : > { %v2051_v32 = vmul.f32 0.70710677, %v1983_v60  ;;  %v5939_v56 = vrot.slane %v5938_v21, 1  ;;  %v5940_v15 = vrot.slane %v4757_v42, 1  ;;  %v1732_v12 = vadd.f32 %v5941_v40, %v1660_v57  ;;  %2830 = vmatprep.mubr.f32.mxu0 %v2112_v46  ;;  %v5945_v42 = vld [vmem:[#allocation107_spill] sm:$0xff] }
 0x281   : > { %v1789_v59 = vmul.f32 %v4108_v36, %v1364_v8  ;;  %v1859_v13 = vmul.f32 %v5773_v2, %v5942_v47  ;;  %3086 = verf.f32 %v2052_v19  ;;  %v1697_v9 = vadd.f32 %v5944_v52, %v5943_v16 }
 0x282   : > { %v1327_v50 = vsel %vm1169_vm7, %v5940_v15, %v5939_v56  ;;  %v3083_v20 = vpop.eup %3082  ;;  %v1663_v22 = vadd.f32 %v4907_v34, %v1591_v14  ;;  %v2003_v6 = vmul.f32 %v5766_v48, %v1364_v8  ;;  %3088 = verf.f32 %v2051_v32  ;;  %v5949_v15 = vld [vmem:[#allocation98_spill] sm:$0xff] }
 0x283   : > { %v1661_v27 = vadd.f32 %v5945_v42, %v1589_v0  ;;  %v3085_v37 = vpop.eup %3084  ;;  %v2082_v54 = vadd.f32 1.0, %v3083_v20  ;;  %v1576_v46 = vmul.f32 %v4069_v7, %v1327_v50  ;;  %v1860_v51 = vmul.f32 %v5773_v2, %v4829_v10  ;;  %v5950_v10 = vld [vmem:[#allocation118_spill] sm:$0xff] }
 0x284   : > { %v1769_v55 = vadd.f32 %v5946_v53, %v1697_v9  ;;  %v2081_v24 = vadd.f32 1.0, %v3085_v37  ;;  %v1803_v57 = vadd.f32 %v1787_v11, %v1731_v17  ;;  %v1790_v49 = vmul.f32 %v4108_v36, %v1327_v50  ;;  %v5951_v11 = vld [vmem:[#allocation80_spill] sm:$0xff]  ;;  %v5954_v37 = vld [vmem:[#allocation101_spill] sm:$0xff] }
 0x285   : > { %v1804_v19 = vadd.f32 %v1788_v44, %v1732_v12  ;;  %v2098_v34 = vmul.f32 %v2082_v54, %v2034_v58  ;;  %v2004_v8 = vmul.f32 %v5766_v48, %v1327_v50  ;;  %v5947_v14 = vmov %v5939_v56  ;;  %v5952_v44 = vld [vmem:[#allocation75_spill] sm:$0xff] }
 0x286   : > { %v1365_v0 = vsel %vm1169_vm7, %v5947_v14, 0.0  ;;  %v1841_v32 = vadd.f32 %v5948_v41, %v1769_v55  ;;  %v2097_v56 = vmul.f32 %v2081_v24, %v2033_v4  ;;  %v1733_v40 = vadd.f32 %v5949_v15, %v1661_v27  ;;  %v5953_v4 = vld [vmem:[#allocation117_spill] sm:$0xff]  ;;  %v5958_v24 = vld [vmem:[#allocation100_spill] sm:$0xff] }
 0x287   : > { %v1735_v47 = vadd.f32 %v5950_v10, %v1663_v22  ;;  %v1791_v16 = vmul.f32 %v4108_v36, %v1365_v0  ;;  %v2114_v17 = vmul.f32 %v2098_v34, %v2018_v43  ;;  %v1969_v58 = vmul.f32 %v5805_v18, %v5952_v44 }
 0x288   : > { %v1913_v52 = vadd.f32 %v5951_v11, %v1841_v32  ;;  %v1662_v50 = vadd.f32 %v4885_v35, %v1590_v45  ;;  %v2113_v21 = vmul.f32 %v2097_v56, %v2017_v29  ;;  %v1875_v12 = vadd.f32 %v1859_v13, %v1803_v57  ;;  %v5955_v35 = vld [vmem:[#allocation105_spill] sm:$0xff]  ;;  %v5956_v45 = vld [vmem:[#allocation39_spill] sm:$0xff] }
 0x289   : > { %v1592_v9 = vadd.f32 %v1576_v46, %v4914_v62  ;;  %v1876_v20 = vadd.f32 %v1860_v51, %v1804_v19  ;;  %v1521_v42 = vadd.f32 %v5953_v4, %v4903_v38  ;;  %v1577_v22 = vmul.f32 %v4069_v7, %v1365_v0  ;;  %v5957_v46 = vld [vmem:[#allocation104_spill] sm:$0xff]  ;;  %v5962_v11 = vld [vmem:[#allocation123_spill] sm:$0xff] }
 0x28a   : > { %v1985_v27 = vadd.f32 %v1969_v58, %v1913_v52  ;;  %v1970_v43 = vmul.f32 %v5805_v18, %v5954_v37  ;;  %2831 = vmatmul.mubr.f32.gmra.mxu0 %v2113_v21  ;;  %v2036_v54 = vmul.f32 0.5, %v1984_v26  ;;  %v1805_v53 = vadd.f32 %v1789_v59, %v1733_v40  ;;  %v5965_v4 = vld [vmem:[#allocation103_spill] sm:$0xff] }
 0x28b   : > { %v1734_v55 = vadd.f32 %v4911_v30, %v1662_v50  ;;  %v1987_v29 = vadd.f32 %v5956_v45, %v5955_v35  ;;  %2833 = vmatprep.mubr.f32.mxu0 %v2114_v17  ;;  %v1807_v62 = vadd.f32 %v1791_v16, %v1735_v47  ;;  %v1861_v13 = vmul.f32 %v5773_v2, %v4858_v1  ;;  %v5966_v37 = vld [vmem:[#allocation95_spill] sm:$0xff]  ;;  %v5967_v35 = vld [vmem:[#allocation137_spill] sm:$0xff] }
 0x28c   : > { %v2053_v38 = vmul.f32 0.70710677, %v1985_v27  ;;  %v1986_v51 = vadd.f32 %v1970_v43, %v5957_v46  ;;  %v1947_v57 = vadd.f32 %v5958_v24, %v1875_v12  ;;  %v2035_v19 = vmul.f32 0.5, %v1983_v60  ;;  %v5961_v60 = vld [vmem:[#allocation120_spill] sm:$0xff]  ;;  %v5970_v24 = vld [vmem:[#allocation134_spill] sm:$0xff] }
 0x28d   : > { %v1948_v34 = vadd.f32 %v4918_v61, %v1876_v20  ;;  %v2055_v26 = vmul.f32 0.70710677, %v1987_v29  ;;  %v5959_v30 = vrot.slane %v4931_v3, 1  ;;  %v5960_v59 = vrot.slane %v4935_v31, 1 }
 0x28e   : > { %3090 = verf.f32 %v2053_v38  ;;  %v2054_v41 = vmul.f32 0.70710677, %v1986_v51  ;;  %v1664_v32 = vadd.f32 %v5026_v28, %v1592_v9  ;;  %v3087_v1 = vpop.eup %3086  ;;  %v1806_v56 = vadd.f32 %v1790_v49, %v1734_v55  ;;  %v5969_v38 = vld [vmem:[#allocation140_spill] sm:$0xff] }
 0x28f   : > { %v1330_v14 = vsel %vm1169_vm7, %v5960_v59, %v5959_v30  ;;  %v1862_v15 = vmul.f32 %v5773_v2, %v4982_v25  ;;  %3092 = verf.f32 %v2055_v26  ;;  %v1972_v61 = vmul.f32 %v5805_v18, %v5961_v60  ;;  %v3089_v40 = vpop.eup %3088  ;;  %v5973_v30 = vld [vmem:[#allocation122_spill] sm:$0xff] }
 0x290   : > { %v2084_v10 = vadd.f32 1.0, %v3087_v1  ;;  %v1877_v47 = vadd.f32 %v1861_v13, %v1805_v53  ;;  %v1879_v3 = vadd.f32 %v5050_v39, %v1807_v62  ;;  %3094 = verf.f32 %v2054_v41  ;;  %v5968_v62 = vld [vmem:[#allocation99_spill] sm:$0xff]  ;;  %v5974_v1 = vld [vmem:[#allocation129_spill] sm:$0xff]  ;;  %v5976_v60 = vld [vmem:[#allocation114_spill] sm:$0xff] }
 0x291   : > { %v2019_v31 = vadd.f32 %v2003_v6, %v1947_v57  ;;  %v2083_v16 = vadd.f32 1.0, %v3089_v40  ;;  %v2020_v17 = vadd.f32 %v2004_v8, %v1948_v34  ;;  %v5327_v28 = vadd.f32 %v1972_v61, %v5962_v11  ;;  %v5963_v6 = vld [vmem:[#allocation119_spill] sm:$0xff]  ;;  %v5980_v11 = vld [vmem:[#allocation136_spill] sm:$0xff] }
 0x292   : > { %v2100_v49 = vmul.f32 %v2084_v10, %v2036_v54  ;;  %v2005_v52 = vmul.f32 %v5766_v48, %v1365_v0  ;;  %v1792_v25 = vmul.f32 %v4108_v36, %v1330_v14  ;;  %v1736_v44 = vadd.f32 %v5018_v33, %v1664_v32  ;;  %v5964_v8 = vld [vmem:[#allocation131_spill] sm:$0xff] }
 0x293   : > { %v2099_v58 = vmul.f32 %v2083_v16, %v2035_v19  ;;  %v1578_v50 = vmul.f32 %v4069_v7, %v1330_v14  ;;  %v1878_v21 = vadd.f32 %v1862_v15, %v1806_v56  ;;  %v2056_v39 = vmul.f32 0.70710677, %v5327_v28  ;;  %v5975_v15 = vld [vmem:[#allocation121_spill] sm:$0xff] }
 0x294   : > { %v2116_v12 = vmul.f32 %v2100_v49, %v2020_v17  ;;  %v1949_v9 = vadd.f32 %v5963_v6, %v1877_v47  ;;  %v1951_v20 = vadd.f32 %v5964_v8, %v1879_v3  ;;  %v1701_v43 = vadd.f32 %v5966_v37, %v5965_v4  ;;  %v5978_v47 = vld [vmem:[#allocation115_spill] sm:$0xff]  ;;  %v5985_v6 = vld [vmem:[#allocation148_spill] sm:$0xff] }
 0x295   : > { %v5341_v0 = vsel %vm4898_vm1, %v5188_v5, 0.0  ;;  %v1277_v33 = vrot.slane %v5232_v63, 7  ;;  %v2115_v54 = vmul.f32 %v2099_v58, %v2019_v31  ;;  %3096 = verf.f32 %v2056_v39  ;;  %v5971_v5 = vld [vmem:[#allocation125_spill] sm:$0xff]  ;;  %v5979_v31 = vld [vmem:[#allocation111_spill] sm:$0xff] }
 0x296   : > { %v1593_v53 = vadd.f32 %v1577_v22, %v1521_v42  ;;  %v1808_v55 = vadd.f32 %v1792_v25, %v1736_v44  ;;  %v1864_v45 = vmul.f32 %v5773_v2, %v5967_v35  ;;  %v1773_v13 = vadd.f32 %v5968_v62, %v1701_v43  ;;  %v5972_v42 = vld [vmem:[#allocation133_spill] sm:$0xff]  ;;  %v5987_v37 = vld [vmem:[#allocation127_spill] sm:$0xff]  ;;  %v5989_v62 = vld [vmem:[#allocation130_spill] sm:$0xff] }
 0x297   : > { %2834 = vmatmul.mubr.f32.gmra.mxu0 %v2115_v54  ;;  %v1594_v46 = vadd.f32 %v1578_v50, %v5969_v38  ;;  %v1950_v57 = vadd.f32 %v5970_v24, %v1878_v21  ;;  %v2006_v23 = vmul.f32 %v5766_v48, %v1330_v14  ;;  %v1974_v19 = vmul.f32 %v5805_v18, %v5971_v5  ;;  %v5977_v14 = vld [vmem:[#allocation46_spill] sm:$0xff]  ;;  %v5983_v50 = vld [vmem:[#allocation152_spill] sm:$0xff]  ;;  %v5984_v21 = vld [vmem:[#allocation49_spill] sm:$0xff] }
 0x298   : > { %2836 = vmatprep.mubr.f32.mxu0 %v2116_v12  ;;  %v2021_v34 = vadd.f32 %v2005_v52, %v1949_v9  ;;  %v2037_v26 = vmul.f32 0.5, %v1985_v27  ;;  %v2023_v22 = vadd.f32 %v5972_v42, %v1951_v20  ;;  %v1845_v59 = vadd.f32 %v5973_v30, %v1773_v13  ;;  %v5982_v52 = vld [vmem:[#allocation116_spill] sm:$0xff]  ;;  %v5986_v20 = vld [vmem:[#allocation138_spill] sm:$0xff]  ;;  %v5990_v24 = vld [vmem:[#allocation147_spill] sm:$0xff] }
 0x299   : > { %v2038_v41 = vmul.f32 0.5, %v1986_v51  ;;  %v2039_v32 = vmul.f32 0.5, %v1987_v29  ;;  %v5355_v56 = vadd.f32 %v1974_v19, %v5974_v1  ;;  %v1703_v61 = vadd.f32 %v5976_v60, %v5975_v15  ;;  %v5991_v19 = vld [vmem:[#allocation146_spill] sm:$0xff]  ;;  %v5995_v60 = vld [vmem:[#allocation128_spill] sm:$0xff] }
 0x29a   : > { %v1880_v40 = vadd.f32 %v1864_v45, %v1808_v55  ;;  %v2008_v10 = vmul.f32 %v5766_v48, %v5977_v14  ;;  %v1917_v3 = vadd.f32 %v5978_v47, %v1845_v59  ;;  %v1973_v27 = vmul.f32 %v5805_v18, %v5979_v31  ;;  %v5988_v45 = vld [vmem:[#allocation47_spill] sm:$0xff]  ;;  %v5994_v1 = vld [vmem:[#allocation154_spill] sm:$0xff] }
 0x29b   : > { %v3091_v16 = vpop.eup %3090  ;;  %v2022_v17 = vadd.f32 %v2006_v23, %v1950_v57  ;;  %v5981_v51 = vrot.slane %v5980_v11, 1  ;;  %v2058_v49 = vmul.f32 0.70710677, %v5355_v56  ;;  %v1775_v25 = vadd.f32 %v5982_v52, %v1703_v61  ;;  %v5993_v59 = vld [vmem:[#allocation79_spill] sm:$0xff]  ;;  %v5998_v52 = vld [vmem:[#allocation50_spill] sm:$0xff] }
 0x29c   : > { %v3093_v44 = vpop.eup %3092  ;;  %v2085_v58 = vadd.f32 1.0, %v3091_v16  ;;  %v1525_v39 = vadd.f32 %v5984_v21, %v5983_v50  ;;  %v5373_v12 = vadd.f32 %v1973_v27, %v1917_v3  ;;  %v1666_v18 = vadd.f32 %v5985_v6, %v1594_v46  ;;  %v5996_v3 = vld [vmem:[#allocation149_spill] sm:$0xff]  ;;  %v6000_v21 = vld [vmem:[#allocation132_spill] sm:$0xff]  ;;  %v6001_v6 = vld [vmem:[#allocation143_spill] sm:$0xff] }
 0x29d   : > { %v5367_v29 = vsel %vm1169_vm7, %v5981_v51, 0.0  ;;  %v3095_v9 = vpop.eup %3094  ;;  %v2087_v8 = vadd.f32 1.0, %v3093_v44  ;;  %v1665_v4 = vadd.f32 %v5986_v20, %v1593_v53  ;;  %3098 = verf.f32 %v2058_v49  ;;  %v6004_v20 = vld [vmem:[#allocation139_spill] sm:$0xff] }
 0x29e   : > { %v1847_v43 = vadd.f32 %v5987_v37, %v1775_v25  ;;  %v2101_v54 = vmul.f32 %v2085_v58, %v2037_v26  ;;  %v2086_v55 = vadd.f32 1.0, %v3095_v9  ;;  %v1581_v35 = vmul.f32 %v4069_v7, %v5367_v29  ;;  %v5992_v26 = vld [vmem:[#allocation124_spill] sm:$0xff]  ;;  %v5999_v25 = vld [vmem:[#allocation135_spill] sm:$0xff]  ;;  %v6005_v37 = vld [vmem:[#allocation41_spill] sm:$0xff] }
 0x29f   : > { %v1595_v13 = vadd.f32 %v5989_v62, %v5988_v45  ;;  %v2103_v38 = vmul.f32 %v2087_v8, %v2039_v32  ;;  %v1952_v57 = vadd.f32 %v5990_v24, %v1880_v40  ;;  %v2057_v46 = vmul.f32 0.70710677, %v5373_v12 }
 0x2a0   : > { %v1794_v23 = vmul.f32 %v4108_v36, %v5977_v14  ;;  %v2117_v53 = vmul.f32 %v2101_v54, %v2021_v34  ;;  %v2102_v5 = vmul.f32 %v2086_v55, %v2038_v41  ;;  %v1738_v42 = vadd.f32 %v5991_v19, %v1666_v18  ;;  %v5997_v14 = vld [vmem:[#allocation126_spill] sm:$0xff]  ;;  %v6006_v54 = vld [vmem:[#allocation63_spill] sm:$0xff] }
 0x2a1   : > { %v1919_v30 = vadd.f32 %v5992_v26, %v1847_v43  ;;  %v1740_v7 = vadd.f32 %v5994_v1, %v5993_v59  ;;  %v2119_v15 = vmul.f32 %v2103_v38, %v2023_v22  ;;  %v1737_v61 = vadd.f32 %v5995_v60, %v1665_v4  ;;  %v6010_v26 = vld [vmem:[#allocation151_spill] sm:$0xff]  ;;  %v6011_v59 = vld [vmem:[#allocation150_spill] sm:$0xff] }
 0x2a2   : > { %3100 = verf.f32 %v2057_v46  ;;  %v3097_v32 = vpop.eup %3096  ;;  %2837 = vmatmul.mubr.f32.gmra.mxu0 %v2117_v53  ;;  %v2118_v40 = vmul.f32 %v2102_v5, %v2022_v17  ;;  %v1597_v47 = vadd.f32 %v1581_v35, %v1525_v39  ;;  %v1667_v31 = vadd.f32 %v5996_v3, %v1595_v13  ;;  %v6007_v35 = vld [vmem:[#allocation142_spill] sm:$0xff]  ;;  %v6008_v13 = vld [vmem:[#allocation155_spill] sm:$0xff] }
 0x2a3   : > { %v5393_v34 = vadd.f32 %v5997_v14, %v1919_v30  ;;  %v1278_v41 = vrot.slane %v5341_v0, 7  ;;  %v1309_v27 = vsel %vm1108_vm3, 0.0, %v1277_v33  ;;  %v2040_v22 = vmul.f32 0.5, %v5327_v28  ;;  %v6002_v28 = vld [vmem:[#allocation145_spill] sm:$0xff] }
 0x2a4   : > { %v2088_v16 = vadd.f32 1.0, %v3097_v32  ;;  %2839 = vmatprep.mubr.f32.mxu1 %v2118_v40  ;;  %v2024_v51 = vadd.f32 %v2008_v10, %v1952_v57  ;;  %v1810_v49 = vadd.f32 %v1794_v23, %v1738_v42  ;;  %v1921_v44 = vadd.f32 %v5999_v25, %v5998_v52  ;;  %v6003_v10 = vld [vmem:[#allocation54_spill] sm:$0xff]  ;;  %v6009_v57 = vld [vmem:[#allocation156_spill] sm:$0xff]  ;;  %v6012_v32 = vld [vmem:[#allocation153_spill] sm:$0xff] }
 0x2a5   : > { %v2059_v17 = vmul.f32 0.70710677, %v5393_v34  ;;  %2840 = vmatmul.mubr.f32.vlgmr.msra.gmra.mxu1 %v2119_v15  ;;  %v1795_v50 = vmul.f32 %v4108_v36, %v5367_v29  ;;  %v1809_v39 = vadd.f32 %v6000_v21, %v1737_v61  ;;  %v1865_v18 = vmul.f32 %v5773_v2, %v6001_v6  ;;  %v6014_v52 = vld [vmem:[#allocation67_spill] sm:$0xff]  ;;  %v6015_v21 = vld [vmem:[#allocation141_spill] sm:$0xff] }
 0x2a6   : > { %v2104_v58 = vmul.f32 %v2088_v16, %v2040_v22  ;;  %v1739_v9 = vadd.f32 %v6002_v28, %v1667_v31  ;;  %v1669_v8 = vadd.f32 %v6003_v10, %v1597_v47  ;;  %v5411_v4 = vadd.f32 %v6004_v20, %v1921_v44  ;;  %v6013_v47 = vld [vmem:[#allocation144_spill] sm:$0xff] }
 0x2a7   : > { %3102 = verf.f32 %v2059_v17  ;;  %v1937_v43 = vmul.f32 %v6005_v37, %v5980_v11  ;;  %v1797_v55 = vmul.f32 %v4108_v36, %v6006_v54  ;;  %v1938_v45 = vmul.f32 %v6005_v37, %v6007_v35 }
 0x2a8   : > { %v2120_v62 = vmul.f32 %v2104_v58, %v2024_v51  ;;  %v1812_v38 = vadd.f32 %v6008_v13, %v1740_v7  ;;  %v1868_v24 = vmul.f32 %v5773_v2, %v1309_v27  ;;  %v1882_v46 = vadd.f32 %v6009_v57, %v1810_v49 }
 0x2a9   : > { %v2061_v23 = vmul.f32 0.70710677, %v5411_v4  ;;  %v1338_v53 = vrot.slane %v5341_v0, 1  ;;  %v1279_v11 = vsel %vm1108_vm3, %v1277_v33, %v1278_v41  ;;  %v1337_v36 = vrot.slane %v5232_v63, 1 }
 0x2aa   : > { %2842 = vmatprep.mubr.f32.mxu1 %v2120_v62  ;;  %v1881_v5 = vadd.f32 %v1865_v18, %v1809_v39  ;;  %v3099_v19 = vpop.eup %3098  ;;  %v1811_v42 = vadd.f32 %v1795_v50, %v1739_v9  ;;  %v1867_v30 = vmul.f32 %v5773_v2, %v6010_v26  ;;  %v1741_v1 = vadd.f32 %v6011_v59, %v1669_v8 }
 0x2ab   : > { %3104 = verf.f32 %v2061_v23  ;;  %v1940_v7 = vmul.f32 %v6005_v37, %v5232_v63  ;;  %v2090_v15 = vadd.f32 1.0, %v3099_v19  ;;  %v1884_v60 = vadd.f32 %v1868_v24, %v1812_v38 }
 0x2ac   : > { %v1954_v61 = vadd.f32 %v1938_v45, %v1882_v46  ;;  %v2010_v33 = vmul.f32 %v5766_v48, %v6012_v32  ;;  %v2042_v40 = vmul.f32 0.5, %v5355_v56  ;;  %v1939_v3 = vmul.f32 %v6005_v37, %v6013_v47 }
 0x2ad   : > { %v1869_v31 = vmul.f32 %v5773_v2, %v1279_v11  ;;  %v1953_v14 = vadd.f32 %v1937_v43, %v1881_v5  ;;  %v2009_v41 = vmul.f32 %v5766_v48, %v5367_v29  ;;  %v1883_v63 = vadd.f32 %v1867_v30, %v1811_v42 }
 0x2ae   : > { %v2106_v22 = vmul.f32 %v2090_v15, %v2042_v40  ;;  %v1339_v16 = vsel %vm1169_vm7, %v1337_v36, %v1338_v53  ;;  %v1813_v51 = vadd.f32 %v1797_v55, %v1741_v1  ;;  %v2041_v49 = vmul.f32 0.5, %v5373_v12 }
 0x2af   : > { %v3101_v27 = vpop.eup %3100  ;;  %v2092_v56 = vadd.f32 1.0, %v6014_v52  ;;  %v1941_v25 = vmul.f32 %v6005_v37, %v5341_v0  ;;  %v1956_v44 = vadd.f32 %v1940_v7, %v1884_v60  ;;  %v2026_v2 = vadd.f32 %v2010_v33, %v1954_v61 }
 0x2b0   : > { %v2089_v17 = vadd.f32 1.0, %v3101_v27  ;;  %v2025_v58 = vadd.f32 %v2009_v41, %v1953_v14  ;;  %v2012_v29 = vmul.f32 %v5766_v48, %v1339_v16  ;;  %v2044_v39 = vmul.f32 0.5, %v6015_v21 }
 0x2b1   : > { %v2122_v6 = vmul.f32 %v2106_v22, %v2026_v2  ;;  %v1955_v18 = vadd.f32 %v1939_v3, %v1883_v63  ;;  %v2011_v28 = vmul.f32 %v5766_v48, %v6006_v54  ;;  %v1885_v12 = vadd.f32 %v1869_v31, %v1813_v51 }
 0x2b2   : > { %v2105_v50 = vmul.f32 %v2089_v17, %v2041_v49  ;;  %v1369_v10 = vsel %vm1169_vm7, %v1338_v53, 0.0  ;;  %v2108_v20 = vmul.f32 %v2092_v56, %v2044_v39  ;;  %v2043_v0 = vmul.f32 0.5, %v5393_v34 }
 0x2b3   : > { %v2028_v43 = vadd.f32 %v2012_v29, %v1956_v44  ;;  %v2013_v55 = vmul.f32 %v5766_v48, %v1369_v10  ;;  %v2027_v35 = vadd.f32 %v2011_v28, %v1955_v18  ;;  %v1957_v62 = vadd.f32 %v1941_v25, %v1885_v12  ;;  %v2557_v48 = vld [vmem:[%s6016_s18] ss:$0 sm:$0xff] }
 0x2b4   : > { %v3103_v9 = vpop.eup %3102  ;;  %v2121_v8 = vmul.f32 %v2105_v50, %v2025_v58  ;;  %v2045_v24 = vmul.f32 0.5, %v5411_v4 }
 0x2b5   : > { %v2091_v37 = vadd.f32 1.0, %v3103_v9  ;;  %v2124_v54 = vmul.f32 %v2108_v20, %v2028_v43  ;;  %v2029_v46 = vadd.f32 %v2013_v55, %v1957_v62 }
 0x2b6   : > { %2843 = vmatmul.mubr.f32.gmra.mxu1 %v2121_v8 }
 0x2b7   : > { %2845 = vmatprep.mubr.f32.mxu1 %v2122_v6  ;;  %v2107_v45 = vmul.f32 %v2091_v37, %v2043_v0 }
 0x2b8   : > { %v3105_v13 = vpop.eup %3104 }
 0x2b9   : > { %v2123_v38 = vmul.f32 %v2107_v45, %v2027_v35  ;;  %v2093_v57 = vadd.f32 1.0, %v3105_v13 }
 0x2bb   : > { %2846 = vmatmul.mubr.f32.gmra.mxu1 %v2123_v38  ;;  %v2109_v23 = vmul.f32 %v2093_v57, %v2045_v24 }
 0x2bc   : > { %2848 = vmatprep.mubr.f32.mxu1 %v2124_v54 }
 0x2bd   : > { %v2125_v34 = vmul.f32 %v2109_v23, %v2029_v46 }
 0x2bf   : > { %2849 = vmatmul.mubr.f32.gmra.mxu1 %v2125_v34 }
 0x337   : > { %v2829_v53 = vpop.f32.mrf.mxu0 }
 0x338   : > { %v2221_v11 = vadd.f32 %v2829_v53, %v2557_v48 }
 0x339   : > { %v2215_v36 = vpop.f32.mrf.mxu0 }
 0x33a   : > { %2295 = vst [vmem:[%s5459_s19 + $0x8] sm:$0xff] %v2221_v11  ;;  %v2216_v4 = vadd.f32 %v2557_v48, %v2215_v36 }
 0x33c   : > { %2294 = vst [vmem:[%s5459_s19] sm:$0xff] %v2216_v4 }
 0x34a   : > { %v2832_v5 = vpop.f32.mrf.mxu0 }
 0x34b   : > { %v2231_v19 = vadd.f32 %v2832_v5, %v2557_v48 }
 0x34c   : > { %v2225_v42 = vpop.f32.mrf.mxu0 }
 0x34d   : > { %2297 = vst [vmem:[%s5459_s19 + $0x18] sm:$0xff] %v2231_v19  ;;  %v2226_v26 = vadd.f32 %v2557_v48, %v2225_v42 }
 0x34f   : > { %2296 = vst [vmem:[%s5459_s19 + $0x10] sm:$0xff] %v2226_v26 }
 0x357   : > { %v2835_v30 = vpop.f32.mrf.mxu0 }
 0x358   : > { %v2241_v59 = vadd.f32 %v2835_v30, %v2557_v48 }
 0x359   : > { %v2235_v1 = vpop.f32.mrf.mxu0 }
 0x35a   : > { %2299 = vst [vmem:[%s5459_s19 + $0x28] sm:$0xff] %v2241_v59  ;;  %v2236_v7 = vadd.f32 %v2557_v48, %v2235_v1 }
 0x35c   : > { %2298 = vst [vmem:[%s5459_s19 + $0x20] sm:$0xff] %v2236_v7 }
 0x362   : > { %v2838_v15 = vpop.f32.mrf.mxu0 }
 0x363   : > { %v2251_v60 = vadd.f32 %v2838_v15, %v2557_v48 }
 0x364   : > { %v2245_v61 = vpop.f32.mrf.mxu0 }
 0x365   : > { %2301 = vst [vmem:[%s5459_s19 + $0x38] sm:$0xff] %v2251_v60  ;;  %v2246_v32 = vadd.f32 %v2557_v48, %v2245_v61  ;;  %v2841_v33 = vpop.f32.mrf.mxu1 }
 0x366   : > { %v2261_v40 = vadd.f32 %v2841_v33, %v2557_v48 }
 0x367   : > { %2300 = vst [vmem:[%s5459_s19 + $0x30] sm:$0xff] %v2246_v32  ;;  %v2255_v47 = vpop.f32.mrf.mxu1 }
 0x368   : > { %2303 = vst [vmem:[%s5459_s19 + $0x48] sm:$0xff] %v2261_v40  ;;  %v2256_v3 = vadd.f32 %v2557_v48, %v2255_v47 }
 0x36a   : > { %2302 = vst [vmem:[%s5459_s19 + $0x40] sm:$0xff] %v2256_v3 }
 0x376   : > { %v2844_v31 = vpop.f32.mrf.mxu1 }
 0x377   : > { %v2271_v14 = vadd.f32 %v2844_v31, %v2557_v48 }
 0x378   : > { %v2265_v41 = vpop.f32.mrf.mxu1 }
 0x379   : > { %2305 = vst [vmem:[%s5459_s19 + $0x58] sm:$0xff] %v2271_v14  ;;  %v2266_v27 = vadd.f32 %v2557_v48, %v2265_v41 }
 0x37b   : > { %2304 = vst [vmem:[%s5459_s19 + $0x50] sm:$0xff] %v2266_v27  ;;  %v2847_v22 = vpop.f32.mrf.mxu1 }
 0x37c   : > { %v2281_v63 = vadd.f32 %v2847_v22, %v2557_v48 }
 0x37d   : > { %v2275_v16 = vpop.f32.mrf.mxu1 }
 0x37e   : > { %2307 = vst [vmem:[%s5459_s19 + $0x68] sm:$0xff] %v2281_v63  ;;  %v2276_v51 = vadd.f32 %v2557_v48, %v2275_v16 }
 0x37f   : > { %v2850_v49 = vpop.f32.mrf.mxu1 }
 0x380   : > { %2306 = vst [vmem:[%s5459_s19 + $0x60] sm:$0xff] %v2276_v51  ;;  %v2291_v17 = vadd.f32 %v2850_v49, %v2557_v48 }
 0x381   : > { %v2285_v52 = vpop.f32.mrf.mxu1 }
 0x382   : > { %2309 = vst [vmem:[%s5459_s19 + $0x78] sm:$0xff] %v2291_v17  ;;  %v2286_v56 = vadd.f32 %v2557_v48, %v2285_v52 }
 0x384   : > { %2308 = vst [vmem:[%s5459_s19 + $0x70] sm:$0xff] %v2286_v56 }
 0x385   : > { %3335 = shalt.err (!%p3332_p2)
}
 0x386   : > { %s3336_s6 = scalar_lea.hbm %s5484_s0, 2048  ;;  %s3340_s1 = scalar_lea.hbm %s6019_s8, 8192 }
 0x387   : > { %p3337_p11 = scmp.ne.s32.totalorder %s5484_s0, %s3336_s6  ;;  %p3341_p8 = scmp.lt.s32.totalorder %s5484_s0, %s6019_s8 }
 0x388   : > { %p3342_p1 = scmp.lt.s32.totalorder %s3340_s1, %s3336_s6 }
 0x389   : > { %p3338_p4 = pnand %p3337_p11, %p6020_p0 }
 0x38a   : > { %p3343_p5 = por %p3342_p1, %p3341_p8 }
 0x38b   : > { %p3339_p13 = pneg %p3338_p4 }
 0x38d   : > { %p3344_p7 = pnand %p3343_p5, %p3339_p13 }
 0x38f   : > { %3347 = shalt.err (!%p3344_p7)
}
 0x390   : > { %s3499_s27 = smov 128   ;;  %s3500_s13 = smov 8  }
 0x391   : > { %2909 = dma.vmem_to_hbm [thread:$0]  (%p6020_p0), %s5478_s4, 2048, %s5484_s0, %s2311_s21, %s3499_s27, %s3499_s27, %s3500_s13  }
 0x392 PF: > { %p2952_p6 = scmp.ge.s32.totalorder %s3486_s30, 2  ;;  %s2342_s12 = sand.u32 1, %s3458_s23  }
 0x393   : > { %p6021_p12 = scmp.ne.s32.totalorder %s5691_s2, 0  ;;  %s2343_s5 = scalar_lea.sflag [#allocation4], %s2342_s12 }
 0x395   : > { %p2938_p10 = pnand %p2952_p6, %p6021_p12 }
 0x397   : > { %p2939_p3 = pneg %p2938_p10 }
 0x399   : > { %3429 = dma.done.wait (%p2939_p3), %s2343_s5, 2048  }
 0x39a   : > { %3431 = vsyncadd (%p2939_p3), %s2343_s5, 4294965248  ;;  %s33_s30 = sadd.s32 1, %s3486_s30   ;;  %s6023_s17 = sld [smem:[#allocation25_spill]] }
 0x39b   : > { %p5515_p9 = scmp.ge.s32.totalorder %s33_s30, 6   ;;  %s6024_s18 = sld [smem:[#allocation26_spill]] }
 0x39c   : > { %s6025_s20 = sld [smem:[#allocation27_spill]]  ;;  %s6032_s19 = smov %s6055_s7 }
 0x39d   : > { %s6026_s3 = sld [smem:[#allocation38_spill]]  ;;  %s6033_s21 = smov %s3454_s22 }
 0x39e   : > { %s6027_s2 = sld [smem:[#allocation30_spill]]  ;;  %s6035_s23 = smov %s3462_s24 }
 0x39f   : > { %s6028_s27 = sld [smem:[#allocation31_spill]]  ;;  %s6036_s24 = smov %s3466_s25 }
 0x3a0   : > { %s6029_s28 = sld [smem:[#allocation33_spill]]  ;;  %s6037_s25 = smov %s3794_s26 }
 0x3a1   : > { %s6030_s10 = sld [smem:[#allocation34_spill]] }
 0x3a3   : > { %s6034_s22 = smov %s6026_s3  ;;  %32 = sbr.rel (!%p5515_p9) target bundleno = 28 (0x1c), region = 153 }
 0x3a4   : > { %s6038_s26 = smov %s6027_s2 }
 0x3a7   : > { %s6039_s29 = smov %s6030_s10 }
 0x3a8   :  { %2348 = vsyncpa [#allocation3], 1 }
 0x3a9   :  { %2350 = vsyncpa [#allocation3 + $0x1], 1 }
 0x3aa   :  { %2351 = vsyncpa [#allocation6], 1 }
 0x3ab   :  { %2353 = vsyncpa [#allocation6 + $0x1], 1 }
 0x3ac   :  { %2354 = vsyncpa [#allocation9], 1 }
 0x3ad   :  { %2355 = vsyncpa [#allocation12], 1 }
 0x3ae   :  { %2356 = vsyncpa [#allocation15], 1 }
 0x3af   :  { %2357 = vsyncpa [#allocation4], 1 }
 0x3b0   :  { %2359 = vsyncpa [#allocation4 + $0x1], 1 }

</bundles_post_ra>
